<compile_context>
chip_gen: v7x
topology: tpu7x:2x2x1
jax: 0.10.0
libtpu: 0.0.40
codegen_flags: <defaults>
</compile_context>

<pallas_src>
import functools

import jax
import jax.numpy as jnp
import numpy as np
from jax import lax
from jax.experimental import pallas as pl
from jax.experimental.pallas import tpu as pltpu


def _round_up(x, m):
    return (x + m - 1) // m * m


def _sigmoid(x):
    # sigmoid(x) = 0.5 * (tanh(x/2) + 1): one EUP push + cheap VPU ops.
    return 0.5 * (jnp.tanh(0.5 * x) + 1.0)


def repeat_autoencoder_kernel(
    x_ref,        # (S, Bt, Din)   cd    time-major input, one batch tile
    e_wih_ref,    # (Din, 4*Hp)    cd    encoder W_ih^T (per-gate zero padded)
    e_whh_ref,    # (Hp,  4*Hp)    cd    encoder W_hh^T
    e_b_ref,      # (1,   4*Hp)    f32   encoder b_ih + b_hh
    d_wih_ref,    # (Hp,  4*Hp)    cd    decoder W_ih^T
    d_whh_ref,    # (Hp,  4*Hp)    cd    decoder W_hh^T
    d_b_ref,      # (1,   4*Hp)    f32   decoder b_ih + b_hh
    fc_w_ref,     # (Hp,  Op)      cd    fc weight^T
    fc_b_ref,     # (1,   Op)      f32   fc bias
    out_ref,      # (S, Bt, Op)    f32
    xp_ref,       # (S, Bt, 4*Hp)  cd    scratch: hoisted encoder input proj
    h_all_ref,    # (S, Bt, Hp)    cd    scratch: decoder hidden states
    dec_in_ref,   # (Bt, 4*Hp)     f32   scratch: hoisted decoder input proj
    *,
    seq_len,
    batch_tile,
    hidden,
    compute_dtype,
    unroll,
):
    S, Bt, Hp = seq_len, batch_tile, hidden
    cd = compute_dtype
    f32 = jnp.float32
    Din = x_ref.shape[-1]
    Op = out_ref.shape[-1]

    def lstm_cell(gates, c):
        # PyTorch gate order i, f, g, o; each gate spans full 128-lane tiles.
        # TODO(synk): when 4*H <= 128, pack gates contiguously into one lane
        # tile instead of per-gate padding to 128 (4x less gate work).
        i = _sigmoid(gates[:, 0 * Hp:1 * Hp])
        f = _sigmoid(gates[:, 1 * Hp:2 * Hp])
        g = jnp.tanh(gates[:, 2 * Hp:3 * Hp])
        o = _sigmoid(gates[:, 3 * Hp:4 * Hp])
        c_new = f * c + i * g
        h_new = o * jnp.tanh(c_new)
        return h_new, c_new

    # ---- hoisted encoder input projection: one big MXU matmul ---------------
    # (Bt % 8 == 0 so merging the leading dims is layout-free.)
    x2 = x_ref[...].reshape(S * Bt, Din)
    xp = (jnp.dot(x2, e_wih_ref[...], preferred_element_type=f32)
          + e_b_ref[...])
    xp_ref[...] = xp.reshape(S, Bt, 4 * Hp).astype(xp_ref.dtype)

    h0 = jnp.zeros((Bt, Hp), f32)
    c0 = jnp.zeros((Bt, Hp), f32)

    # ---- encoder recurrence (only the recurrent matmul stays in the loop) ---
    def enc_step(t, carry):
        h, c = carry
        gates = xp_ref[t].astype(f32) + jnp.dot(
            h.astype(cd), e_whh_ref[...], preferred_element_type=f32)
        return lstm_cell(gates, c)

    h_enc, _ = lax.fori_loop(0, S, enc_step, (h0, c0), unroll=unroll)

    # ---- decoder: repeated input -> hoist its projection to one matmul ------
    dec_in_ref[...] = (
        jnp.dot(h_enc.astype(cd), d_wih_ref[...], preferred_element_type=f32)
        + d_b_ref[...]
    )

    def dec_step(t, carry):
        h, c = carry
        gates = dec_in_ref[...] + jnp.dot(
            h.astype(cd), d_whh_ref[...], preferred_element_type=f32)
        h_new, c_new = lstm_cell(gates, c)
        h_all_ref[t] = h_new.astype(h_all_ref.dtype)
        return h_new, c_new

    lax.fori_loop(0, S, dec_step, (h0, c0), unroll=unroll)

    # ---- fc head: one big matmul + a single lane-dense store ----------------
    h2 = h_all_ref[...].reshape(S * Bt, Hp)
    y = (jnp.dot(h2, fc_w_ref[...], preferred_element_type=f32)
         + fc_b_ref[...])
    out_ref[...] = y.reshape(S, Bt, Op).astype(out_ref.dtype)


def _pad_gates_last(w, H, Hp):
    """Pad the trailing 4H (i|f|g|o) axis to 4Hp, padding each gate separately."""
    lead = w.shape[:-1]
    w = w.reshape(lead + (4, H))
    w = jnp.pad(w, [(0, 0)] * len(lead) + [(0, 0), (0, Hp - H)])
    return w.reshape(lead + (4 * Hp,))


def _vmem_limit_bytes():
    cap = None
    try:
        info = pltpu.get_tpu_info()
        cap = getattr(info, "vmem_capacity_bytes", None)
    except Exception:
        cap = None
    if not cap:
        cap = 64 * 1024 * 1024  # conservative (v7x-sized) fallback
    # leave headroom for compiler-internal scratch; cap even on 128 MiB parts.
    return int(min(cap * 0.85, 100 * 1024 * 1024))


def repeat_autoencoder_forward(x, params, *, compute_dtype=jnp.bfloat16):
    """x: (B, S, input_dim) batch_first, like the PyTorch module."""
    B, S, Din = x.shape
    H = params["e_whh_t"].shape[0]
    Dout = params["fc_w_t"].shape[1]

    Hp = _round_up(H, 128)      # each LSTM gate on full 128-lane tiles
    Op = _round_up(Dout, 128)   # lane-dense output store

    f32 = jnp.float32
    cd = compute_dtype
    cdb = jnp.dtype(cd).itemsize
    align = 8 if cdb == 4 else 16       # sublane tile of the compute dtype

    vmem_limit = _vmem_limit_bytes()

    # ---- batch tile: as large as VMEM allows (fills MXU rows per step) ------
    def _tile_bytes(bt):
        xp = S * bt * 4 * Hp * cdb              # hoisted encoder input proj
        h_all = S * bt * Hp * cdb               # decoder hidden states
        dec_in = bt * 4 * Hp * 4                # hoisted decoder input proj
        xblk = 2 * S * bt * max(Din, 128) * cdb     # double-buffered x block
        oblk = 2 * S * bt * Op * 4                  # double-buffered out block
        return xp + h_all + dec_in + xblk + oblk

    Bt = min(_round_up(B, align), 256)
    while Bt > align and _tile_bytes(Bt) > int(vmem_limit * 0.6):
        Bt -= align
    # TODO(synk): if even Bt==align overflows (very long S on v7x), chunk the
    # hoisted encoder projection over S instead of reverting to per-step proj.
    Bpad = _round_up(B, Bt)
    n_tiles = Bpad // Bt

    # ---- zero-pad parameters (keeps padded hidden units exactly zero) -------
    e_wih = _pad_gates_last(params["e_wih_t"].astype(f32), H, Hp).astype(cd)
    e_whh = jnp.pad(_pad_gates_last(params["e_whh_t"].astype(f32), H, Hp),
                    [(0, Hp - H), (0, 0)]).astype(cd)
    e_b = _pad_gates_last(params["e_b"].astype(f32), H, Hp)
    d_wih = jnp.pad(_pad_gates_last(params["d_wih_t"].astype(f32), H, Hp),
                    [(0, Hp - H), (0, 0)]).astype(cd)
    d_whh = jnp.pad(_pad_gates_last(params["d_whh_t"].astype(f32), H, Hp),
                    [(0, Hp - H), (0, 0)]).astype(cd)
    d_b = _pad_gates_last(params["d_b"].astype(f32), H, Hp)
    fc_w = jnp.pad(params["fc_w_t"].astype(f32),
                   [(0, Hp - H), (0, Op - Dout)]).astype(cd)
    fc_b = jnp.pad(params["fc_b"].astype(f32), [(0, 0), (0, Op - Dout)])

    # ---- time-major, batch-padded input, cast to the matmul dtype -----------
    # TODO(synk): fold this (B,S,D)->(S,B,D) transpose into the kernel once a
    # time-axis grid exists, to drop one XLA pass over x.
    x_tm = jnp.transpose(x.astype(cd), (1, 0, 2))            # (S, B, Din)
    x_tm = jnp.pad(x_tm, [(0, 0), (0, Bpad - B), (0, 0)])    # (S, Bpad, Din)

    unroll = True if S <= 32 else 8

    kernel = functools.partial(
        repeat_autoencoder_kernel,
        seq_len=S, batch_tile=Bt, hidden=Hp,
        compute_dtype=cd, unroll=unroll,
    )

    const2 = lambda i: (0, 0)
    out = pl.pallas_call(
        kernel,
        grid=(n_tiles,),
        out_shape=jax.ShapeDtypeStruct((S, Bpad, Op), jnp.float32),
        in_specs=[
            pl.BlockSpec((S, Bt, Din), lambda i: (0, i, 0)),   # x (batch tiles)
            pl.BlockSpec((Din, 4 * Hp), const2),               # e_wih (resident)
            pl.BlockSpec((Hp, 4 * Hp), const2),                # e_whh
            pl.BlockSpec((1, 4 * Hp), const2),                 # e_b
            pl.BlockSpec((Hp, 4 * Hp), const2),                # d_wih
            pl.BlockSpec((Hp, 4 * Hp), const2),                # d_whh
            pl.BlockSpec((1, 4 * Hp), const2),                 # d_b
            pl.BlockSpec((Hp, Op), const2),                    # fc_w
            pl.BlockSpec((1, Op), const2),                     # fc_b
        ],
        out_specs=pl.BlockSpec((S, Bt, Op), lambda i: (0, i, 0)),
        scratch_shapes=[
            pltpu.VMEM((S, Bt, 4 * Hp), cd),        # hoisted encoder input proj
            pltpu.VMEM((S, Bt, Hp), cd),            # decoder hidden states
            pltpu.VMEM((Bt, 4 * Hp), jnp.float32),  # hoisted decoder input proj
        ],
        compiler_params=pltpu.CompilerParams(
            dimension_semantics=("parallel",),
            vmem_limit_bytes=vmem_limit,
        ),
    )(x_tm, e_wih, e_whh, e_b, d_wih, d_whh, d_b, fc_w, fc_b)

    out = out[:, :B, :Dout]                    # strip batch / lane padding
    return jnp.transpose(out, (1, 0, 2))       # (B, S, Dout)


# --------------------- pure-JAX reference for verification ---------------------
def _ref_lstm(x_seq, wih_t, whh_t, b, H):
    B = x_seq.shape[1]
    h = jnp.zeros((B, H), jnp.float32)
    c = jnp.zeros((B, H), jnp.float32)
    outs = []
    for t in range(x_seq.shape[0]):
        gates = x_seq[t] @ wih_t + h @ whh_t + b
        i = jax.nn.sigmoid(gates[:, 0:H])
        f = jax.nn.sigmoid(gates[:, H:2 * H])
        g = jnp.tanh(gates[:, 2 * H:3 * H])
        o = jax.nn.sigmoid(gates[:, 3 * H:4 * H])
        c = f * c + i * g
        h = o * jnp.tanh(c)
        outs.append(h)
    return jnp.stack(outs), h


def _reference(x, p):
    B, S, _ = x.shape
    H = p["e_whh_t"].shape[0]
    x_tm = jnp.transpose(x, (1, 0, 2))
    _, h_enc = _ref_lstm(x_tm, p["e_wih_t"], p["e_whh_t"], p["e_b"], H)
    dec_in = jnp.broadcast_to(h_enc[None], (S, B, H))
    dec_out, _ = _ref_lstm(dec_in, p["d_wih_t"], p["d_whh_t"], p["d_b"], H)
    y = dec_out @ p["fc_w_t"] + p["fc_b"]
    return jnp.transpose(y, (1, 0, 2))


def make_params(key, input_dim, hidden_dim, output_dim):
    """Deterministic init mimicking PyTorch's uniform(-1/sqrt(H), 1/sqrt(H))."""
    ks = jax.random.split(key, 11)
    s = 1.0 / np.sqrt(hidden_dim)
    u = lambda k, shape: jax.random.uniform(k, shape, jnp.float32, -s, s)
    H4 = 4 * hidden_dim
    return {
        # encoder LSTM (weights stored transposed for x @ W)
        "e_wih_t": u(ks[0], (input_dim, H4)),
        "e_whh_t": u(ks[1], (hidden_dim, H4)),
        "e_b":     u(ks[2], (1, H4)) + u(ks[3], (1, H4)),   # b_ih + b_hh
        # decoder LSTM
        "d_wih_t": u(ks[4], (hidden_dim, H4)),
        "d_whh_t": u(ks[5], (hidden_dim, H4)),
        "d_b":     u(ks[6], (1, H4)) + u(ks[7], (1, H4)),
        # fc
        "fc_w_t":  u(ks[8], (hidden_dim, output_dim)),
        "fc_b":    u(ks[9], (1, output_dim)),
    }


if __name__ == "__main__":
    B, S = 2, 8
    input_dim, hidden_dim, output_dim = 4, 32, 4

    key = jax.random.PRNGKey(0)
    kx, kp = jax.random.split(key)
    x = jax.random.normal(kx, (B, S, input_dim), jnp.float32)
    params = make_params(kp, input_dim, hidden_dim, output_dim)

    y_ref = jax.block_until_ready(_reference(x, params))

    # f32 MXU operands: matches the PyTorch math tightly.
    y_f32 = jax.block_until_ready(
        repeat_autoencoder_forward(x, params, compute_dtype=jnp.float32))
    assert y_f32.shape == (B, S, output_dim)
    np.testing.assert_allclose(np.asarray(y_f32), np.asarray(y_ref),
                               rtol=1e-4, atol=1e-4)

    # default path: bf16 MXU operands (f32 accumulation, gate math & state);
    # bf16 rounding compounds through the recurrence -> loose tolerance.
    y_bf16 = jax.block_until_ready(repeat_autoencoder_forward(x, params))
    assert y_bf16.shape == (B, S, output_dim)
    np.testing.assert_allclose(np.asarray(y_bf16), np.asarray(y_ref),
                               rtol=5e-2, atol=5e-2)

    print("KERNEL_OK")
</pallas_src>

<mosaic_0001>
module attributes {stable_mosaic.version = 11 : i64} {
  func.func @repeat_autoencoder_kernel(%arg0: i32, %arg1: memref<8x8x4xf32, #tpu.memory_space<vmem>>, %arg2: memref<4x512xf32, #tpu.memory_space<vmem>>, %arg3: memref<128x512xf32, #tpu.memory_space<vmem>>, %arg4: memref<1x512xf32, #tpu.memory_space<vmem>>, %arg5: memref<128x512xf32, #tpu.memory_space<vmem>>, %arg6: memref<128x512xf32, #tpu.memory_space<vmem>>, %arg7: memref<1x512xf32, #tpu.memory_space<vmem>>, %arg8: memref<128x128xf32, #tpu.memory_space<vmem>>, %arg9: memref<1x128xf32, #tpu.memory_space<vmem>>, %arg10: memref<8x8x128xf32, #tpu.memory_space<vmem>>, %arg11: memref<8x8x512xf32, #tpu.memory_space<vmem>>, %arg12: memref<8x8x128xf32, #tpu.memory_space<vmem>>, %arg13: memref<8x512xf32, #tpu.memory_space<vmem>>) attributes {dimension_semantics = [#tpu.dimension_semantics<parallel>], iteration_bounds = array<i64: 1>, scalar_prefetch = 0 : i64, scratch_operands = 3 : i64, tpu.core_type = #tpu.core_type<tc>, window_params = [{transform_indices = @transform_0, window_bounds = array<i64: 8, 8, 4>}, {pipeline_mode = #tpu.pipeline_mode<synchronous>, transform_indices = @transform_1, window_bounds = array<i64: 4, 512>}, {pipeline_mode = #tpu.pipeline_mode<synchronous>, transform_indices = @transform_2, window_bounds = array<i64: 128, 512>}, {pipeline_mode = #tpu.pipeline_mode<synchronous>, transform_indices = @transform_3, window_bounds = array<i64: 1, 512>}, {pipeline_mode = #tpu.pipeline_mode<synchronous>, transform_indices = @transform_4, window_bounds = array<i64: 128, 512>}, {pipeline_mode = #tpu.pipeline_mode<synchronous>, transform_indices = @transform_5, window_bounds = array<i64: 128, 512>}, {pipeline_mode = #tpu.pipeline_mode<synchronous>, transform_indices = @transform_6, window_bounds = array<i64: 1, 512>}, {pipeline_mode = #tpu.pipeline_mode<synchronous>, transform_indices = @transform_7, window_bounds = array<i64: 128, 128>}, {pipeline_mode = #tpu.pipeline_mode<synchronous>, transform_indices = @transform_8, window_bounds = array<i64: 1, 128>}, {transform_indices = @transform_9, window_bounds = array<i64: 8, 8, 128>}]} {
    %c0 = arith.constant 0 : index
    %c0_0 = arith.constant 0 : index
    %c0_1 = arith.constant 0 : index
    %0 = vector.load %arg1[%c0, %c0_0, %c0_1] : memref<8x8x4xf32, #tpu.memory_space<vmem>>, vector<8x8x4xf32>
    %1 = vector.shape_cast %0 : vector<8x8x4xf32> to vector<64x4xf32>
    %c0_2 = arith.constant 0 : index
    %c0_3 = arith.constant 0 : index
    %2 = vector.load %arg2[%c0_2, %c0_3] : memref<4x512xf32, #tpu.memory_space<vmem>>, vector<4x512xf32>
    %cst = arith.constant dense<0.000000e+00> : vector<64x512xf32>
    %3 = tpu.matmul %1, %2, %cst {dimension_numbers = #tpu.dot_dimension_numbers<[1], [0], [0], [1], [0, 0, 1, 1], [], []>} : vector<64x4xf32>, vector<4x512xf32>, vector<64x512xf32> -> vector<64x512xf32>
    %c0_4 = arith.constant 0 : index
    %c0_5 = arith.constant 0 : index
    %4 = vector.load %arg4[%c0_4, %c0_5] : memref<1x512xf32, #tpu.memory_space<vmem>>, vector<1x512xf32>
    %5 = vector.broadcast %4 : vector<1x512xf32> to vector<64x512xf32>
    %6 = arith.addf %3, %5 : vector<64x512xf32>
    %7 = vector.shape_cast %6 : vector<64x512xf32> to vector<8x8x512xf32>
    %c0_6 = arith.constant 0 : index
    %c0_7 = arith.constant 0 : index
    %c0_8 = arith.constant 0 : index
    %8 = vector.load %arg11[%c0_6, %c0_7, %c0_8] : memref<8x8x512xf32, #tpu.memory_space<vmem>>, vector<8x8x512xf32>
    tpu.vector_store %arg11[%c0_6, %c0_7, %c0_8], %7 {strides = array<i32>} : memref<8x8x512xf32, #tpu.memory_space<vmem>>, vector<8x8x512xf32>,
    %cst_9 = arith.constant 0.000000e+00 : f32
    %9 = vector.broadcast %cst_9 : f32 to vector<8x128xf32>
    %cst_10 = arith.constant 0.000000e+00 : f32
    %10 = vector.broadcast %cst_10 : f32 to vector<8x128xf32>
    %c0_i32 = arith.constant 0 : i32
    %11 = arith.index_cast %c0_i32 : i32 to index
    %c0_11 = arith.constant 0 : index
    %c0_12 = arith.constant 0 : index
    %12 = vector.load %arg11[%11, %c0_11, %c0_12] : memref<8x8x512xf32, #tpu.memory_space<vmem>>, vector<1x8x512xf32>
    %13 = vector.shape_cast %12 : vector<1x8x512xf32> to vector<8x512xf32>
    %c0_13 = arith.constant 0 : index
    %c0_14 = arith.constant 0 : index
    %14 = vector.load %arg3[%c0_13, %c0_14] : memref<128x512xf32, #tpu.memory_space<vmem>>, vector<128x512xf32>
    %cst_15 = arith.constant dense<0.000000e+00> : vector<8x512xf32>
    %15 = tpu.matmul %9, %14, %cst_15 {dimension_numbers = #tpu.dot_dimension_numbers<[1], [0], [0], [1], [0, 0, 1, 1], [], []>} : vector<8x128xf32>, vector<128x512xf32>, vector<8x512xf32> -> vector<8x512xf32>
    %16 = arith.addf %13, %15 : vector<8x512xf32>
    %17 = vector.extract_strided_slice %16 {offsets = [0, 0], sizes = [8, 128], strides = [1, 1]} : vector<8x512xf32> to vector<8x128xf32>
    %cst_16 = arith.constant 5.000000e-01 : f32
    %18 = vector.broadcast %cst_16 : f32 to vector<8x128xf32>
    %19 = arith.mulf %18, %17 : vector<8x128xf32>
    %20 = math.tanh %19 : vector<8x128xf32>
    %cst_17 = arith.constant 1.000000e+00 : f32
    %21 = vector.broadcast %cst_17 : f32 to vector<8x128xf32>
    %22 = arith.addf %20, %21 : vector<8x128xf32>
    %cst_18 = arith.constant 5.000000e-01 : f32
    %23 = vector.broadcast %cst_18 : f32 to vector<8x128xf32>
    %24 = arith.mulf %23, %22 : vector<8x128xf32>
    %25 = vector.extract_strided_slice %16 {offsets = [0, 128], sizes = [8, 128], strides = [1, 1]} : vector<8x512xf32> to vector<8x128xf32>
    %cst_19 = arith.constant 5.000000e-01 : f32
    %26 = vector.broadcast %cst_19 : f32 to vector<8x128xf32>
    %27 = arith.mulf %26, %25 : vector<8x128xf32>
    %28 = math.tanh %27 : vector<8x128xf32>
    %cst_20 = arith.constant 1.000000e+00 : f32
    %29 = vector.broadcast %cst_20 : f32 to vector<8x128xf32>
    %30 = arith.addf %28, %29 : vector<8x128xf32>
    %cst_21 = arith.constant 5.000000e-01 : f32
    %31 = vector.broadcast %cst_21 : f32 to vector<8x128xf32>
    %32 = arith.mulf %31, %30 : vector<8x128xf32>
    %33 = vector.extract_strided_slice %16 {offsets = [0, 256], sizes = [8, 128], strides = [1, 1]} : vector<8x512xf32> to vector<8x128xf32>
    %34 = math.tanh %33 : vector<8x128xf32>
    %35 = vector.extract_strided_slice %16 {offsets = [0, 384], sizes = [8, 128], strides = [1, 1]} : vector<8x512xf32> to vector<8x128xf32>
    %cst_22 = arith.constant 5.000000e-01 : f32
    %36 = vector.broadcast %cst_22 : f32 to vector<8x128xf32>
    %37 = arith.mulf %36, %35 : vector<8x128xf32>
    %38 = math.tanh %37 : vector<8x128xf32>
    %cst_23 = arith.constant 1.000000e+00 : f32
    %39 = vector.broadcast %cst_23 : f32 to vector<8x128xf32>
    %40 = arith.addf %38, %39 : vector<8x128xf32>
    %cst_24 = arith.constant 5.000000e-01 : f32
    %41 = vector.broadcast %cst_24 : f32 to vector<8x128xf32>
    %42 = arith.mulf %41, %40 : vector<8x128xf32>
    %43 = arith.mulf %32, %10 : vector<8x128xf32>
    %44 = arith.mulf %24, %34 : vector<8x128xf32>
    %45 = arith.addf %43, %44 : vector<8x128xf32>
    %46 = math.tanh %45 : vector<8x128xf32>
    %47 = arith.mulf %42, %46 : vector<8x128xf32>
    %c1_i32 = arith.constant 1 : i32
    %48 = arith.index_cast %c1_i32 : i32 to index
    %c0_25 = arith.constant 0 : index
    %c0_26 = arith.constant 0 : index
    %49 = vector.load %arg11[%48, %c0_25, %c0_26] : memref<8x8x512xf32, #tpu.memory_space<vmem>>, vector<1x8x512xf32>
    %50 = vector.shape_cast %49 : vector<1x8x512xf32> to vector<8x512xf32>
    %c0_27 = arith.constant 0 : index
    %c0_28 = arith.constant 0 : index
    %51 = vector.load %arg3[%c0_27, %c0_28] : memref<128x512xf32, #tpu.memory_space<vmem>>, vector<128x512xf32>
    %cst_29 = arith.constant dense<0.000000e+00> : vector<8x512xf32>
    %52 = tpu.matmul %47, %51, %cst_29 {dimension_numbers = #tpu.dot_dimension_numbers<[1], [0], [0], [1], [0, 0, 1, 1], [], []>} : vector<8x128xf32>, vector<128x512xf32>, vector<8x512xf32> -> vector<8x512xf32>
    %53 = arith.addf %50, %52 : vector<8x512xf32>
    %54 = vector.extract_strided_slice %53 {offsets = [0, 0], sizes = [8, 128], strides = [1, 1]} : vector<8x512xf32> to vector<8x128xf32>
    %cst_30 = arith.constant 5.000000e-01 : f32
    %55 = vector.broadcast %cst_30 : f32 to vector<8x128xf32>
    %56 = arith.mulf %55, %54 : vector<8x128xf32>
    %57 = math.tanh %56 : vector<8x128xf32>
    %cst_31 = arith.constant 1.000000e+00 : f32
    %58 = vector.broadcast %cst_31 : f32 to vector<8x128xf32>
    %59 = arith.addf %57, %58 : vector<8x128xf32>
    %cst_32 = arith.constant 5.000000e-01 : f32
    %60 = vector.broadcast %cst_32 : f32 to vector<8x128xf32>
    %61 = arith.mulf %60, %59 : vector<8x128xf32>
    %62 = vector.extract_strided_slice %53 {offsets = [0, 128], sizes = [8, 128], strides = [1, 1]} : vector<8x512xf32> to vector<8x128xf32>
    %cst_33 = arith.constant 5.000000e-01 : f32
    %63 = vector.broadcast %cst_33 : f32 to vector<8x128xf32>
    %64 = arith.mulf %63, %62 : vector<8x128xf32>
    %65 = math.tanh %64 : vector<8x128xf32>
    %cst_34 = arith.constant 1.000000e+00 : f32
    %66 = vector.broadcast %cst_34 : f32 to vector<8x128xf32>
    %67 = arith.addf %65, %66 : vector<8x128xf32>
    %cst_35 = arith.constant 5.000000e-01 : f32
    %68 = vector.broadcast %cst_35 : f32 to vector<8x128xf32>
    %69 = arith.mulf %68, %67 : vector<8x128xf32>
    %70 = vector.extract_strided_slice %53 {offsets = [0, 256], sizes = [8, 128], strides = [1, 1]} : vector<8x512xf32> to vector<8x128xf32>
    %71 = math.tanh %70 : vector<8x128xf32>
    %72 = vector.extract_strided_slice %53 {offsets = [0, 384], sizes = [8, 128], strides = [1, 1]} : vector<8x512xf32> to vector<8x128xf32>
    %cst_36 = arith.constant 5.000000e-01 : f32
    %73 = vector.broadcast %cst_36 : f32 to vector<8x128xf32>
    %74 = arith.mulf %73, %72 : vector<8x128xf32>
    %75 = math.tanh %74 : vector<8x128xf32>
    %cst_37 = arith.constant 1.000000e+00 : f32
    %76 = vector.broadcast %cst_37 : f32 to vector<8x128xf32>
    %77 = arith.addf %75, %76 : vector<8x128xf32>
    %cst_38 = arith.constant 5.000000e-01 : f32
    %78 = vector.broadcast %cst_38 : f32 to vector<8x128xf32>
    %79 = arith.mulf %78, %77 : vector<8x128xf32>
    %80 = arith.mulf %69, %45 : vector<8x128xf32>
    %81 = arith.mulf %61, %71 : vector<8x128xf32>
    %82 = arith.addf %80, %81 : vector<8x128xf32>
    %83 = math.tanh %82 : vector<8x128xf32>
    %84 = arith.mulf %79, %83 : vector<8x128xf32>
    %c2_i32 = arith.constant 2 : i32
    %85 = arith.index_cast %c2_i32 : i32 to index
    %c0_39 = arith.constant 0 : index
    %c0_40 = arith.constant 0 : index
    %86 = vector.load %arg11[%85, %c0_39, %c0_40] : memref<8x8x512xf32, #tpu.memory_space<vmem>>, vector<1x8x512xf32>
    %87 = vector.shape_cast %86 : vector<1x8x512xf32> to vector<8x512xf32>
    %c0_41 = arith.constant 0 : index
    %c0_42 = arith.constant 0 : index
    %88 = vector.load %arg3[%c0_41, %c0_42] : memref<128x512xf32, #tpu.memory_space<vmem>>, vector<128x512xf32>
    %cst_43 = arith.constant dense<0.000000e+00> : vector<8x512xf32>
    %89 = tpu.matmul %84, %88, %cst_43 {dimension_numbers = #tpu.dot_dimension_numbers<[1], [0], [0], [1], [0, 0, 1, 1], [], []>} : vector<8x128xf32>, vector<128x512xf32>, vector<8x512xf32> -> vector<8x512xf32>
    %90 = arith.addf %87, %89 : vector<8x512xf32>
    %91 = vector.extract_strided_slice %90 {offsets = [0, 0], sizes = [8, 128], strides = [1, 1]} : vector<8x512xf32> to vector<8x128xf32>
    %cst_44 = arith.constant 5.000000e-01 : f32
    %92 = vector.broadcast %cst_44 : f32 to vector<8x128xf32>
    %93 = arith.mulf %92, %91 : vector<8x128xf32>
    %94 = math.tanh %93 : vector<8x128xf32>
    %cst_45 = arith.constant 1.000000e+00 : f32
    %95 = vector.broadcast %cst_45 : f32 to vector<8x128xf32>
    %96 = arith.addf %94, %95 : vector<8x128xf32>
    %cst_46 = arith.constant 5.000000e-01 : f32
    %97 = vector.broadcast %cst_46 : f32 to vector<8x128xf32>
    %98 = arith.mulf %97, %96 : vector<8x128xf32>
    %99 = vector.extract_strided_slice %90 {offsets = [0, 128], sizes = [8, 128], strides = [1, 1]} : vector<8x512xf32> to vector<8x128xf32>
    %cst_47 = arith.constant 5.000000e-01 : f32
    %100 = vector.broadcast %cst_47 : f32 to vector<8x128xf32>
    %101 = arith.mulf %100, %99 : vector<8x128xf32>
    %102 = math.tanh %101 : vector<8x128xf32>
    %cst_48 = arith.constant 1.000000e+00 : f32
    %103 = vector.broadcast %cst_48 : f32 to vector<8x128xf32>
    %104 = arith.addf %102, %103 : vector<8x128xf32>
    %cst_49 = arith.constant 5.000000e-01 : f32
    %105 = vector.broadcast %cst_49 : f32 to vector<8x128xf32>
    %106 = arith.mulf %105, %104 : vector<8x128xf32>
    %107 = vector.extract_strided_slice %90 {offsets = [0, 256], sizes = [8, 128], strides = [1, 1]} : vector<8x512xf32> to vector<8x128xf32>
    %108 = math.tanh %107 : vector<8x128xf32>
    %109 = vector.extract_strided_slice %90 {offsets = [0, 384], sizes = [8, 128], strides = [1, 1]} : vector<8x512xf32> to vector<8x128xf32>
    %cst_50 = arith.constant 5.000000e-01 : f32
    %110 = vector.broadcast %cst_50 : f32 to vector<8x128xf32>
    %111 = arith.mulf %110, %109 : vector<8x128xf32>
    %112 = math.tanh %111 : vector<8x128xf32>
    %cst_51 = arith.constant 1.000000e+00 : f32
    %113 = vector.broadcast %cst_51 : f32 to vector<8x128xf32>
    %114 = arith.addf %112, %113 : vector<8x128xf32>
    %cst_52 = arith.constant 5.000000e-01 : f32
    %115 = vector.broadcast %cst_52 : f32 to vector<8x128xf32>
    %116 = arith.mulf %115, %114 : vector<8x128xf32>
    %117 = arith.mulf %106, %82 : vector<8x128xf32>
    %118 = arith.mulf %98, %108 : vector<8x128xf32>
    %119 = arith.addf %117, %118 : vector<8x128xf32>
    %120 = math.tanh %119 : vector<8x128xf32>
    %121 = arith.mulf %116, %120 : vector<8x128xf32>
    %c3_i32 = arith.constant 3 : i32
    %122 = arith.index_cast %c3_i32 : i32 to index
    %c0_53 = arith.constant 0 : index
    %c0_54 = arith.constant 0 : index
    %123 = vector.load %arg11[%122, %c0_53, %c0_54] : memref<8x8x512xf32, #tpu.memory_space<vmem>>, vector<1x8x512xf32>
    %124 = vector.shape_cast %123 : vector<1x8x512xf32> to vector<8x512xf32>
    %c0_55 = arith.constant 0 : index
    %c0_56 = arith.constant 0 : index
    %125 = vector.load %arg3[%c0_55, %c0_56] : memref<128x512xf32, #tpu.memory_space<vmem>>, vector<128x512xf32>
    %cst_57 = arith.constant dense<0.000000e+00> : vector<8x512xf32>
    %126 = tpu.matmul %121, %125, %cst_57 {dimension_numbers = #tpu.dot_dimension_numbers<[1], [0], [0], [1], [0, 0, 1, 1], [], []>} : vector<8x128xf32>, vector<128x512xf32>, vector<8x512xf32> -> vector<8x512xf32>
    %127 = arith.addf %124, %126 : vector<8x512xf32>
    %128 = vector.extract_strided_slice %127 {offsets = [0, 0], sizes = [8, 128], strides = [1, 1]} : vector<8x512xf32> to vector<8x128xf32>
    %cst_58 = arith.constant 5.000000e-01 : f32
    %129 = vector.broadcast %cst_58 : f32 to vector<8x128xf32>
    %130 = arith.mulf %129, %128 : vector<8x128xf32>
    %131 = math.tanh %130 : vector<8x128xf32>
    %cst_59 = arith.constant 1.000000e+00 : f32
    %132 = vector.broadcast %cst_59 : f32 to vector<8x128xf32>
    %133 = arith.addf %131, %132 : vector<8x128xf32>
    %cst_60 = arith.constant 5.000000e-01 : f32
    %134 = vector.broadcast %cst_60 : f32 to vector<8x128xf32>
    %135 = arith.mulf %134, %133 : vector<8x128xf32>
    %136 = vector.extract_strided_slice %127 {offsets = [0, 128], sizes = [8, 128], strides = [1, 1]} : vector<8x512xf32> to vector<8x128xf32>
    %cst_61 = arith.constant 5.000000e-01 : f32
    %137 = vector.broadcast %cst_61 : f32 to vector<8x128xf32>
    %138 = arith.mulf %137, %136 : vector<8x128xf32>
    %139 = math.tanh %138 : vector<8x128xf32>
    %cst_62 = arith.constant 1.000000e+00 : f32
    %140 = vector.broadcast %cst_62 : f32 to vector<8x128xf32>
    %141 = arith.addf %139, %140 : vector<8x128xf32>
    %cst_63 = arith.constant 5.000000e-01 : f32
    %142 = vector.broadcast %cst_63 : f32 to vector<8x128xf32>
    %143 = arith.mulf %142, %141 : vector<8x128xf32>
    %144 = vector.extract_strided_slice %127 {offsets = [0, 256], sizes = [8, 128], strides = [1, 1]} : vector<8x512xf32> to vector<8x128xf32>
    %145 = math.tanh %144 : vector<8x128xf32>
    %146 = vector.extract_strided_slice %127 {offsets = [0, 384], sizes = [8, 128], strides = [1, 1]} : vector<8x512xf32> to vector<8x128xf32>
    %cst_64 = arith.constant 5.000000e-01 : f32
    %147 = vector.broadcast %cst_64 : f32 to vector<8x128xf32>
    %148 = arith.mulf %147, %146 : vector<8x128xf32>
    %149 = math.tanh %148 : vector<8x128xf32>
    %cst_65 = arith.constant 1.000000e+00 : f32
    %150 = vector.broadcast %cst_65 : f32 to vector<8x128xf32>
    %151 = arith.addf %149, %150 : vector<8x128xf32>
    %cst_66 = arith.constant 5.000000e-01 : f32
    %152 = vector.broadcast %cst_66 : f32 to vector<8x128xf32>
    %153 = arith.mulf %152, %151 : vector<8x128xf32>
    %154 = arith.mulf %143, %119 : vector<8x128xf32>
    %155 = arith.mulf %135, %145 : vector<8x128xf32>
    %156 = arith.addf %154, %155 : vector<8x128xf32>
    %157 = math.tanh %156 : vector<8x128xf32>
    %158 = arith.mulf %153, %157 : vector<8x128xf32>
    %c4_i32 = arith.constant 4 : i32
    %159 = arith.index_cast %c4_i32 : i32 to index
    %c0_67 = arith.constant 0 : index
    %c0_68 = arith.constant 0 : index
    %160 = vector.load %arg11[%159, %c0_67, %c0_68] : memref<8x8x512xf32, #tpu.memory_space<vmem>>, vector<1x8x512xf32>
    %161 = vector.shape_cast %160 : vector<1x8x512xf32> to vector<8x512xf32>
    %c0_69 = arith.constant 0 : index
    %c0_70 = arith.constant 0 : index
    %162 = vector.load %arg3[%c0_69, %c0_70] : memref<128x512xf32, #tpu.memory_space<vmem>>, vector<128x512xf32>
    %cst_71 = arith.constant dense<0.000000e+00> : vector<8x512xf32>
    %163 = tpu.matmul %158, %162, %cst_71 {dimension_numbers = #tpu.dot_dimension_numbers<[1], [0], [0], [1], [0, 0, 1, 1], [], []>} : vector<8x128xf32>, vector<128x512xf32>, vector<8x512xf32> -> vector<8x512xf32>
    %164 = arith.addf %161, %163 : vector<8x512xf32>
    %165 = vector.extract_strided_slice %164 {offsets = [0, 0], sizes = [8, 128], strides = [1, 1]} : vector<8x512xf32> to vector<8x128xf32>
    %cst_72 = arith.constant 5.000000e-01 : f32
    %166 = vector.broadcast %cst_72 : f32 to vector<8x128xf32>
    %167 = arith.mulf %166, %165 : vector<8x128xf32>
    %168 = math.tanh %167 : vector<8x128xf32>
    %cst_73 = arith.constant 1.000000e+00 : f32
    %169 = vector.broadcast %cst_73 : f32 to vector<8x128xf32>
    %170 = arith.addf %168, %169 : vector<8x128xf32>
    %cst_74 = arith.constant 5.000000e-01 : f32
    %171 = vector.broadcast %cst_74 : f32 to vector<8x128xf32>
    %172 = arith.mulf %171, %170 : vector<8x128xf32>
    %173 = vector.extract_strided_slice %164 {offsets = [0, 128], sizes = [8, 128], strides = [1, 1]} : vector<8x512xf32> to vector<8x128xf32>
    %cst_75 = arith.constant 5.000000e-01 : f32
    %174 = vector.broadcast %cst_75 : f32 to vector<8x128xf32>
    %175 = arith.mulf %174, %173 : vector<8x128xf32>
    %176 = math.tanh %175 : vector<8x128xf32>
    %cst_76 = arith.constant 1.000000e+00 : f32
    %177 = vector.broadcast %cst_76 : f32 to vector<8x128xf32>
    %178 = arith.addf %176, %177 : vector<8x128xf32>
    %cst_77 = arith.constant 5.000000e-01 : f32
    %179 = vector.broadcast %cst_77 : f32 to vector<8x128xf32>
    %180 = arith.mulf %179, %178 : vector<8x128xf32>
    %181 = vector.extract_strided_slice %164 {offsets = [0, 256], sizes = [8, 128], strides = [1, 1]} : vector<8x512xf32> to vector<8x128xf32>
    %182 = math.tanh %181 : vector<8x128xf32>
    %183 = vector.extract_strided_slice %164 {offsets = [0, 384], sizes = [8, 128], strides = [1, 1]} : vector<8x512xf32> to vector<8x128xf32>
    %cst_78 = arith.constant 5.000000e-01 : f32
    %184 = vector.broadcast %cst_78 : f32 to vector<8x128xf32>
    %185 = arith.mulf %184, %183 : vector<8x128xf32>
    %186 = math.tanh %185 : vector<8x128xf32>
    %cst_79 = arith.constant 1.000000e+00 : f32
    %187 = vector.broadcast %cst_79 : f32 to vector<8x128xf32>
    %188 = arith.addf %186, %187 : vector<8x128xf32>
    %cst_80 = arith.constant 5.000000e-01 : f32
    %189 = vector.broadcast %cst_80 : f32 to vector<8x128xf32>
    %190 = arith.mulf %189, %188 : vector<8x128xf32>
    %191 = arith.mulf %180, %156 : vector<8x128xf32>
    %192 = arith.mulf %172, %182 : vector<8x128xf32>
    %193 = arith.addf %191, %192 : vector<8x128xf32>
    %194 = math.tanh %193 : vector<8x128xf32>
    %195 = arith.mulf %190, %194 : vector<8x128xf32>
    %c5_i32 = arith.constant 5 : i32
    %196 = arith.index_cast %c5_i32 : i32 to index
    %c0_81 = arith.constant 0 : index
    %c0_82 = arith.constant 0 : index
    %197 = vector.load %arg11[%196, %c0_81, %c0_82] : memref<8x8x512xf32, #tpu.memory_space<vmem>>, vector<1x8x512xf32>
    %198 = vector.shape_cast %197 : vector<1x8x512xf32> to vector<8x512xf32>
    %c0_83 = arith.constant 0 : index
    %c0_84 = arith.constant 0 : index
    %199 = vector.load %arg3[%c0_83, %c0_84] : memref<128x512xf32, #tpu.memory_space<vmem>>, vector<128x512xf32>
    %cst_85 = arith.constant dense<0.000000e+00> : vector<8x512xf32>
    %200 = tpu.matmul %195, %199, %cst_85 {dimension_numbers = #tpu.dot_dimension_numbers<[1], [0], [0], [1], [0, 0, 1, 1], [], []>} : vector<8x128xf32>, vector<128x512xf32>, vector<8x512xf32> -> vector<8x512xf32>
    %201 = arith.addf %198, %200 : vector<8x512xf32>
    %202 = vector.extract_strided_slice %201 {offsets = [0, 0], sizes = [8, 128], strides = [1, 1]} : vector<8x512xf32> to vector<8x128xf32>
    %cst_86 = arith.constant 5.000000e-01 : f32
    %203 = vector.broadcast %cst_86 : f32 to vector<8x128xf32>
    %204 = arith.mulf %203, %202 : vector<8x128xf32>
    %205 = math.tanh %204 : vector<8x128xf32>
    %cst_87 = arith.constant 1.000000e+00 : f32
    %206 = vector.broadcast %cst_87 : f32 to vector<8x128xf32>
    %207 = arith.addf %205, %206 : vector<8x128xf32>
    %cst_88 = arith.constant 5.000000e-01 : f32
    %208 = vector.broadcast %cst_88 : f32 to vector<8x128xf32>
    %209 = arith.mulf %208, %207 : vector<8x128xf32>
    %210 = vector.extract_strided_slice %201 {offsets = [0, 128], sizes = [8, 128], strides = [1, 1]} : vector<8x512xf32> to vector<8x128xf32>
    %cst_89 = arith.constant 5.000000e-01 : f32
    %211 = vector.broadcast %cst_89 : f32 to vector<8x128xf32>
    %212 = arith.mulf %211, %210 : vector<8x128xf32>
    %213 = math.tanh %212 : vector<8x128xf32>
    %cst_90 = arith.constant 1.000000e+00 : f32
    %214 = vector.broadcast %cst_90 : f32 to vector<8x128xf32>
    %215 = arith.addf %213, %214 : vector<8x128xf32>
    %cst_91 = arith.constant 5.000000e-01 : f32
    %216 = vector.broadcast %cst_91 : f32 to vector<8x128xf32>
    %217 = arith.mulf %216, %215 : vector<8x128xf32>
    %218 = vector.extract_strided_slice %201 {offsets = [0, 256], sizes = [8, 128], strides = [1, 1]} : vector<8x512xf32> to vector<8x128xf32>
    %219 = math.tanh %218 : vector<8x128xf32>
    %220 = vector.extract_strided_slice %201 {offsets = [0, 384], sizes = [8, 128], strides = [1, 1]} : vector<8x512xf32> to vector<8x128xf32>
    %cst_92 = arith.constant 5.000000e-01 : f32
    %221 = vector.broadcast %cst_92 : f32 to vector<8x128xf32>
    %222 = arith.mulf %221, %220 : vector<8x128xf32>
    %223 = math.tanh %222 : vector<8x128xf32>
    %cst_93 = arith.constant 1.000000e+00 : f32
    %224 = vector.broadcast %cst_93 : f32 to vector<8x128xf32>
    %225 = arith.addf %223, %224 : vector<8x128xf32>
    %cst_94 = arith.constant 5.000000e-01 : f32
    %226 = vector.broadcast %cst_94 : f32 to vector<8x128xf32>
    %227 = arith.mulf %226, %225 : vector<8x128xf32>
    %228 = arith.mulf %217, %193 : vector<8x128xf32>
    %229 = arith.mulf %209, %219 : vector<8x128xf32>
    %230 = arith.addf %228, %229 : vector<8x128xf32>
    %231 = math.tanh %230 : vector<8x128xf32>
    %232 = arith.mulf %227, %231 : vector<8x128xf32>
    %c6_i32 = arith.constant 6 : i32
    %233 = arith.index_cast %c6_i32 : i32 to index
    %c0_95 = arith.constant 0 : index
    %c0_96 = arith.constant 0 : index
    %234 = vector.load %arg11[%233, %c0_95, %c0_96] : memref<8x8x512xf32, #tpu.memory_space<vmem>>, vector<1x8x512xf32>
    %235 = vector.shape_cast %234 : vector<1x8x512xf32> to vector<8x512xf32>
    %c0_97 = arith.constant 0 : index
    %c0_98 = arith.constant 0 : index
    %236 = vector.load %arg3[%c0_97, %c0_98] : memref<128x512xf32, #tpu.memory_space<vmem>>, vector<128x512xf32>
    %cst_99 = arith.constant dense<0.000000e+00> : vector<8x512xf32>
    %237 = tpu.matmul %232, %236, %cst_99 {dimension_numbers = #tpu.dot_dimension_numbers<[1], [0], [0], [1], [0, 0, 1, 1], [], []>} : vector<8x128xf32>, vector<128x512xf32>, vector<8x512xf32> -> vector<8x512xf32>
    %238 = arith.addf %235, %237 : vector<8x512xf32>
    %239 = vector.extract_strided_slice %238 {offsets = [0, 0], sizes = [8, 128], strides = [1, 1]} : vector<8x512xf32> to vector<8x128xf32>
    %cst_100 = arith.constant 5.000000e-01 : f32
    %240 = vector.broadcast %cst_100 : f32 to vector<8x128xf32>
    %241 = arith.mulf %240, %239 : vector<8x128xf32>
    %242 = math.tanh %241 : vector<8x128xf32>
    %cst_101 = arith.constant 1.000000e+00 : f32
    %243 = vector.broadcast %cst_101 : f32 to vector<8x128xf32>
    %244 = arith.addf %242, %243 : vector<8x128xf32>
    %cst_102 = arith.constant 5.000000e-01 : f32
    %245 = vector.broadcast %cst_102 : f32 to vector<8x128xf32>
    %246 = arith.mulf %245, %244 : vector<8x128xf32>
    %247 = vector.extract_strided_slice %238 {offsets = [0, 128], sizes = [8, 128], strides = [1, 1]} : vector<8x512xf32> to vector<8x128xf32>
    %cst_103 = arith.constant 5.000000e-01 : f32
    %248 = vector.broadcast %cst_103 : f32 to vector<8x128xf32>
    %249 = arith.mulf %248, %247 : vector<8x128xf32>
    %250 = math.tanh %249 : vector<8x128xf32>
    %cst_104 = arith.constant 1.000000e+00 : f32
    %251 = vector.broadcast %cst_104 : f32 to vector<8x128xf32>
    %252 = arith.addf %250, %251 : vector<8x128xf32>
    %cst_105 = arith.constant 5.000000e-01 : f32
    %253 = vector.broadcast %cst_105 : f32 to vector<8x128xf32>
    %254 = arith.mulf %253, %252 : vector<8x128xf32>
    %255 = vector.extract_strided_slice %238 {offsets = [0, 256], sizes = [8, 128], strides = [1, 1]} : vector<8x512xf32> to vector<8x128xf32>
    %256 = math.tanh %255 : vector<8x128xf32>
    %257 = vector.extract_strided_slice %238 {offsets = [0, 384], sizes = [8, 128], strides = [1, 1]} : vector<8x512xf32> to vector<8x128xf32>
    %cst_106 = arith.constant 5.000000e-01 : f32
    %258 = vector.broadcast %cst_106 : f32 to vector<8x128xf32>
    %259 = arith.mulf %258, %257 : vector<8x128xf32>
    %260 = math.tanh %259 : vector<8x128xf32>
    %cst_107 = arith.constant 1.000000e+00 : f32
    %261 = vector.broadcast %cst_107 : f32 to vector<8x128xf32>
    %262 = arith.addf %260, %261 : vector<8x128xf32>
    %cst_108 = arith.constant 5.000000e-01 : f32
    %263 = vector.broadcast %cst_108 : f32 to vector<8x128xf32>
    %264 = arith.mulf %263, %262 : vector<8x128xf32>
    %265 = arith.mulf %254, %230 : vector<8x128xf32>
    %266 = arith.mulf %246, %256 : vector<8x128xf32>
    %267 = arith.addf %265, %266 : vector<8x128xf32>
    %268 = math.tanh %267 : vector<8x128xf32>
    %269 = arith.mulf %264, %268 : vector<8x128xf32>
    %c7_i32 = arith.constant 7 : i32
    %270 = arith.index_cast %c7_i32 : i32 to index
    %c0_109 = arith.constant 0 : index
    %c0_110 = arith.constant 0 : index
    %271 = vector.load %arg11[%270, %c0_109, %c0_110] : memref<8x8x512xf32, #tpu.memory_space<vmem>>, vector<1x8x512xf32>
    %272 = vector.shape_cast %271 : vector<1x8x512xf32> to vector<8x512xf32>
    %c0_111 = arith.constant 0 : index
    %c0_112 = arith.constant 0 : index
    %273 = vector.load %arg3[%c0_111, %c0_112] : memref<128x512xf32, #tpu.memory_space<vmem>>, vector<128x512xf32>
    %cst_113 = arith.constant dense<0.000000e+00> : vector<8x512xf32>
    %274 = tpu.matmul %269, %273, %cst_113 {dimension_numbers = #tpu.dot_dimension_numbers<[1], [0], [0], [1], [0, 0, 1, 1], [], []>} : vector<8x128xf32>, vector<128x512xf32>, vector<8x512xf32> -> vector<8x512xf32>
    %275 = arith.addf %272, %274 : vector<8x512xf32>
    %276 = vector.extract_strided_slice %275 {offsets = [0, 0], sizes = [8, 128], strides = [1, 1]} : vector<8x512xf32> to vector<8x128xf32>
    %cst_114 = arith.constant 5.000000e-01 : f32
    %277 = vector.broadcast %cst_114 : f32 to vector<8x128xf32>
    %278 = arith.mulf %277, %276 : vector<8x128xf32>
    %279 = math.tanh %278 : vector<8x128xf32>
    %cst_115 = arith.constant 1.000000e+00 : f32
    %280 = vector.broadcast %cst_115 : f32 to vector<8x128xf32>
    %281 = arith.addf %279, %280 : vector<8x128xf32>
    %cst_116 = arith.constant 5.000000e-01 : f32
    %282 = vector.broadcast %cst_116 : f32 to vector<8x128xf32>
    %283 = arith.mulf %282, %281 : vector<8x128xf32>
    %284 = vector.extract_strided_slice %275 {offsets = [0, 128], sizes = [8, 128], strides = [1, 1]} : vector<8x512xf32> to vector<8x128xf32>
    %cst_117 = arith.constant 5.000000e-01 : f32
    %285 = vector.broadcast %cst_117 : f32 to vector<8x128xf32>
    %286 = arith.mulf %285, %284 : vector<8x128xf32>
    %287 = math.tanh %286 : vector<8x128xf32>
    %cst_118 = arith.constant 1.000000e+00 : f32
    %288 = vector.broadcast %cst_118 : f32 to vector<8x128xf32>
    %289 = arith.addf %287, %288 : vector<8x128xf32>
    %cst_119 = arith.constant 5.000000e-01 : f32
    %290 = vector.broadcast %cst_119 : f32 to vector<8x128xf32>
    %291 = arith.mulf %290, %289 : vector<8x128xf32>
    %292 = vector.extract_strided_slice %275 {offsets = [0, 256], sizes = [8, 128], strides = [1, 1]} : vector<8x512xf32> to vector<8x128xf32>
    %293 = math.tanh %292 : vector<8x128xf32>
    %294 = vector.extract_strided_slice %275 {offsets = [0, 384], sizes = [8, 128], strides = [1, 1]} : vector<8x512xf32> to vector<8x128xf32>
    %cst_120 = arith.constant 5.000000e-01 : f32
    %295 = vector.broadcast %cst_120 : f32 to vector<8x128xf32>
    %296 = arith.mulf %295, %294 : vector<8x128xf32>
    %297 = math.tanh %296 : vector<8x128xf32>
    %cst_121 = arith.constant 1.000000e+00 : f32
    %298 = vector.broadcast %cst_121 : f32 to vector<8x128xf32>
    %299 = arith.addf %297, %298 : vector<8x128xf32>
    %cst_122 = arith.constant 5.000000e-01 : f32
    %300 = vector.broadcast %cst_122 : f32 to vector<8x128xf32>
    %301 = arith.mulf %300, %299 : vector<8x128xf32>
    %302 = arith.mulf %291, %267 : vector<8x128xf32>
    %303 = arith.mulf %283, %293 : vector<8x128xf32>
    %304 = arith.addf %302, %303 : vector<8x128xf32>
    %305 = math.tanh %304 : vector<8x128xf32>
    %306 = arith.mulf %301, %305 : vector<8x128xf32>
    %c8_i32 = arith.constant 8 : i32
    %c0_123 = arith.constant 0 : index
    %c0_124 = arith.constant 0 : index
    %307 = vector.load %arg5[%c0_123, %c0_124] : memref<128x512xf32, #tpu.memory_space<vmem>>, vector<128x512xf32>
    %cst_125 = arith.constant dense<0.000000e+00> : vector<8x512xf32>
    %308 = tpu.matmul %306, %307, %cst_125 {dimension_numbers = #tpu.dot_dimension_numbers<[1], [0], [0], [1], [0, 0, 1, 1], [], []>} : vector<8x128xf32>, vector<128x512xf32>, vector<8x512xf32> -> vector<8x512xf32>
    %c0_126 = arith.constant 0 : index
    %c0_127 = arith.constant 0 : index
    %309 = vector.load %arg7[%c0_126, %c0_127] : memref<1x512xf32, #tpu.memory_space<vmem>>, vector<1x512xf32>
    %310 = vector.broadcast %309 : vector<1x512xf32> to vector<8x512xf32>
    %311 = arith.addf %308, %310 : vector<8x512xf32>
    %c0_128 = arith.constant 0 : index
    %c0_129 = arith.constant 0 : index
    %312 = vector.load %arg13[%c0_128, %c0_129] : memref<8x512xf32, #tpu.memory_space<vmem>>, vector<8x512xf32>
    tpu.vector_store %arg13[%c0_128, %c0_129], %311 {strides = array<i32>} : memref<8x512xf32, #tpu.memory_space<vmem>>, vector<8x512xf32>,
    %c0_i32_130 = arith.constant 0 : i32
    %c0_131 = arith.constant 0 : index
    %c0_132 = arith.constant 0 : index
    %313 = vector.load %arg13[%c0_131, %c0_132] : memref<8x512xf32, #tpu.memory_space<vmem>>, vector<8x512xf32>
    %c0_133 = arith.constant 0 : index
    %c0_134 = arith.constant 0 : index
    %314 = vector.load %arg6[%c0_133, %c0_134] : memref<128x512xf32, #tpu.memory_space<vmem>>, vector<128x512xf32>
    %cst_135 = arith.constant dense<0.000000e+00> : vector<8x512xf32>
    %315 = tpu.matmul %9, %314, %cst_135 {dimension_numbers = #tpu.dot_dimension_numbers<[1], [0], [0], [1], [0, 0, 1, 1], [], []>} : vector<8x128xf32>, vector<128x512xf32>, vector<8x512xf32> -> vector<8x512xf32>
    %316 = arith.addf %313, %315 : vector<8x512xf32>
    %317 = vector.extract_strided_slice %316 {offsets = [0, 0], sizes = [8, 128], strides = [1, 1]} : vector<8x512xf32> to vector<8x128xf32>
    %cst_136 = arith.constant 5.000000e-01 : f32
    %318 = vector.broadcast %cst_136 : f32 to vector<8x128xf32>
    %319 = arith.mulf %318, %317 : vector<8x128xf32>
    %320 = math.tanh %319 : vector<8x128xf32>
    %cst_137 = arith.constant 1.000000e+00 : f32
    %321 = vector.broadcast %cst_137 : f32 to vector<8x128xf32>
    %322 = arith.addf %320, %321 : vector<8x128xf32>
    %cst_138 = arith.constant 5.000000e-01 : f32
    %323 = vector.broadcast %cst_138 : f32 to vector<8x128xf32>
    %324 = arith.mulf %323, %322 : vector<8x128xf32>
    %325 = vector.extract_strided_slice %316 {offsets = [0, 128], sizes = [8, 128], strides = [1, 1]} : vector<8x512xf32> to vector<8x128xf32>
    %cst_139 = arith.constant 5.000000e-01 : f32
    %326 = vector.broadcast %cst_139 : f32 to vector<8x128xf32>
    %327 = arith.mulf %326, %325 : vector<8x128xf32>
    %328 = math.tanh %327 : vector<8x128xf32>
    %cst_140 = arith.constant 1.000000e+00 : f32
    %329 = vector.broadcast %cst_140 : f32 to vector<8x128xf32>
    %330 = arith.addf %328, %329 : vector<8x128xf32>
    %cst_141 = arith.constant 5.000000e-01 : f32
    %331 = vector.broadcast %cst_141 : f32 to vector<8x128xf32>
    %332 = arith.mulf %331, %330 : vector<8x128xf32>
    %333 = vector.extract_strided_slice %316 {offsets = [0, 256], sizes = [8, 128], strides = [1, 1]} : vector<8x512xf32> to vector<8x128xf32>
    %334 = math.tanh %333 : vector<8x128xf32>
    %335 = vector.extract_strided_slice %316 {offsets = [0, 384], sizes = [8, 128], strides = [1, 1]} : vector<8x512xf32> to vector<8x128xf32>
    %cst_142 = arith.constant 5.000000e-01 : f32
    %336 = vector.broadcast %cst_142 : f32 to vector<8x128xf32>
    %337 = arith.mulf %336, %335 : vector<8x128xf32>
    %338 = math.tanh %337 : vector<8x128xf32>
    %cst_143 = arith.constant 1.000000e+00 : f32
    %339 = vector.broadcast %cst_143 : f32 to vector<8x128xf32>
    %340 = arith.addf %338, %339 : vector<8x128xf32>
    %cst_144 = arith.constant 5.000000e-01 : f32
    %341 = vector.broadcast %cst_144 : f32 to vector<8x128xf32>
    %342 = arith.mulf %341, %340 : vector<8x128xf32>
    %343 = arith.mulf %332, %10 : vector<8x128xf32>
    %344 = arith.mulf %324, %334 : vector<8x128xf32>
    %345 = arith.addf %343, %344 : vector<8x128xf32>
    %346 = math.tanh %345 : vector<8x128xf32>
    %347 = arith.mulf %342, %346 : vector<8x128xf32>
    %348 = arith.index_cast %c0_i32_130 : i32 to index
    %c0_145 = arith.constant 0 : index
    %c0_146 = arith.constant 0 : index
    %349 = vector.load %arg12[%348, %c0_145, %c0_146] : memref<8x8x128xf32, #tpu.memory_space<vmem>>, vector<1x8x128xf32>
    %350 = vector.shape_cast %349 : vector<1x8x128xf32> to vector<8x128xf32>
    %351 = vector.shape_cast %347 : vector<8x128xf32> to vector<1x8x128xf32>
    tpu.vector_store %arg12[%348, %c0_145, %c0_146], %351 {strides = array<i32>} : memref<8x8x128xf32, #tpu.memory_space<vmem>>, vector<1x8x128xf32>,
    %c1_i32_147 = arith.constant 1 : i32
    %c0_148 = arith.constant 0 : index
    %c0_149 = arith.constant 0 : index
    %352 = vector.load %arg13[%c0_148, %c0_149] : memref<8x512xf32, #tpu.memory_space<vmem>>, vector<8x512xf32>
    %c0_150 = arith.constant 0 : index
    %c0_151 = arith.constant 0 : index
    %353 = vector.load %arg6[%c0_150, %c0_151] : memref<128x512xf32, #tpu.memory_space<vmem>>, vector<128x512xf32>
    %cst_152 = arith.constant dense<0.000000e+00> : vector<8x512xf32>
    %354 = tpu.matmul %347, %353, %cst_152 {dimension_numbers = #tpu.dot_dimension_numbers<[1], [0], [0], [1], [0, 0, 1, 1], [], []>} : vector<8x128xf32>, vector<128x512xf32>, vector<8x512xf32> -> vector<8x512xf32>
    %355 = arith.addf %352, %354 : vector<8x512xf32>
    %356 = vector.extract_strided_slice %355 {offsets = [0, 0], sizes = [8, 128], strides = [1, 1]} : vector<8x512xf32> to vector<8x128xf32>
    %cst_153 = arith.constant 5.000000e-01 : f32
    %357 = vector.broadcast %cst_153 : f32 to vector<8x128xf32>
    %358 = arith.mulf %357, %356 : vector<8x128xf32>
    %359 = math.tanh %358 : vector<8x128xf32>
    %cst_154 = arith.constant 1.000000e+00 : f32
    %360 = vector.broadcast %cst_154 : f32 to vector<8x128xf32>
    %361 = arith.addf %359, %360 : vector<8x128xf32>
    %cst_155 = arith.constant 5.000000e-01 : f32
    %362 = vector.broadcast %cst_155 : f32 to vector<8x128xf32>
    %363 = arith.mulf %362, %361 : vector<8x128xf32>
    %364 = vector.extract_strided_slice %355 {offsets = [0, 128], sizes = [8, 128], strides = [1, 1]} : vector<8x512xf32> to vector<8x128xf32>
    %cst_156 = arith.constant 5.000000e-01 : f32
    %365 = vector.broadcast %cst_156 : f32 to vector<8x128xf32>
    %366 = arith.mulf %365, %364 : vector<8x128xf32>
    %367 = math.tanh %366 : vector<8x128xf32>
    %cst_157 = arith.constant 1.000000e+00 : f32
    %368 = vector.broadcast %cst_157 : f32 to vector<8x128xf32>
    %369 = arith.addf %367, %368 : vector<8x128xf32>
    %cst_158 = arith.constant 5.000000e-01 : f32
    %370 = vector.broadcast %cst_158 : f32 to vector<8x128xf32>
    %371 = arith.mulf %370, %369 : vector<8x128xf32>
    %372 = vector.extract_strided_slice %355 {offsets = [0, 256], sizes = [8, 128], strides = [1, 1]} : vector<8x512xf32> to vector<8x128xf32>
    %373 = math.tanh %372 : vector<8x128xf32>
    %374 = vector.extract_strided_slice %355 {offsets = [0, 384], sizes = [8, 128], strides = [1, 1]} : vector<8x512xf32> to vector<8x128xf32>
    %cst_159 = arith.constant 5.000000e-01 : f32
    %375 = vector.broadcast %cst_159 : f32 to vector<8x128xf32>
    %376 = arith.mulf %375, %374 : vector<8x128xf32>
    %377 = math.tanh %376 : vector<8x128xf32>
    %cst_160 = arith.constant 1.000000e+00 : f32
    %378 = vector.broadcast %cst_160 : f32 to vector<8x128xf32>
    %379 = arith.addf %377, %378 : vector<8x128xf32>
    %cst_161 = arith.constant 5.000000e-01 : f32
    %380 = vector.broadcast %cst_161 : f32 to vector<8x128xf32>
    %381 = arith.mulf %380, %379 : vector<8x128xf32>
    %382 = arith.mulf %371, %345 : vector<8x128xf32>
    %383 = arith.mulf %363, %373 : vector<8x128xf32>
    %384 = arith.addf %382, %383 : vector<8x128xf32>
    %385 = math.tanh %384 : vector<8x128xf32>
    %386 = arith.mulf %381, %385 : vector<8x128xf32>
    %387 = arith.index_cast %c1_i32_147 : i32 to index
    %c0_162 = arith.constant 0 : index
    %c0_163 = arith.constant 0 : index
    %388 = vector.load %arg12[%387, %c0_162, %c0_163] : memref<8x8x128xf32, #tpu.memory_space<vmem>>, vector<1x8x128xf32>
    %389 = vector.shape_cast %388 : vector<1x8x128xf32> to vector<8x128xf32>
    %390 = vector.shape_cast %386 : vector<8x128xf32> to vector<1x8x128xf32>
    tpu.vector_store %arg12[%387, %c0_162, %c0_163], %390 {strides = array<i32>} : memref<8x8x128xf32, #tpu.memory_space<vmem>>, vector<1x8x128xf32>,
    %c2_i32_164 = arith.constant 2 : i32
    %c0_165 = arith.constant 0 : index
    %c0_166 = arith.constant 0 : index
    %391 = vector.load %arg13[%c0_165, %c0_166] : memref<8x512xf32, #tpu.memory_space<vmem>>, vector<8x512xf32>
    %c0_167 = arith.constant 0 : index
    %c0_168 = arith.constant 0 : index
    %392 = vector.load %arg6[%c0_167, %c0_168] : memref<128x512xf32, #tpu.memory_space<vmem>>, vector<128x512xf32>
    %cst_169 = arith.constant dense<0.000000e+00> : vector<8x512xf32>
    %393 = tpu.matmul %386, %392, %cst_169 {dimension_numbers = #tpu.dot_dimension_numbers<[1], [0], [0], [1], [0, 0, 1, 1], [], []>} : vector<8x128xf32>, vector<128x512xf32>, vector<8x512xf32> -> vector<8x512xf32>
    %394 = arith.addf %391, %393 : vector<8x512xf32>
    %395 = vector.extract_strided_slice %394 {offsets = [0, 0], sizes = [8, 128], strides = [1, 1]} : vector<8x512xf32> to vector<8x128xf32>
    %cst_170 = arith.constant 5.000000e-01 : f32
    %396 = vector.broadcast %cst_170 : f32 to vector<8x128xf32>
    %397 = arith.mulf %396, %395 : vector<8x128xf32>
    %398 = math.tanh %397 : vector<8x128xf32>
    %cst_171 = arith.constant 1.000000e+00 : f32
    %399 = vector.broadcast %cst_171 : f32 to vector<8x128xf32>
    %400 = arith.addf %398, %399 : vector<8x128xf32>
    %cst_172 = arith.constant 5.000000e-01 : f32
    %401 = vector.broadcast %cst_172 : f32 to vector<8x128xf32>
    %402 = arith.mulf %401, %400 : vector<8x128xf32>
    %403 = vector.extract_strided_slice %394 {offsets = [0, 128], sizes = [8, 128], strides = [1, 1]} : vector<8x512xf32> to vector<8x128xf32>
    %cst_173 = arith.constant 5.000000e-01 : f32
    %404 = vector.broadcast %cst_173 : f32 to vector<8x128xf32>
    %405 = arith.mulf %404, %403 : vector<8x128xf32>
    %406 = math.tanh %405 : vector<8x128xf32>
    %cst_174 = arith.constant 1.000000e+00 : f32
    %407 = vector.broadcast %cst_174 : f32 to vector<8x128xf32>
    %408 = arith.addf %406, %407 : vector<8x128xf32>
    %cst_175 = arith.constant 5.000000e-01 : f32
    %409 = vector.broadcast %cst_175 : f32 to vector<8x128xf32>
    %410 = arith.mulf %409, %408 : vector<8x128xf32>
    %411 = vector.extract_strided_slice %394 {offsets = [0, 256], sizes = [8, 128], strides = [1, 1]} : vector<8x512xf32> to vector<8x128xf32>
    %412 = math.tanh %411 : vector<8x128xf32>
    %413 = vector.extract_strided_slice %394 {offsets = [0, 384], sizes = [8, 128], strides = [1, 1]} : vector<8x512xf32> to vector<8x128xf32>
    %cst_176 = arith.constant 5.000000e-01 : f32
    %414 = vector.broadcast %cst_176 : f32 to vector<8x128xf32>
    %415 = arith.mulf %414, %413 : vector<8x128xf32>
    %416 = math.tanh %415 : vector<8x128xf32>
    %cst_177 = arith.constant 1.000000e+00 : f32
    %417 = vector.broadcast %cst_177 : f32 to vector<8x128xf32>
    %418 = arith.addf %416, %417 : vector<8x128xf32>
    %cst_178 = arith.constant 5.000000e-01 : f32
    %419 = vector.broadcast %cst_178 : f32 to vector<8x128xf32>
    %420 = arith.mulf %419, %418 : vector<8x128xf32>
    %421 = arith.mulf %410, %384 : vector<8x128xf32>
    %422 = arith.mulf %402, %412 : vector<8x128xf32>
    %423 = arith.addf %421, %422 : vector<8x128xf32>
    %424 = math.tanh %423 : vector<8x128xf32>
    %425 = arith.mulf %420, %424 : vector<8x128xf32>
    %426 = arith.index_cast %c2_i32_164 : i32 to index
    %c0_179 = arith.constant 0 : index
    %c0_180 = arith.constant 0 : index
    %427 = vector.load %arg12[%426, %c0_179, %c0_180] : memref<8x8x128xf32, #tpu.memory_space<vmem>>, vector<1x8x128xf32>
    %428 = vector.shape_cast %427 : vector<1x8x128xf32> to vector<8x128xf32>
    %429 = vector.shape_cast %425 : vector<8x128xf32> to vector<1x8x128xf32>
    tpu.vector_store %arg12[%426, %c0_179, %c0_180], %429 {strides = array<i32>} : memref<8x8x128xf32, #tpu.memory_space<vmem>>, vector<1x8x128xf32>,
    %c3_i32_181 = arith.constant 3 : i32
    %c0_182 = arith.constant 0 : index
    %c0_183 = arith.constant 0 : index
    %430 = vector.load %arg13[%c0_182, %c0_183] : memref<8x512xf32, #tpu.memory_space<vmem>>, vector<8x512xf32>
    %c0_184 = arith.constant 0 : index
    %c0_185 = arith.constant 0 : index
    %431 = vector.load %arg6[%c0_184, %c0_185] : memref<128x512xf32, #tpu.memory_space<vmem>>, vector<128x512xf32>
    %cst_186 = arith.constant dense<0.000000e+00> : vector<8x512xf32>
    %432 = tpu.matmul %425, %431, %cst_186 {dimension_numbers = #tpu.dot_dimension_numbers<[1], [0], [0], [1], [0, 0, 1, 1], [], []>} : vector<8x128xf32>, vector<128x512xf32>, vector<8x512xf32> -> vector<8x512xf32>
    %433 = arith.addf %430, %432 : vector<8x512xf32>
    %434 = vector.extract_strided_slice %433 {offsets = [0, 0], sizes = [8, 128], strides = [1, 1]} : vector<8x512xf32> to vector<8x128xf32>
    %cst_187 = arith.constant 5.000000e-01 : f32
    %435 = vector.broadcast %cst_187 : f32 to vector<8x128xf32>
    %436 = arith.mulf %435, %434 : vector<8x128xf32>
    %437 = math.tanh %436 : vector<8x128xf32>
    %cst_188 = arith.constant 1.000000e+00 : f32
    %438 = vector.broadcast %cst_188 : f32 to vector<8x128xf32>
    %439 = arith.addf %437, %438 : vector<8x128xf32>
    %cst_189 = arith.constant 5.000000e-01 : f32
    %440 = vector.broadcast %cst_189 : f32 to vector<8x128xf32>
    %441 = arith.mulf %440, %439 : vector<8x128xf32>
    %442 = vector.extract_strided_slice %433 {offsets = [0, 128], sizes = [8, 128], strides = [1, 1]} : vector<8x512xf32> to vector<8x128xf32>
    %cst_190 = arith.constant 5.000000e-01 : f32
    %443 = vector.broadcast %cst_190 : f32 to vector<8x128xf32>
    %444 = arith.mulf %443, %442 : vector<8x128xf32>
    %445 = math.tanh %444 : vector<8x128xf32>
    %cst_191 = arith.constant 1.000000e+00 : f32
    %446 = vector.broadcast %cst_191 : f32 to vector<8x128xf32>
    %447 = arith.addf %445, %446 : vector<8x128xf32>
    %cst_192 = arith.constant 5.000000e-01 : f32
    %448 = vector.broadcast %cst_192 : f32 to vector<8x128xf32>
    %449 = arith.mulf %448, %447 : vector<8x128xf32>
    %450 = vector.extract_strided_slice %433 {offsets = [0, 256], sizes = [8, 128], strides = [1, 1]} : vector<8x512xf32> to vector<8x128xf32>
    %451 = math.tanh %450 : vector<8x128xf32>
    %452 = vector.extract_strided_slice %433 {offsets = [0, 384], sizes = [8, 128], strides = [1, 1]} : vector<8x512xf32> to vector<8x128xf32>
    %cst_193 = arith.constant 5.000000e-01 : f32
    %453 = vector.broadcast %cst_193 : f32 to vector<8x128xf32>
    %454 = arith.mulf %453, %452 : vector<8x128xf32>
    %455 = math.tanh %454 : vector<8x128xf32>
    %cst_194 = arith.constant 1.000000e+00 : f32
    %456 = vector.broadcast %cst_194 : f32 to vector<8x128xf32>
    %457 = arith.addf %455, %456 : vector<8x128xf32>
    %cst_195 = arith.constant 5.000000e-01 : f32
    %458 = vector.broadcast %cst_195 : f32 to vector<8x128xf32>
    %459 = arith.mulf %458, %457 : vector<8x128xf32>
    %460 = arith.mulf %449, %423 : vector<8x128xf32>
    %461 = arith.mulf %441, %451 : vector<8x128xf32>
    %462 = arith.addf %460, %461 : vector<8x128xf32>
    %463 = math.tanh %462 : vector<8x128xf32>
    %464 = arith.mulf %459, %463 : vector<8x128xf32>
    %465 = arith.index_cast %c3_i32_181 : i32 to index
    %c0_196 = arith.constant 0 : index
    %c0_197 = arith.constant 0 : index
    %466 = vector.load %arg12[%465, %c0_196, %c0_197] : memref<8x8x128xf32, #tpu.memory_space<vmem>>, vector<1x8x128xf32>
    %467 = vector.shape_cast %466 : vector<1x8x128xf32> to vector<8x128xf32>
    %468 = vector.shape_cast %464 : vector<8x128xf32> to vector<1x8x128xf32>
    tpu.vector_store %arg12[%465, %c0_196, %c0_197], %468 {strides = array<i32>} : memref<8x8x128xf32, #tpu.memory_space<vmem>>, vector<1x8x128xf32>,
    %c4_i32_198 = arith.constant 4 : i32
    %c0_199 = arith.constant 0 : index
    %c0_200 = arith.constant 0 : index
    %469 = vector.load %arg13[%c0_199, %c0_200] : memref<8x512xf32, #tpu.memory_space<vmem>>, vector<8x512xf32>
    %c0_201 = arith.constant 0 : index
    %c0_202 = arith.constant 0 : index
    %470 = vector.load %arg6[%c0_201, %c0_202] : memref<128x512xf32, #tpu.memory_space<vmem>>, vector<128x512xf32>
    %cst_203 = arith.constant dense<0.000000e+00> : vector<8x512xf32>
    %471 = tpu.matmul %464, %470, %cst_203 {dimension_numbers = #tpu.dot_dimension_numbers<[1], [0], [0], [1], [0, 0, 1, 1], [], []>} : vector<8x128xf32>, vector<128x512xf32>, vector<8x512xf32> -> vector<8x512xf32>
    %472 = arith.addf %469, %471 : vector<8x512xf32>
    %473 = vector.extract_strided_slice %472 {offsets = [0, 0], sizes = [8, 128], strides = [1, 1]} : vector<8x512xf32> to vector<8x128xf32>
    %cst_204 = arith.constant 5.000000e-01 : f32
    %474 = vector.broadcast %cst_204 : f32 to vector<8x128xf32>
    %475 = arith.mulf %474, %473 : vector<8x128xf32>
    %476 = math.tanh %475 : vector<8x128xf32>
    %cst_205 = arith.constant 1.000000e+00 : f32
    %477 = vector.broadcast %cst_205 : f32 to vector<8x128xf32>
    %478 = arith.addf %476, %477 : vector<8x128xf32>
    %cst_206 = arith.constant 5.000000e-01 : f32
    %479 = vector.broadcast %cst_206 : f32 to vector<8x128xf32>
    %480 = arith.mulf %479, %478 : vector<8x128xf32>
    %481 = vector.extract_strided_slice %472 {offsets = [0, 128], sizes = [8, 128], strides = [1, 1]} : vector<8x512xf32> to vector<8x128xf32>
    %cst_207 = arith.constant 5.000000e-01 : f32
    %482 = vector.broadcast %cst_207 : f32 to vector<8x128xf32>
    %483 = arith.mulf %482, %481 : vector<8x128xf32>
    %484 = math.tanh %483 : vector<8x128xf32>
    %cst_208 = arith.constant 1.000000e+00 : f32
    %485 = vector.broadcast %cst_208 : f32 to vector<8x128xf32>
    %486 = arith.addf %484, %485 : vector<8x128xf32>
    %cst_209 = arith.constant 5.000000e-01 : f32
    %487 = vector.broadcast %cst_209 : f32 to vector<8x128xf32>
    %488 = arith.mulf %487, %486 : vector<8x128xf32>
    %489 = vector.extract_strided_slice %472 {offsets = [0, 256], sizes = [8, 128], strides = [1, 1]} : vector<8x512xf32> to vector<8x128xf32>
    %490 = math.tanh %489 : vector<8x128xf32>
    %491 = vector.extract_strided_slice %472 {offsets = [0, 384], sizes = [8, 128], strides = [1, 1]} : vector<8x512xf32> to vector<8x128xf32>
    %cst_210 = arith.constant 5.000000e-01 : f32
    %492 = vector.broadcast %cst_210 : f32 to vector<8x128xf32>
    %493 = arith.mulf %492, %491 : vector<8x128xf32>
    %494 = math.tanh %493 : vector<8x128xf32>
    %cst_211 = arith.constant 1.000000e+00 : f32
    %495 = vector.broadcast %cst_211 : f32 to vector<8x128xf32>
    %496 = arith.addf %494, %495 : vector<8x128xf32>
    %cst_212 = arith.constant 5.000000e-01 : f32
    %497 = vector.broadcast %cst_212 : f32 to vector<8x128xf32>
    %498 = arith.mulf %497, %496 : vector<8x128xf32>
    %499 = arith.mulf %488, %462 : vector<8x128xf32>
    %500 = arith.mulf %480, %490 : vector<8x128xf32>
    %501 = arith.addf %499, %500 : vector<8x128xf32>
    %502 = math.tanh %501 : vector<8x128xf32>
    %503 = arith.mulf %498, %502 : vector<8x128xf32>
    %504 = arith.index_cast %c4_i32_198 : i32 to index
    %c0_213 = arith.constant 0 : index
    %c0_214 = arith.constant 0 : index
    %505 = vector.load %arg12[%504, %c0_213, %c0_214] : memref<8x8x128xf32, #tpu.memory_space<vmem>>, vector<1x8x128xf32>
    %506 = vector.shape_cast %505 : vector<1x8x128xf32> to vector<8x128xf32>
    %507 = vector.shape_cast %503 : vector<8x128xf32> to vector<1x8x128xf32>
    tpu.vector_store %arg12[%504, %c0_213, %c0_214], %507 {strides = array<i32>} : memref<8x8x128xf32, #tpu.memory_space<vmem>>, vector<1x8x128xf32>,
    %c5_i32_215 = arith.constant 5 : i32
    %c0_216 = arith.constant 0 : index
    %c0_217 = arith.constant 0 : index
    %508 = vector.load %arg13[%c0_216, %c0_217] : memref<8x512xf32, #tpu.memory_space<vmem>>, vector<8x512xf32>
    %c0_218 = arith.constant 0 : index
    %c0_219 = arith.constant 0 : index
    %509 = vector.load %arg6[%c0_218, %c0_219] : memref<128x512xf32, #tpu.memory_space<vmem>>, vector<128x512xf32>
    %cst_220 = arith.constant dense<0.000000e+00> : vector<8x512xf32>
    %510 = tpu.matmul %503, %509, %cst_220 {dimension_numbers = #tpu.dot_dimension_numbers<[1], [0], [0], [1], [0, 0, 1, 1], [], []>} : vector<8x128xf32>, vector<128x512xf32>, vector<8x512xf32> -> vector<8x512xf32>
    %511 = arith.addf %508, %510 : vector<8x512xf32>
    %512 = vector.extract_strided_slice %511 {offsets = [0, 0], sizes = [8, 128], strides = [1, 1]} : vector<8x512xf32> to vector<8x128xf32>
    %cst_221 = arith.constant 5.000000e-01 : f32
    %513 = vector.broadcast %cst_221 : f32 to vector<8x128xf32>
    %514 = arith.mulf %513, %512 : vector<8x128xf32>
    %515 = math.tanh %514 : vector<8x128xf32>
    %cst_222 = arith.constant 1.000000e+00 : f32
    %516 = vector.broadcast %cst_222 : f32 to vector<8x128xf32>
    %517 = arith.addf %515, %516 : vector<8x128xf32>
    %cst_223 = arith.constant 5.000000e-01 : f32
    %518 = vector.broadcast %cst_223 : f32 to vector<8x128xf32>
    %519 = arith.mulf %518, %517 : vector<8x128xf32>
    %520 = vector.extract_strided_slice %511 {offsets = [0, 128], sizes = [8, 128], strides = [1, 1]} : vector<8x512xf32> to vector<8x128xf32>
    %cst_224 = arith.constant 5.000000e-01 : f32
    %521 = vector.broadcast %cst_224 : f32 to vector<8x128xf32>
    %522 = arith.mulf %521, %520 : vector<8x128xf32>
    %523 = math.tanh %522 : vector<8x128xf32>
    %cst_225 = arith.constant 1.000000e+00 : f32
    %524 = vector.broadcast %cst_225 : f32 to vector<8x128xf32>
    %525 = arith.addf %523, %524 : vector<8x128xf32>
    %cst_226 = arith.constant 5.000000e-01 : f32
    %526 = vector.broadcast %cst_226 : f32 to vector<8x128xf32>
    %527 = arith.mulf %526, %525 : vector<8x128xf32>
    %528 = vector.extract_strided_slice %511 {offsets = [0, 256], sizes = [8, 128], strides = [1, 1]} : vector<8x512xf32> to vector<8x128xf32>
    %529 = math.tanh %528 : vector<8x128xf32>
    %530 = vector.extract_strided_slice %511 {offsets = [0, 384], sizes = [8, 128], strides = [1, 1]} : vector<8x512xf32> to vector<8x128xf32>
    %cst_227 = arith.constant 5.000000e-01 : f32
    %531 = vector.broadcast %cst_227 : f32 to vector<8x128xf32>
    %532 = arith.mulf %531, %530 : vector<8x128xf32>
    %533 = math.tanh %532 : vector<8x128xf32>
    %cst_228 = arith.constant 1.000000e+00 : f32
    %534 = vector.broadcast %cst_228 : f32 to vector<8x128xf32>
    %535 = arith.addf %533, %534 : vector<8x128xf32>
    %cst_229 = arith.constant 5.000000e-01 : f32
    %536 = vector.broadcast %cst_229 : f32 to vector<8x128xf32>
    %537 = arith.mulf %536, %535 : vector<8x128xf32>
    %538 = arith.mulf %527, %501 : vector<8x128xf32>
    %539 = arith.mulf %519, %529 : vector<8x128xf32>
    %540 = arith.addf %538, %539 : vector<8x128xf32>
    %541 = math.tanh %540 : vector<8x128xf32>
    %542 = arith.mulf %537, %541 : vector<8x128xf32>
    %543 = arith.index_cast %c5_i32_215 : i32 to index
    %c0_230 = arith.constant 0 : index
    %c0_231 = arith.constant 0 : index
    %544 = vector.load %arg12[%543, %c0_230, %c0_231] : memref<8x8x128xf32, #tpu.memory_space<vmem>>, vector<1x8x128xf32>
    %545 = vector.shape_cast %544 : vector<1x8x128xf32> to vector<8x128xf32>
    %546 = vector.shape_cast %542 : vector<8x128xf32> to vector<1x8x128xf32>
    tpu.vector_store %arg12[%543, %c0_230, %c0_231], %546 {strides = array<i32>} : memref<8x8x128xf32, #tpu.memory_space<vmem>>, vector<1x8x128xf32>,
    %c6_i32_232 = arith.constant 6 : i32
    %c0_233 = arith.constant 0 : index
    %c0_234 = arith.constant 0 : index
    %547 = vector.load %arg13[%c0_233, %c0_234] : memref<8x512xf32, #tpu.memory_space<vmem>>, vector<8x512xf32>
    %c0_235 = arith.constant 0 : index
    %c0_236 = arith.constant 0 : index
    %548 = vector.load %arg6[%c0_235, %c0_236] : memref<128x512xf32, #tpu.memory_space<vmem>>, vector<128x512xf32>
    %cst_237 = arith.constant dense<0.000000e+00> : vector<8x512xf32>
    %549 = tpu.matmul %542, %548, %cst_237 {dimension_numbers = #tpu.dot_dimension_numbers<[1], [0], [0], [1], [0, 0, 1, 1], [], []>} : vector<8x128xf32>, vector<128x512xf32>, vector<8x512xf32> -> vector<8x512xf32>
    %550 = arith.addf %547, %549 : vector<8x512xf32>
    %551 = vector.extract_strided_slice %550 {offsets = [0, 0], sizes = [8, 128], strides = [1, 1]} : vector<8x512xf32> to vector<8x128xf32>
    %cst_238 = arith.constant 5.000000e-01 : f32
    %552 = vector.broadcast %cst_238 : f32 to vector<8x128xf32>
    %553 = arith.mulf %552, %551 : vector<8x128xf32>
    %554 = math.tanh %553 : vector<8x128xf32>
    %cst_239 = arith.constant 1.000000e+00 : f32
    %555 = vector.broadcast %cst_239 : f32 to vector<8x128xf32>
    %556 = arith.addf %554, %555 : vector<8x128xf32>
    %cst_240 = arith.constant 5.000000e-01 : f32
    %557 = vector.broadcast %cst_240 : f32 to vector<8x128xf32>
    %558 = arith.mulf %557, %556 : vector<8x128xf32>
    %559 = vector.extract_strided_slice %550 {offsets = [0, 128], sizes = [8, 128], strides = [1, 1]} : vector<8x512xf32> to vector<8x128xf32>
    %cst_241 = arith.constant 5.000000e-01 : f32
    %560 = vector.broadcast %cst_241 : f32 to vector<8x128xf32>
    %561 = arith.mulf %560, %559 : vector<8x128xf32>
    %562 = math.tanh %561 : vector<8x128xf32>
    %cst_242 = arith.constant 1.000000e+00 : f32
    %563 = vector.broadcast %cst_242 : f32 to vector<8x128xf32>
    %564 = arith.addf %562, %563 : vector<8x128xf32>
    %cst_243 = arith.constant 5.000000e-01 : f32
    %565 = vector.broadcast %cst_243 : f32 to vector<8x128xf32>
    %566 = arith.mulf %565, %564 : vector<8x128xf32>
    %567 = vector.extract_strided_slice %550 {offsets = [0, 256], sizes = [8, 128], strides = [1, 1]} : vector<8x512xf32> to vector<8x128xf32>
    %568 = math.tanh %567 : vector<8x128xf32>
    %569 = vector.extract_strided_slice %550 {offsets = [0, 384], sizes = [8, 128], strides = [1, 1]} : vector<8x512xf32> to vector<8x128xf32>
    %cst_244 = arith.constant 5.000000e-01 : f32
    %570 = vector.broadcast %cst_244 : f32 to vector<8x128xf32>
    %571 = arith.mulf %570, %569 : vector<8x128xf32>
    %572 = math.tanh %571 : vector<8x128xf32>
    %cst_245 = arith.constant 1.000000e+00 : f32
    %573 = vector.broadcast %cst_245 : f32 to vector<8x128xf32>
    %574 = arith.addf %572, %573 : vector<8x128xf32>
    %cst_246 = arith.constant 5.000000e-01 : f32
    %575 = vector.broadcast %cst_246 : f32 to vector<8x128xf32>
    %576 = arith.mulf %575, %574 : vector<8x128xf32>
    %577 = arith.mulf %566, %540 : vector<8x128xf32>
    %578 = arith.mulf %558, %568 : vector<8x128xf32>
    %579 = arith.addf %577, %578 : vector<8x128xf32>
    %580 = math.tanh %579 : vector<8x128xf32>
    %581 = arith.mulf %576, %580 : vector<8x128xf32>
    %582 = arith.index_cast %c6_i32_232 : i32 to index
    %c0_247 = arith.constant 0 : index
    %c0_248 = arith.constant 0 : index
    %583 = vector.load %arg12[%582, %c0_247, %c0_248] : memref<8x8x128xf32, #tpu.memory_space<vmem>>, vector<1x8x128xf32>
    %584 = vector.shape_cast %583 : vector<1x8x128xf32> to vector<8x128xf32>
    %585 = vector.shape_cast %581 : vector<8x128xf32> to vector<1x8x128xf32>
    tpu.vector_store %arg12[%582, %c0_247, %c0_248], %585 {strides = array<i32>} : memref<8x8x128xf32, #tpu.memory_space<vmem>>, vector<1x8x128xf32>,
    %c7_i32_249 = arith.constant 7 : i32
    %c0_250 = arith.constant 0 : index
    %c0_251 = arith.constant 0 : index
    %586 = vector.load %arg13[%c0_250, %c0_251] : memref<8x512xf32, #tpu.memory_space<vmem>>, vector<8x512xf32>
    %c0_252 = arith.constant 0 : index
    %c0_253 = arith.constant 0 : index
    %587 = vector.load %arg6[%c0_252, %c0_253] : memref<128x512xf32, #tpu.memory_space<vmem>>, vector<128x512xf32>
    %cst_254 = arith.constant dense<0.000000e+00> : vector<8x512xf32>
    %588 = tpu.matmul %581, %587, %cst_254 {dimension_numbers = #tpu.dot_dimension_numbers<[1], [0], [0], [1], [0, 0, 1, 1], [], []>} : vector<8x128xf32>, vector<128x512xf32>, vector<8x512xf32> -> vector<8x512xf32>
    %589 = arith.addf %586, %588 : vector<8x512xf32>
    %590 = vector.extract_strided_slice %589 {offsets = [0, 0], sizes = [8, 128], strides = [1, 1]} : vector<8x512xf32> to vector<8x128xf32>
    %cst_255 = arith.constant 5.000000e-01 : f32
    %591 = vector.broadcast %cst_255 : f32 to vector<8x128xf32>
    %592 = arith.mulf %591, %590 : vector<8x128xf32>
    %593 = math.tanh %592 : vector<8x128xf32>
    %cst_256 = arith.constant 1.000000e+00 : f32
    %594 = vector.broadcast %cst_256 : f32 to vector<8x128xf32>
    %595 = arith.addf %593, %594 : vector<8x128xf32>
    %cst_257 = arith.constant 5.000000e-01 : f32
    %596 = vector.broadcast %cst_257 : f32 to vector<8x128xf32>
    %597 = arith.mulf %596, %595 : vector<8x128xf32>
    %598 = vector.extract_strided_slice %589 {offsets = [0, 128], sizes = [8, 128], strides = [1, 1]} : vector<8x512xf32> to vector<8x128xf32>
    %cst_258 = arith.constant 5.000000e-01 : f32
    %599 = vector.broadcast %cst_258 : f32 to vector<8x128xf32>
    %600 = arith.mulf %599, %598 : vector<8x128xf32>
    %601 = math.tanh %600 : vector<8x128xf32>
    %cst_259 = arith.constant 1.000000e+00 : f32
    %602 = vector.broadcast %cst_259 : f32 to vector<8x128xf32>
    %603 = arith.addf %601, %602 : vector<8x128xf32>
    %cst_260 = arith.constant 5.000000e-01 : f32
    %604 = vector.broadcast %cst_260 : f32 to vector<8x128xf32>
    %605 = arith.mulf %604, %603 : vector<8x128xf32>
    %606 = vector.extract_strided_slice %589 {offsets = [0, 256], sizes = [8, 128], strides = [1, 1]} : vector<8x512xf32> to vector<8x128xf32>
    %607 = math.tanh %606 : vector<8x128xf32>
    %608 = vector.extract_strided_slice %589 {offsets = [0, 384], sizes = [8, 128], strides = [1, 1]} : vector<8x512xf32> to vector<8x128xf32>
    %cst_261 = arith.constant 5.000000e-01 : f32
    %609 = vector.broadcast %cst_261 : f32 to vector<8x128xf32>
    %610 = arith.mulf %609, %608 : vector<8x128xf32>
    %611 = math.tanh %610 : vector<8x128xf32>
    %cst_262 = arith.constant 1.000000e+00 : f32
    %612 = vector.broadcast %cst_262 : f32 to vector<8x128xf32>
    %613 = arith.addf %611, %612 : vector<8x128xf32>
    %cst_263 = arith.constant 5.000000e-01 : f32
    %614 = vector.broadcast %cst_263 : f32 to vector<8x128xf32>
    %615 = arith.mulf %614, %613 : vector<8x128xf32>
    %616 = arith.mulf %605, %579 : vector<8x128xf32>
    %617 = arith.mulf %597, %607 : vector<8x128xf32>
    %618 = arith.addf %616, %617 : vector<8x128xf32>
    %619 = math.tanh %618 : vector<8x128xf32>
    %620 = arith.mulf %615, %619 : vector<8x128xf32>
    %621 = arith.index_cast %c7_i32_249 : i32 to index
    %c0_264 = arith.constant 0 : index
    %c0_265 = arith.constant 0 : index
    %622 = vector.load %arg12[%621, %c0_264, %c0_265] : memref<8x8x128xf32, #tpu.memory_space<vmem>>, vector<1x8x128xf32>
    %623 = vector.shape_cast %622 : vector<1x8x128xf32> to vector<8x128xf32>
    %624 = vector.shape_cast %620 : vector<8x128xf32> to vector<1x8x128xf32>
    tpu.vector_store %arg12[%621, %c0_264, %c0_265], %624 {strides = array<i32>} : memref<8x8x128xf32, #tpu.memory_space<vmem>>, vector<1x8x128xf32>,
    %c8_i32_266 = arith.constant 8 : i32
    %c0_267 = arith.constant 0 : index
    %c0_268 = arith.constant 0 : index
    %c0_269 = arith.constant 0 : index
    %625 = vector.load %arg12[%c0_267, %c0_268, %c0_269] : memref<8x8x128xf32, #tpu.memory_space<vmem>>, vector<8x8x128xf32>
    %626 = vector.shape_cast %625 : vector<8x8x128xf32> to vector<64x128xf32>
    %c0_270 = arith.constant 0 : index
    %c0_271 = arith.constant 0 : index
    %627 = vector.load %arg8[%c0_270, %c0_271] : memref<128x128xf32, #tpu.memory_space<vmem>>, vector<128x128xf32>
    %cst_272 = arith.constant dense<0.000000e+00> : vector<64x128xf32>
    %628 = tpu.matmul %626, %627, %cst_272 {dimension_numbers = #tpu.dot_dimension_numbers<[1], [0], [0], [1], [0, 0, 1, 1], [], []>} : vector<64x128xf32>, vector<128x128xf32>, vector<64x128xf32> -> vector<64x128xf32>
    %c0_273 = arith.constant 0 : index
    %c0_274 = arith.constant 0 : index
    %629 = vector.load %arg9[%c0_273, %c0_274] : memref<1x128xf32, #tpu.memory_space<vmem>>, vector<1x128xf32>
    %630 = vector.broadcast %629 : vector<1x128xf32> to vector<64x128xf32>
    %631 = arith.addf %628, %630 : vector<64x128xf32>
    %632 = vector.shape_cast %631 : vector<64x128xf32> to vector<8x8x128xf32>
    %c0_275 = arith.constant 0 : index
    %c0_276 = arith.constant 0 : index
    %c0_277 = arith.constant 0 : index
    %633 = vector.load %arg10[%c0_275, %c0_276, %c0_277] : memref<8x8x128xf32, #tpu.memory_space<vmem>>, vector<8x8x128xf32>
    tpu.vector_store %arg10[%c0_275, %c0_276, %c0_277], %632 {strides = array<i32>} : memref<8x8x128xf32, #tpu.memory_space<vmem>>, vector<8x8x128xf32>,
    return
  }
  func.func @transform_0(%arg0: i32) -> (i32, i32, i32) {
    %c0_i32 = arith.constant 0 : i32
    %c0_i32_0 = arith.constant 0 : i32
    %c0_i32_1 = arith.constant 0 : i32
    return %c0_i32, %arg0, %c0_i32_0 : i32, i32, i32
  }
  func.func @transform_1(%arg0: i32) -> (i32, i32) {
    %c0_i32 = arith.constant 0 : i32
    %c0_i32_0 = arith.constant 0 : i32
    %c0_i32_1 = arith.constant 0 : i32
    return %c0_i32, %c0_i32_0 : i32, i32
  }
  func.func @transform_2(%arg0: i32) -> (i32, i32) {
    %c0_i32 = arith.constant 0 : i32
    %c0_i32_0 = arith.constant 0 : i32
    %c0_i32_1 = arith.constant 0 : i32
    return %c0_i32, %c0_i32_0 : i32, i32
  }
  func.func @transform_3(%arg0: i32) -> (i32, i32) {
    %c0_i32 = arith.constant 0 : i32
    %c0_i32_0 = arith.constant 0 : i32
    %c0_i32_1 = arith.constant 0 : i32
    return %c0_i32, %c0_i32_0 : i32, i32
  }
  func.func @transform_4(%arg0: i32) -> (i32, i32) {
    %c0_i32 = arith.constant 0 : i32
    %c0_i32_0 = arith.constant 0 : i32
    %c0_i32_1 = arith.constant 0 : i32
    return %c0_i32, %c0_i32_0 : i32, i32
  }
  func.func @transform_5(%arg0: i32) -> (i32, i32) {
    %c0_i32 = arith.constant 0 : i32
    %c0_i32_0 = arith.constant 0 : i32
    %c0_i32_1 = arith.constant 0 : i32
    return %c0_i32, %c0_i32_0 : i32, i32
  }
  func.func @transform_6(%arg0: i32) -> (i32, i32) {
    %c0_i32 = arith.constant 0 : i32
    %c0_i32_0 = arith.constant 0 : i32
    %c0_i32_1 = arith.constant 0 : i32
    return %c0_i32, %c0_i32_0 : i32, i32
  }
  func.func @transform_7(%arg0: i32) -> (i32, i32) {
    %c0_i32 = arith.constant 0 : i32
    %c0_i32_0 = arith.constant 0 : i32
    %c0_i32_1 = arith.constant 0 : i32
    return %c0_i32, %c0_i32_0 : i32, i32
  }
  func.func @transform_8(%arg0: i32) -> (i32, i32) {
    %c0_i32 = arith.constant 0 : i32
    %c0_i32_0 = arith.constant 0 : i32
    %c0_i32_1 = arith.constant 0 : i32
    return %c0_i32, %c0_i32_0 : i32, i32
  }
  func.func @transform_9(%arg0: i32) -> (i32, i32, i32) {
    %c0_i32 = arith.constant 0 : i32
    %c0_i32_0 = arith.constant 0 : i32
    %c0_i32_1 = arith.constant 0 : i32
    return %c0_i32, %arg0, %c0_i32_0 : i32, i32, i32
  }
}

</mosaic_0001>

<bundles_post_ra>
// kernel: tpu_custom_call.1
= control target key start
LH: loop header
LB: loop body
LE: loop exit
PB: predicated region body
PF: predicated region fallthrough
CT: control target
= control target key end

     0   :  { %14 = vsyncpa [#allocation6], 0  ;;  %s6830_s0 = inlined_call_operand.vmem [shape: f32[8,8,4], index: 0, kind: input, shape index: {}]   ;;  %s6831_s1 = inlined_call_operand.vmem [shape: f32[4,512], index: 1, kind: input, shape index: {}]   ;;  %s6832_s2 = inlined_call_operand.hbm [shape: f32[128,512], index: 2, kind: input, shape index: {}]   ;;  %s6833_s3 = inlined_call_operand.vmem [shape: f32[1,512], index: 3, kind: input, shape index: {}]   ;;  %s6834_s4 = inlined_call_operand.hbm [shape: f32[128,512], index: 4, kind: input, shape index: {}]   ;;  %s6835_s5 = inlined_call_operand.hbm [shape: f32[128,512], index: 5, kind: input, shape index: {}]   ;;  %s6836_s6 = inlined_call_operand.vmem [shape: f32[1,512], index: 6, kind: input, shape index: {}]   ;;  %s6837_s7 = inlined_call_operand.hbm [shape: f32[128,128], index: 7, kind: input, shape index: {}]   ;;  %s6838_s8 = inlined_call_operand.vmem [shape: f32[1,128], index: 8, kind: input, shape index: {}]   ;;  %s6839_s9 = inlined_call_operand.hbm [shape: f32[8,8,128], index: 9, kind: output, shape index: {}]  }
   0x1   :  { %15 = vsyncpa [#allocation9], 0 }
   0x2   :  { %16 = vsyncpa [#allocation12], 0 }
   0x3   :  { %17 = vsyncpa [#allocation7], 0  ;;  %s5660_s30 = smov [#allocation8]   ;;  %s5661_s11 = smov [#allocation5]  }
   0x4   :  { %s41_s10 = sshll.u32 %s5660_s30, 4  ;;  %s27_s12 = sshll.u32 %s5661_s11, 4  ;;  %s42_s10 = int_to_ptr.vmem [resolvable:$true] %s41_s10  ;;  %s5720_s12 = int_to_ptr.vmem [resolvable:$true] %s27_s12 }
   0x5   :  { %s5542_s15 = scalar_lea.hbm %s6834_s4, 8192 }
   0x6   :  { %p5543_p0 = scmp.ne.s32.totalorder %s6834_s4, %s5542_s15  ;;  %p5546_p1 = scmp.lt.u32.totalorder %s5542_s15, %s6834_s4 }
   0x8   :  { %p5548_p2 = pnand %p5546_p1, %p5543_p0 }
   0xa   :  { %5551 = shalt.err (!%p5548_p2)
}
   0xb   :  { %s5552_s20 = scalar_lea.vmem %s42_s10, 8192  ;;  %p5557_p4 = scmp.lt.s32.totalorder %s42_s10, %s42_s10 }
   0xc   :  { %p5553_p3 = scmp.ne.s32.totalorder %s42_s10, %s5552_s20  ;;  %p5558_p5 = scmp.lt.s32.totalorder %s5552_s20, %s5552_s20 }
   0xe   :  { %p5559_p6 = por %p5558_p5, %p5557_p4 }
  0x10   :  { %p5560_p7 = pnand %p5559_p6, %p5553_p3 }
  0x12   :  { %5563 = shalt.err (!%p5560_p7)
}
  0x13   :  { %s5662_s21 = smov 512   ;;  %s5663_s22 = smov 32  }
  0x14   :  { %47 = dma.hbm_to_vmem [thread:$0]  %s6834_s4, 8192, %s42_s10, [#allocation9], %s5662_s21, %s5662_s21, %s5663_s22  }
  0x15   :  { %s5564_s27 = scalar_lea.hbm %s6832_s2, 8192 }
  0x16   :  { %p5565_p8 = scmp.ne.s32.totalorder %s6832_s2, %s5564_s27  ;;  %p5568_p9 = scmp.lt.u32.totalorder %s5564_s27, %s6832_s2 }
  0x18   :  { %p5570_p10 = pnand %p5568_p9, %p5565_p8 }
  0x1a   :  { %5573 = shalt.err (!%p5570_p10)
}
  0x1b   :  { %s5574_s13 = scalar_lea.vmem %s5720_s12, 8192  ;;  %p5579_p12 = scmp.lt.s32.totalorder %s5720_s12, %s5720_s12 }
  0x1c   :  { %p5575_p11 = scmp.ne.s32.totalorder %s5720_s12, %s5574_s13  ;;  %p5580_p13 = scmp.lt.s32.totalorder %s5574_s13, %s5574_s13 }
  0x1e   :  { %p5581_p0 = por %p5580_p13, %p5579_p12 }
  0x20   :  { %p5582_p1 = pnand %p5581_p0, %p5575_p11 }
  0x22   :  { %5585 = shalt.err (!%p5582_p1)
}
  0x23   :  { %33 = dma.hbm_to_vmem [thread:$0]  %s6832_s2, 8192, %s5720_s12, [#allocation6], %s5662_s21, %s5662_s21, %s5663_s22  }
  0x24   :  { %s5664_s14 = smov [#allocation10]   ;;  %s5665_s16 = smov [#allocation11]  }
  0x25   :  { %s53_s15 = sshll.u32 %s5664_s14, 4  ;;  %s67_s17 = sshll.u32 %s5665_s16, 4  ;;  %s54_s15 = int_to_ptr.vmem [resolvable:$true] %s53_s15  ;;  %s5757_s17 = int_to_ptr.vmem [resolvable:$true] %s67_s17 }
  0x26   :  { %s5586_s20 = scalar_lea.hbm %s6835_s5, 8192 }
  0x27   :  { %p5587_p2 = scmp.ne.s32.totalorder %s6835_s5, %s5586_s20  ;;  %p5590_p3 = scmp.lt.u32.totalorder %s5586_s20, %s6835_s5 }
  0x29   :  { %p5592_p4 = pnand %p5590_p3, %p5587_p2 }
  0x2b   :  { %5595 = shalt.err (!%p5592_p4)
}
  0x2c   :  { %s5596_s2 = scalar_lea.vmem %s54_s15, 8192  ;;  %p5601_p6 = scmp.lt.s32.totalorder %s54_s15, %s54_s15 }
  0x2d   :  { %p5597_p5 = scmp.ne.s32.totalorder %s54_s15, %s5596_s2  ;;  %p5602_p7 = scmp.lt.s32.totalorder %s5596_s2, %s5596_s2 }
  0x2f   :  { %p5603_p8 = por %p5602_p7, %p5601_p6 }
  0x31   :  { %p5604_p9 = pnand %p5603_p8, %p5597_p5 }
  0x33   :  { %5607 = shalt.err (!%p5604_p9)
}
  0x34   :  { %59 = dma.hbm_to_vmem [thread:$0]  %s6835_s5, 8192, %s54_s15, [#allocation9], %s5662_s21, %s5662_s21, %s5663_s22  }
  0x35   :  { %s5608_s30 = scalar_lea.hbm %s6837_s7, 2048 }
  0x36   :  { %p5609_p10 = scmp.ne.s32.totalorder %s6837_s7, %s5608_s30  ;;  %p5612_p11 = scmp.lt.u32.totalorder %s5608_s30, %s6837_s7 }
  0x38   :  { %p5614_p12 = pnand %p5612_p11, %p5609_p10 }
  0x3a   :  { %5617 = shalt.err (!%p5614_p12)
}
  0x3b   :  { %s5618_s14 = scalar_lea.vmem %s5757_s17, 2048  ;;  %p5623_p0 = scmp.lt.s32.totalorder %s5757_s17, %s5757_s17 }
  0x3c   :  { %p5619_p13 = scmp.ne.s32.totalorder %s5757_s17, %s5618_s14  ;;  %p5624_p1 = scmp.lt.s32.totalorder %s5618_s14, %s5618_s14 }
  0x3e   :  { %p5625_p2 = por %p5624_p1, %p5623_p0 }
  0x40   :  { %p5626_p3 = pnand %p5625_p2, %p5619_p13 }
  0x42   :  { %5629 = shalt.err (!%p5626_p3)
}
  0x43   :  { %s5666_s5 = smov 128   ;;  %s5667_s21 = smov 8  }
  0x44   :  { %73 = dma.hbm_to_vmem [thread:$0]  %s6837_s7, 2048, %s5757_s17, [#allocation12], %s5666_s5, %s5666_s5, %s5667_s21  }
  0x45   :  { %5652 = dma.done.wait [#allocation6], 8192  }
  0x46   :  { %5653 = vsyncadd [#allocation6], 4294959104 }
  0x47   :  { %5654 = dma.done.wait [#allocation9], 16384  }
  0x48   :  { %5655 = vsyncadd [#allocation9], 4294950912 }
  0x49   :  { %5656 = dma.done.wait [#allocation12], 2048  }
  0x4a   :  { %5657 = vsyncadd [#allocation12], 4294965248  ;;  %v5668_v0 = vmov 0.0   ;;  %v97_v1 = vld [vmem:[%s6831_s1 + $0x8] sm:$0xff]  ;;  %vm149_vm0 = vcmask 1043456   ;;  %v420_v5 = vld [vmem:[#allocation5] sm:$0xff] }
  0x4b   :  { %335 = vmatprep.mubr.f32.mxu1 %v5668_v0  ;;  %222 = vmatprep.mubr.f32.mxu0 %v5668_v0  ;;  %v421_v2 = vld [vmem:[#allocation5 + $0x8] sm:$0xff]  ;;  %v123_v3 = vcombine.high %v97_v1, %v97_v1  ;;  %v424_v6 = vld [vmem:[#allocation5 + $0x20] sm:$0xff]  ;;  %vm124_vm1 = vcmask 31744   ;;  %v5828_v24 = vld [vmem:[%s6830_s0 + $0x10] sm:$0xff] }
  0x4c   :  { %v425_v4 = vld [vmem:[#allocation5 + $0x28] sm:$0xff]  ;;  %v88_v7 = vld [vmem:[%s6830_s0] sm:$0xff]  ;;  %v5804_v9 = vpack.c.bf16 %v424_v6, %v420_v5  ;;  %v5845_v33 = vld [vmem:[%s6830_s0 + $0x18] sm:$0xff] }
  0x4d   :  { %v5802_v8 = vpack.c.bf16 %v425_v4, %v421_v2  ;;  %v429_v10 = vld [vmem:[#allocation5 + $0x48] sm:$0xff]  ;;  %4107 = vmatprep.subr.msk.mxu1 %vm149_vm0, %v123_v3  ;;  %v428_v13 = vld [vmem:[#allocation5 + $0x40] sm:$0xff]  ;;  %v94_v54 = vld [vmem:[%s6830_s0 + $0x30] sm:$0xff] }
  0x4e   :  { %v433_v11 = vld [vmem:[#allocation5 + $0x68] sm:$0xff]  ;;  %v432_v14 = vld [vmem:[#allocation5 + $0x60] sm:$0xff]  ;;  %4108 = vmatpush1.msk.msra.mxu1 %vm149_vm0, %v97_v1  ;;  %v423_v59 = vld [vmem:[#allocation5 + $0x18] sm:$0xff] }
  0x4f   :  { %v5807_v12 = vpack.c.bf16 %v433_v11, %v429_v10  ;;  %v437_v15 = vld [vmem:[#allocation5 + $0x88] sm:$0xff]  ;;  %4109 = vmatmul.mubr.msk.f32.vlgmr.msra.gmra.mrb[0].mxu1 %vm124_vm1, %v88_v7  ;;  %4187 = vmatprep.subr.bf16.mxu1 %v5802_v8  ;;  %v5817_v18 = vpack.c.bf16 %v432_v14, %v428_v13  ;;  %v436_v20 = vld [vmem:[#allocation5 + $0x80] sm:$0xff]  ;;  %v427_v60 = vld [vmem:[#allocation5 + $0x38] sm:$0xff] }
  0x50   :  { %v441_v16 = vld [vmem:[#allocation5 + $0xa8] sm:$0xff]  ;;  %4189 = vmatpush1.bf16.msra.mxu1 %v5804_v9  ;;  %341 = vmatprep.mubr.f32.mxu1 %v5668_v0  ;;  %v440_v21 = vld [vmem:[#allocation5 + $0xa0] sm:$0xff]  ;;  %v95_v61 = vld [vmem:[%s6830_s0 + $0x38] sm:$0xff]  ;;  %v5917_v63 = vpack.c.bf16 %v427_v60, %v423_v59 }
  0x51   :  { %v89_v17 = vld [vmem:[%s6830_s0 + $0x8] sm:$0xff]  ;;  %4191 = vmatprep.subr.bf16.mxu1 %v5807_v12  ;;  %v5820_v19 = vpack.c.bf16 %v441_v16, %v437_v15  ;;  %v5830_v25 = vpack.c.bf16 %v440_v21, %v436_v20  ;;  %v444_v27 = vld [vmem:[#allocation5 + $0xc0] sm:$0xff]  ;;  %v422_v1 = vld [vmem:[#allocation5 + $0x10] sm:$0xff] }
  0x52   :  { %v445_v22 = vld [vmem:[#allocation5 + $0xc8] sm:$0xff]  ;;  %v448_v28 = vld [vmem:[#allocation5 + $0xe0] sm:$0xff]  ;;  %v426_v2 = vld [vmem:[#allocation5 + $0x30] sm:$0xff] }
  0x53   :  { %v449_v23 = vld [vmem:[#allocation5 + $0xe8] sm:$0xff]  ;;  %4110 = vmatmul.mubr.msk.f32.gmra.mrb[2].mxu1 %vm124_vm1, %v89_v17  ;;  %v96_v31 = vld [vmem:[%s6831_s1] sm:$0xff]  ;;  %v5847_v34 = vpack.c.bf16 %v448_v28, %v444_v27  ;;  %v431_v3 = vld [vmem:[#allocation5 + $0x58] sm:$0xff]  ;;  %v5927_v5 = vpack.c.bf16 %v426_v2, %v422_v1  ;;  %v100_v1 = vlaneseq }
  0x54   :  { %4193 = vmatpush1.bf16.msra.mxu1 %v5817_v18  ;;  %347 = vmatprep.mubr.f32.mxu1 %v5668_v0  ;;  %v5833_v26 = vpack.c.bf16 %v449_v23, %v445_v22  ;;  %v453_v29 = vld [vmem:[#allocation5 + $0x108] sm:$0xff]  ;;  %v122_v32 = vcombine.high %v96_v31, %v96_v31  ;;  %v452_v36 = vld [vmem:[#allocation5 + $0x100] sm:$0xff]  ;;  %v435_v4 = vld [vmem:[#allocation5 + $0x78] sm:$0xff] }
  0x55   :  { %4195 = vmatprep.subr.bf16.mxu1 %v5820_v19  ;;  %v457_v30 = vld [vmem:[#allocation5 + $0x128] sm:$0xff]  ;;  %v456_v37 = vld [vmem:[#allocation5 + $0x120] sm:$0xff]  ;;  %v5930_v6 = vpack.c.bf16 %v435_v4, %v431_v3  ;;  %v434_v10 = vld [vmem:[#allocation5 + $0x70] sm:$0xff]  ;;  %v6012_v3 = vshrl.u32 %v100_v1, 7 }
  0x56   :  { %v5850_v35 = vpack.c.bf16 %v457_v30, %v453_v29  ;;  %4097 = vmatprep.subr.msk.mxu0 %vm149_vm0, %v122_v32  ;;  %v461_v38 = vld [vmem:[#allocation5 + $0x148] sm:$0xff]  ;;  %v5862_v40 = vld [vmem:[%s6830_s0 + $0x20] sm:$0xff]  ;;  %v5864_v41 = vpack.c.bf16 %v456_v37, %v452_v36  ;;  %v439_v11 = vld [vmem:[#allocation5 + $0x98] sm:$0xff] }
  0x57   :  { %4111 = vmatmul.mubr.msk.f32.gmra.mrb[4].mxu1 %vm124_vm1, %v5828_v24  ;;  %v465_v39 = vld [vmem:[#allocation5 + $0x168] sm:$0xff]  ;;  %4098 = vmatpush1.msk.msra.mxu0 %vm149_vm0, %v96_v31  ;;  %v460_v43 = vld [vmem:[#allocation5 + $0x140] sm:$0xff]  ;;  %v443_v13 = vld [vmem:[#allocation5 + $0xb8] sm:$0xff]  ;;  %v102_v4 = vsub.s32 0, %v6012_v3 }
  0x58   :  { %4197 = vmatpush1.bf16.msra.mxu1 %v5830_v25  ;;  %353 = vmatprep.mubr.f32.mxu1 %v5668_v0  ;;  %v5867_v42 = vpack.c.bf16 %v465_v39, %v461_v38  ;;  %v464_v44 = vld [vmem:[#allocation5 + $0x160] sm:$0xff]  ;;  %v469_v45 = vld [vmem:[#allocation5 + $0x188] sm:$0xff]  ;;  %v5943_v15 = vpack.c.bf16 %v443_v13, %v439_v11  ;;  %v438_v16 = vld [vmem:[#allocation5 + $0x90] sm:$0xff] }
  0x59   :  { %4199 = vmatprep.subr.bf16.mxu1 %v5833_v26  ;;  %4099 = vmatmul.mubr.msk.f32.vlgmr.msra.gmra.mrb[0].mxu0 %vm124_vm1, %v88_v7  ;;  %v473_v46 = vld [vmem:[#allocation5 + $0x1a8] sm:$0xff]  ;;  %v5882_v48 = vpack.c.bf16 %v464_v44, %v460_v43  ;;  %v468_v50 = vld [vmem:[#allocation5 + $0x180] sm:$0xff]  ;;  %v430_v7 = vld [vmem:[#allocation5 + $0x50] sm:$0xff] }
  0x5a   :  { %4251 = vmatprep.subr.bf16.mxu0 %v5802_v8  ;;  %228 = vmatprep.mubr.f32.mxu0 %v5668_v0  ;;  %v5880_v47 = vld [vmem:[%s6830_s0 + $0x28] sm:$0xff]  ;;  %v5885_v49 = vpack.c.bf16 %v473_v46, %v469_v45  ;;  %v472_v51 = vld [vmem:[#allocation5 + $0x1a0] sm:$0xff]  ;;  %v5939_v14 = vpack.c.bf16 %v434_v10, %v430_v7  ;;  %v447_v20 = vld [vmem:[#allocation5 + $0xd8] sm:$0xff]  ;;  %v106_v10 = vsub.s32 1, %v6012_v3 }
  0x5b   :  { %4112 = vmatmul.mubr.msk.f32.gmra.mrb[6].mxu1 %vm124_vm1, %v5845_v33  ;;  %4253 = vmatpush1.bf16.msra.mxu0 %v5804_v9  ;;  %v477_v52 = vld [vmem:[#allocation5 + $0x1c8] sm:$0xff]  ;;  %v5898_v55 = vpack.c.bf16 %v472_v51, %v468_v50  ;;  %v476_v57 = vld [vmem:[#allocation5 + $0x1c0] sm:$0xff]  ;;  %v451_v21 = vld [vmem:[#allocation5 + $0xf8] sm:$0xff] }
  0x5c   :  { %4201 = vmatpush1.bf16.msra.mxu1 %v5847_v34  ;;  %359 = vmatprep.mubr.f32.mxu1 %v5668_v0  ;;  %v481_v53 = vld [vmem:[#allocation5 + $0x1e8] sm:$0xff]  ;;  %v480_v58 = vld [vmem:[#allocation5 + $0x1e0] sm:$0xff]  ;;  %v5954_v23 = vpack.c.bf16 %v451_v21, %v447_v20  ;;  %v450_v27 = vld [vmem:[#allocation5 + $0xf0] sm:$0xff] }
  0x5d   :  { %4203 = vmatprep.subr.bf16.mxu1 %v5850_v35  ;;  %4255 = vmatprep.subr.bf16.mxu0 %v5807_v12  ;;  %v5901_v56 = vpack.c.bf16 %v481_v53, %v477_v52  ;;  %v5914_v62 = vpack.c.bf16 %v480_v58, %v476_v57  ;;  %v455_v28 = vld [vmem:[#allocation5 + $0x118] sm:$0xff]  ;;  %v454_v32 = vld [vmem:[#allocation5 + $0x110] sm:$0xff]  ;;  %v98_v7 = vld [vmem:[%s6833_s3] sm:$0xf] }
  0x5e   :  { %4100 = vmatmul.mubr.msk.f32.gmra.mrb[2].mxu0 %vm124_vm1, %v89_v17  ;;  %v442_v17 = vld [vmem:[#allocation5 + $0xb0] sm:$0xff]  ;;  %v459_v29 = vld [vmem:[#allocation5 + $0x138] sm:$0xff]  ;;  %v6021_v11 = vrot.slane %v98_v7, %v102_v4  ;;  %v6025_v13 = vrot.slane %v98_v7, %v106_v10 }
  0x5f   :  { %4113 = vmatmul.mubr.msk.f32.gmra.mrb[8].mxu1 %vm124_vm1, %v5862_v40  ;;  %4257 = vmatpush1.bf16.msra.mxu0 %v5817_v18  ;;  %v5951_v22 = vpack.c.bf16 %v442_v17, %v438_v16  ;;  %v5964_v31 = vpack.c.bf16 %v459_v29, %v455_v28  ;;  %v463_v36 = vld [vmem:[#allocation5 + $0x158] sm:$0xff]  ;;  %v466_v43 = vld [vmem:[#allocation5 + $0x170] sm:$0xff] }
  0x60   :  { %4205 = vmatpush1.bf16.msra.mxu1 %v5864_v41  ;;  %365 = vmatprep.mubr.f32.mxu1 %v5668_v0  ;;  %v467_v37 = vld [vmem:[#allocation5 + $0x178] sm:$0xff]  ;;  %v470_v50 = vld [vmem:[#allocation5 + $0x190] sm:$0xff] }
  0x61   :  { %4207 = vmatprep.subr.bf16.mxu1 %v5867_v42  ;;  %234 = vmatprep.mubr.f32.mxu0 %v5668_v0  ;;  %v5974_v39 = vpack.c.bf16 %v467_v37, %v463_v36  ;;  %v471_v44 = vld [vmem:[#allocation5 + $0x198] sm:$0xff]  ;;  %v474_v51 = vld [vmem:[#allocation5 + $0x1b0] sm:$0xff] }
  0x62   :  { %4259 = vmatprep.subr.bf16.mxu0 %v5820_v19  ;;  %4101 = vmatmul.mubr.msk.f32.gmra.mrb[4].mxu0 %vm124_vm1, %v5828_v24  ;;  %v446_v24 = vld [vmem:[#allocation5 + $0xd0] sm:$0xff]  ;;  %v475_v45 = vld [vmem:[#allocation5 + $0x1b8] sm:$0xff] }
  0x63   :  { %4114 = vmatmul.mubr.msk.f32.gmra.mrb[10].mxu1 %vm124_vm1, %v5880_v47  ;;  %4261 = vmatpush1.bf16.msra.mxu0 %v5830_v25  ;;  %v5961_v30 = vpack.c.bf16 %v450_v27, %v446_v24  ;;  %v479_v52 = vld [vmem:[#allocation5 + $0x1d8] sm:$0xff]  ;;  %v478_v58 = vld [vmem:[#allocation5 + $0x1d0] sm:$0xff] }
  0x64   :  { %4209 = vmatpush1.bf16.msra.mxu1 %v5882_v48  ;;  %371 = vmatprep.mubr.f32.mxu1 %v5668_v0  ;;  %v483_v53 = vld [vmem:[#allocation5 + $0x1f8] sm:$0xff]  ;;  %v482_v59 = vld [vmem:[#allocation5 + $0x1f0] sm:$0xff] }
  0x65   :  { %4211 = vmatprep.subr.bf16.mxu1 %v5885_v49  ;;  %240 = vmatprep.mubr.f32.mxu0 %v5668_v0  ;;  %v5986_v57 = vpack.c.bf16 %v483_v53, %v479_v52  ;;  %v5989_v60 = vpack.c.bf16 %v482_v59, %v478_v58 }
  0x66   :  { %4263 = vmatprep.subr.bf16.mxu0 %v5833_v26  ;;  %4102 = vmatmul.mubr.msk.f32.gmra.mrb[6].mxu0 %vm124_vm1, %v5845_v33  ;;  %v458_v33 = vld [vmem:[#allocation5 + $0x130] sm:$0xff] }
  0x67   :  { %4115 = vmatmul.mubr.msk.f32.gmra.mrb[12].mxu1 %vm124_vm1, %v94_v54  ;;  %4265 = vmatpush1.bf16.msra.mxu0 %v5847_v34  ;;  %v5971_v38 = vpack.c.bf16 %v458_v33, %v454_v32  ;;  %v110_v32 = vsub.s32 2, %v6012_v3  ;;  %v114_v33 = vsub.s32 3, %v6012_v3 }
  0x68   :  { %4213 = vmatpush1.bf16.msra.mxu1 %v5898_v55  ;;  %377 = vmatprep.mubr.f32.mxu1 %v5668_v0 }
  0x69   :  { %4215 = vmatprep.subr.bf16.mxu1 %v5901_v56  ;;  %246 = vmatprep.mubr.f32.mxu0 %v5668_v0  ;;  %v6033_v36 = vrot.slane %v98_v7, %v110_v32  ;;  %v6037_v37 = vrot.slane %v98_v7, %v114_v33 }
  0x6a   :  { %4267 = vmatprep.subr.bf16.mxu0 %v5850_v35  ;;  %4103 = vmatmul.mubr.msk.f32.gmra.mrb[8].mxu0 %vm124_vm1, %v5862_v40  ;;  %v462_v40 = vld [vmem:[#allocation5 + $0x150] sm:$0xff] }
  0x6b   :  { %4116 = vmatmul.mubr.msk.f32.gmra.mrb[14].mxu1 %vm124_vm1, %v95_v61  ;;  %4269 = vmatpush1.bf16.msra.mxu0 %v5864_v41  ;;  %v5977_v46 = vpack.c.bf16 %v466_v43, %v462_v40 }
  0x6c   :  { %4217 = vmatpush1.bf16.msra.mxu1 %v5914_v62  ;;  %548 = vmatprep.mubr.f32.mxu1 %v5668_v0 }
  0x6d   :  { %4219 = vmatprep.subr.bf16.mxu1 %v5917_v63  ;;  %252 = vmatprep.mubr.f32.mxu0 %v5668_v0 }
  0x6e   :  { %4271 = vmatprep.subr.bf16.mxu0 %v5867_v42  ;;  %4104 = vmatmul.mubr.msk.f32.gmra.mrb[10].mxu0 %vm124_vm1, %v5880_v47  ;;  %v5980_v47 = vpack.c.bf16 %v475_v45, %v471_v44 }
  0x6f   :  { %549 = vmatmul.mubr.f32.vlgmr.msra.gmra.mrb[16].mxu1 %v5668_v0  ;;  %4273 = vmatpush1.bf16.msra.mxu0 %v5882_v48 }
  0x70   :  { %4221 = vmatpush1.bf16.msra.mxu1 %v5927_v5  ;;  %619 = vmatprep.mubr.f32.mxu1 %v5668_v0 }
  0x71   :  { %4223 = vmatprep.subr.bf16.mxu1 %v5930_v6  ;;  %258 = vmatprep.mubr.f32.mxu0 %v5668_v0 }
  0x72   :  { %4275 = vmatprep.subr.bf16.mxu0 %v5885_v49  ;;  %4105 = vmatmul.mubr.msk.f32.gmra.mrb[12].mxu0 %vm124_vm1, %v94_v54  ;;  %v5983_v54 = vpack.c.bf16 %v474_v51, %v470_v50 }
  0x73   :  { %4277 = vmatpush1.bf16.msra.mxu0 %v5898_v55  ;;  %264 = vmatprep.mubr.f32.mxu0 %v5668_v0 }
  0x74   :  { %4225 = vmatpush1.bf16.msra.mxu1 %v5939_v14  ;;  %4279 = vmatprep.subr.bf16.mxu0 %v5901_v56 }
  0x75   :  { %4227 = vmatprep.subr.bf16.mxu1 %v5943_v15 }
  0x76   :  { %4106 = vmatmul.mubr.msk.f32.gmra.mrb[14].mxu0 %vm124_vm1, %v95_v61 }
  0x77   :  { %4281 = vmatpush1.bf16.msra.mxu0 %v5914_v62  ;;  %717 = vmatprep.mubr.f32.mxu0 %v5668_v0 }
  0x78   :  { %4229 = vmatpush1.bf16.msra.mxu1 %v5951_v22  ;;  %4315 = vmatprep.subr.bf16.mxu0 %v5802_v8 }
  0x79   :  { %4231 = vmatprep.subr.bf16.mxu1 %v5954_v23 }
  0x7c   :  { %4233 = vmatpush1.bf16.msra.mxu1 %v5961_v30 }
  0x7d   :  { %4235 = vmatprep.subr.bf16.mxu1 %v5964_v31 }
  0x80   :  { %4237 = vmatpush1.bf16.msra.mxu1 %v5971_v38 }
  0x81   :  { %4239 = vmatprep.subr.bf16.mxu1 %v5974_v39 }
  0x84   :  { %4241 = vmatpush1.bf16.msra.mxu1 %v5977_v46 }
  0x85   :  { %4243 = vmatprep.subr.bf16.mxu1 %v5980_v47 }
  0x88   :  { %4245 = vmatpush1.bf16.msra.mxu1 %v5983_v54 }
  0x89   :  { %4247 = vmatprep.subr.bf16.mxu1 %v5986_v57 }
  0x8c   :  { %4249 = vmatpush1.bf16.msra.mxu1 %v5989_v60 }
  0x8d   :  { %4283 = vmatprep.subr.bf16.mxu1 %v5917_v63 }
  0x8f   :  { %620 = vmatmul.mubr.f32.vlgmr.msra.gmra.mrb[0].mxu1 %v5668_v0 }
  0x90   :  { %4285 = vmatpush1.bf16.msra.mxu1 %v5927_v5  ;;  %788 = vmatprep.mubr.f32.mxu1 %v5668_v0 }
  0x91   :  { %4287 = vmatprep.subr.bf16.mxu1 %v5930_v6 }
  0x94   :  { %4289 = vmatpush1.bf16.msra.mxu1 %v5939_v14 }
  0x95   :  { %4291 = vmatprep.subr.bf16.mxu1 %v5943_v15 }
  0x98   :  { %4293 = vmatpush1.bf16.msra.mxu1 %v5951_v22 }
  0x99   :  { %4295 = vmatprep.subr.bf16.mxu1 %v5954_v23 }
  0x9c   :  { %4297 = vmatpush1.bf16.msra.mxu1 %v5961_v30 }
  0x9d   :  { %4299 = vmatprep.subr.bf16.mxu1 %v5964_v31 }
  0xa0   :  { %4301 = vmatpush1.bf16.msra.mxu1 %v5971_v38 }
  0xa1   :  { %4303 = vmatprep.subr.bf16.mxu1 %v5974_v39 }
  0xa4   :  { %4305 = vmatpush1.bf16.msra.mxu1 %v5977_v46 }
  0xa5   :  { %4307 = vmatprep.subr.bf16.mxu1 %v5980_v47 }
  0xa8   :  { %4309 = vmatpush1.bf16.msra.mxu1 %v5983_v54 }
  0xa9   :  { %4311 = vmatprep.subr.bf16.mxu1 %v5986_v57 }
  0xac   :  { %4313 = vmatpush1.bf16.msra.mxu1 %v5989_v60 }
  0xad   :  { %4347 = vmatprep.subr.bf16.mxu1 %v5917_v63 }
 0x12c   :  { %v224_v61 = vpop.f32.mrb[0].mxu0 }
 0x12d   :  { %v226_v2 = vpop.f32.mrb[1].mxu0  ;;  %v225_v16 = vadd.f32 %v224_v61, %v6021_v11 }
 0x12e   :  { %v227_v17 = vadd.f32 %v226_v2, %v6025_v13 }
 0x142   :  { %v550_v20 = vpop.f32.mrb[16].mxu1 }
 0x143   :  { %v626_v21 = vadd.f32 %v550_v20, %v225_v16  ;;  %v552_v24 = vpop.f32.mrb[17].mxu1 }
 0x144   :  { %v627_v27 = vadd.f32 %v552_v24, %v227_v17 }
 0x145   :  { %v630_v29 = vmul.f32 0.5, %v626_v21 }
 0x146   :  { %v634_v28 = vmul.f32 0.5, %v627_v27 }
 0x148   :  { %5382 = vtanh.f32 %v634_v28 }
 0x149   :  { %5384 = vtanh.f32 %v630_v29 }
 0x152   :  { %v5383_v50 = vpop.eup %5382 }
 0x153   :  { %v5385_v51 = vpop.eup %5384  ;;  %v636_v52 = vadd.f32 1.0, %v5383_v50 }
 0x154   :  { %v632_v58 = vadd.f32 1.0, %v5385_v51 }
 0x155   :  { %v637_v59 = vmul.f32 0.5, %v636_v52 }
 0x156   :  { %v633_v61 = vmul.f32 0.5, %v632_v58 }
 0x157   :  { %v643_v2 = vmul.f32 0.0, %v637_v59 }
 0x162   :  { %v621_v40 = vpop.f32.mrb[0].mxu1 }
 0x163   :  { %v5324_v43 = vadd.f32 %v621_v40, %v6033_v36  ;;  %v623_v44 = vpop.f32.mrb[1].mxu1 }
 0x164   :  { %v5325_v45 = vadd.f32 %v623_v44, %v6037_v37 }
 0x165   :  { %5386 = vtanh.f32 %v5324_v43 }
 0x166   :  { %v639_v53 = vmul.f32 0.5, %v5325_v45 }
 0x168   :  { %5388 = vtanh.f32 %v639_v53 }
 0x16f   :  { %v5387_v1 = vpop.eup %5386 }
 0x170   :  { %v644_v16 = vmul.f32 %v5387_v1, %v633_v61 }
 0x172   :  { %v6041_v7 = vadd.f32 %v644_v16, %v643_v2  ;;  %v5389_v17 = vpop.eup %5388 }
 0x173   :  { %v641_v20 = vadd.f32 1.0, %v5389_v17 }
 0x174   :  { %5390 = vtanh.f32 %v6041_v7 }
 0x175   :  { %v642_v21 = vmul.f32 0.5, %v641_v20 }
 0x17e   :  { %v5391_v24 = vpop.eup %5390 }
 0x17f   :  { %v647_v27 = vmul.f32 %v5391_v24, %v642_v21 }
 0x181   :  { %718 = vmatmul.mubr.f32.vlgmr.msra.gmra.mrb[2].mxu0 %v647_v27  ;;  %789 = vmatmul.mubr.f32.vlgmr.msra.gmra.mrb[2].mxu1 %v647_v27 }
 0x182   :  { %4317 = vmatpush1.bf16.msra.mxu0 %v5804_v9  ;;  %4349 = vmatpush1.bf16.msra.mxu1 %v5927_v5 }
 0x183   :  { %4319 = vmatprep.subr.bf16.mxu0 %v5807_v12  ;;  %4351 = vmatprep.subr.bf16.mxu1 %v5930_v6 }
 0x184   :  { %886 = vmatprep.mubr.f32.mxu0 %v5668_v0  ;;  %957 = vmatprep.mubr.f32.mxu1 %v5668_v0 }
 0x186   :  { %4321 = vmatpush1.bf16.msra.mxu0 %v5817_v18  ;;  %4353 = vmatpush1.bf16.msra.mxu1 %v5939_v14 }
 0x187   :  { %4323 = vmatprep.subr.bf16.mxu0 %v5820_v19  ;;  %4355 = vmatprep.subr.bf16.mxu1 %v5943_v15 }
 0x18a   :  { %4325 = vmatpush1.bf16.msra.mxu0 %v5830_v25  ;;  %4357 = vmatpush1.bf16.msra.mxu1 %v5951_v22 }
 0x18b   :  { %4327 = vmatprep.subr.bf16.mxu0 %v5833_v26  ;;  %4359 = vmatprep.subr.bf16.mxu1 %v5954_v23 }
 0x18e   :  { %4329 = vmatpush1.bf16.msra.mxu0 %v5847_v34  ;;  %4361 = vmatpush1.bf16.msra.mxu1 %v5961_v30 }
 0x18f   :  { %4331 = vmatprep.subr.bf16.mxu0 %v5850_v35  ;;  %4363 = vmatprep.subr.bf16.mxu1 %v5964_v31 }
 0x192   :  { %4333 = vmatpush1.bf16.msra.mxu0 %v5864_v41  ;;  %4365 = vmatpush1.bf16.msra.mxu1 %v5971_v38 }
 0x193   :  { %4335 = vmatprep.subr.bf16.mxu0 %v5867_v42  ;;  %4367 = vmatprep.subr.bf16.mxu1 %v5974_v39 }
 0x196   :  { %4337 = vmatpush1.bf16.msra.mxu0 %v5882_v48  ;;  %4369 = vmatpush1.bf16.msra.mxu1 %v5977_v46 }
 0x197   :  { %4339 = vmatprep.subr.bf16.mxu0 %v5885_v49  ;;  %4371 = vmatprep.subr.bf16.mxu1 %v5980_v47 }
 0x19a   :  { %4341 = vmatpush1.bf16.msra.mxu0 %v5898_v55  ;;  %4373 = vmatpush1.bf16.msra.mxu1 %v5983_v54 }
 0x19b   :  { %4343 = vmatprep.subr.bf16.mxu0 %v5901_v56  ;;  %4375 = vmatprep.subr.bf16.mxu1 %v5986_v57 }
 0x19e   :  { %4345 = vmatpush1.bf16.msra.mxu0 %v5914_v62  ;;  %4377 = vmatpush1.bf16.msra.mxu1 %v5989_v60 }
 0x19f   :  { %4379 = vmatprep.subr.bf16.mxu0 %v5802_v8  ;;  %4411 = vmatprep.subr.bf16.mxu1 %v5917_v63 }
 0x254   :  { %v719_v28 = vpop.f32.mrb[2].mxu0  ;;  %v790_v29 = vpop.f32.mrb[2].mxu1 }
 0x255   :  { %v5310_v40 = vadd.f32 %v719_v28, %v6021_v11  ;;  %v721_v43 = vpop.f32.mrb[3].mxu0  ;;  %v792_v44 = vpop.f32.mrb[3].mxu1  ;;  %v5326_v52 = vadd.f32 %v790_v29, %v6033_v36 }
 0x256   :  { %v5311_v45 = vadd.f32 %v721_v43, %v6025_v13  ;;  %v5327_v53 = vadd.f32 %v792_v44, %v6037_v37 }
 0x257   :  { %v799_v50 = vmul.f32 0.5, %v5310_v40 }
 0x258   :  { %v803_v51 = vmul.f32 0.5, %v5311_v45  ;;  %v808_v58 = vmul.f32 0.5, %v5327_v53 }
 0x259   :  { %5392 = vtanh.f32 %v799_v50 }
 0x25a   :  { %5394 = vtanh.f32 %v803_v51 }
 0x25b   :  { %5396 = vtanh.f32 %v5326_v52 }
 0x25c   :  { %5398 = vtanh.f32 %v808_v58 }
 0x263   :  { %v5393_v59 = vpop.eup %5392 }
 0x264   :  { %v5395_v61 = vpop.eup %5394  ;;  %v801_v1 = vadd.f32 1.0, %v5393_v59 }
 0x265   :  { %v805_v2 = vadd.f32 1.0, %v5395_v61  ;;  %v5397_v17 = vpop.eup %5396 }
 0x266   :  { %v802_v16 = vmul.f32 0.5, %v801_v1  ;;  %v5399_v28 = vpop.eup %5398 }
 0x267   :  { %v806_v20 = vmul.f32 0.5, %v805_v2  ;;  %v810_v29 = vadd.f32 1.0, %v5399_v28 }
 0x268   :  { %v813_v21 = vmul.f32 %v5397_v17, %v802_v16 }
 0x269   :  { %v812_v24 = vmul.f32 %v806_v20, %v6041_v7  ;;  %v811_v40 = vmul.f32 0.5, %v810_v29 }
 0x26b   :  { %v6083_v27 = vadd.f32 %v813_v21, %v812_v24 }
 0x26d   :  { %5400 = vtanh.f32 %v6083_v27 }
 0x277   :  { %v5401_v43 = vpop.eup %5400 }
 0x278   :  { %v816_v44 = vmul.f32 %v5401_v43, %v811_v40 }
 0x27a   :  { %887 = vmatmul.mubr.f32.vlgmr.msra.gmra.mrb[4].mxu0 %v816_v44  ;;  %958 = vmatmul.mubr.f32.vlgmr.msra.gmra.mrb[4].mxu1 %v816_v44 }
 0x27b   :  { %4381 = vmatpush1.bf16.msra.mxu0 %v5804_v9  ;;  %4413 = vmatpush1.bf16.msra.mxu1 %v5927_v5 }
 0x27c   :  { %4383 = vmatprep.subr.bf16.mxu0 %v5807_v12  ;;  %4415 = vmatprep.subr.bf16.mxu1 %v5930_v6 }
 0x27d   :  { %1055 = vmatprep.mubr.f32.mxu0 %v5668_v0  ;;  %1126 = vmatprep.mubr.f32.mxu1 %v5668_v0 }
 0x27f   :  { %4385 = vmatpush1.bf16.msra.mxu0 %v5817_v18  ;;  %4417 = vmatpush1.bf16.msra.mxu1 %v5939_v14 }
 0x280   :  { %4387 = vmatprep.subr.bf16.mxu0 %v5820_v19  ;;  %4419 = vmatprep.subr.bf16.mxu1 %v5943_v15 }
 0x283   :  { %4389 = vmatpush1.bf16.msra.mxu0 %v5830_v25  ;;  %4421 = vmatpush1.bf16.msra.mxu1 %v5951_v22 }
 0x284   :  { %4391 = vmatprep.subr.bf16.mxu0 %v5833_v26  ;;  %4423 = vmatprep.subr.bf16.mxu1 %v5954_v23 }
 0x287   :  { %4393 = vmatpush1.bf16.msra.mxu0 %v5847_v34  ;;  %4425 = vmatpush1.bf16.msra.mxu1 %v5961_v30 }
 0x288   :  { %4395 = vmatprep.subr.bf16.mxu0 %v5850_v35  ;;  %4427 = vmatprep.subr.bf16.mxu1 %v5964_v31 }
 0x28b   :  { %4397 = vmatpush1.bf16.msra.mxu0 %v5864_v41  ;;  %4429 = vmatpush1.bf16.msra.mxu1 %v5971_v38 }
 0x28c   :  { %4399 = vmatprep.subr.bf16.mxu0 %v5867_v42  ;;  %4431 = vmatprep.subr.bf16.mxu1 %v5974_v39 }
 0x28f   :  { %4401 = vmatpush1.bf16.msra.mxu0 %v5882_v48  ;;  %4433 = vmatpush1.bf16.msra.mxu1 %v5977_v46 }
 0x290   :  { %4403 = vmatprep.subr.bf16.mxu0 %v5885_v49  ;;  %4435 = vmatprep.subr.bf16.mxu1 %v5980_v47 }
 0x293   :  { %4405 = vmatpush1.bf16.msra.mxu0 %v5898_v55  ;;  %4437 = vmatpush1.bf16.msra.mxu1 %v5983_v54 }
 0x294   :  { %4407 = vmatprep.subr.bf16.mxu0 %v5901_v56  ;;  %4439 = vmatprep.subr.bf16.mxu1 %v5986_v57 }
 0x297   :  { %4409 = vmatpush1.bf16.msra.mxu0 %v5914_v62  ;;  %4441 = vmatpush1.bf16.msra.mxu1 %v5989_v60 }
 0x298   :  { %4443 = vmatprep.subr.bf16.mxu0 %v5802_v8  ;;  %4475 = vmatprep.subr.bf16.mxu1 %v5917_v63 }
 0x34d   :  { %v888_v7 = vpop.f32.mrb[4].mxu0  ;;  %v959_v45 = vpop.f32.mrb[4].mxu1 }
 0x34e   :  { %v5312_v50 = vadd.f32 %v888_v7, %v6021_v11  ;;  %v890_v51 = vpop.f32.mrb[5].mxu0  ;;  %v961_v52 = vpop.f32.mrb[5].mxu1  ;;  %v5328_v61 = vadd.f32 %v959_v45, %v6033_v36 }
 0x34f   :  { %v5313_v53 = vadd.f32 %v890_v51, %v6025_v13  ;;  %v5329_v1 = vadd.f32 %v961_v52, %v6037_v37 }
 0x350   :  { %v968_v58 = vmul.f32 0.5, %v5312_v50 }
 0x351   :  { %v972_v59 = vmul.f32 0.5, %v5313_v53  ;;  %v977_v2 = vmul.f32 0.5, %v5329_v1 }
 0x352   :  { %5402 = vtanh.f32 %v968_v58 }
 0x353   :  { %5404 = vtanh.f32 %v972_v59 }
 0x354   :  { %5406 = vtanh.f32 %v5328_v61 }
 0x355   :  { %5408 = vtanh.f32 %v977_v2 }
 0x35c   :  { %v5403_v16 = vpop.eup %5402 }
 0x35d   :  { %v5405_v17 = vpop.eup %5404  ;;  %v970_v20 = vadd.f32 1.0, %v5403_v16 }
 0x35e   :  { %v974_v21 = vadd.f32 1.0, %v5405_v17  ;;  %v5407_v28 = vpop.eup %5406 }
 0x35f   :  { %v971_v24 = vmul.f32 0.5, %v970_v20  ;;  %v5409_v7 = vpop.eup %5408 }
 0x360   :  { %v975_v29 = vmul.f32 0.5, %v974_v21  ;;  %v979_v45 = vadd.f32 1.0, %v5409_v7 }
 0x361   :  { %v982_v40 = vmul.f32 %v5407_v28, %v971_v24 }
 0x362   :  { %v981_v43 = vmul.f32 %v975_v29, %v6083_v27  ;;  %v980_v50 = vmul.f32 0.5, %v979_v45 }
 0x364   :  { %v6125_v44 = vadd.f32 %v982_v40, %v981_v43 }
 0x366   :  { %5410 = vtanh.f32 %v6125_v44 }
 0x370   :  { %v5411_v51 = vpop.eup %5410 }
 0x371   :  { %v985_v52 = vmul.f32 %v5411_v51, %v980_v50 }
 0x373   :  { %1056 = vmatmul.mubr.f32.vlgmr.msra.gmra.mrb[6].mxu0 %v985_v52  ;;  %1127 = vmatmul.mubr.f32.vlgmr.msra.gmra.mrb[6].mxu1 %v985_v52 }
 0x374   :  { %4445 = vmatpush1.bf16.msra.mxu0 %v5804_v9  ;;  %4477 = vmatpush1.bf16.msra.mxu1 %v5927_v5 }
 0x375   :  { %4447 = vmatprep.subr.bf16.mxu0 %v5807_v12  ;;  %4479 = vmatprep.subr.bf16.mxu1 %v5930_v6 }
 0x376   :  { %1224 = vmatprep.mubr.f32.mxu0 %v5668_v0  ;;  %1295 = vmatprep.mubr.f32.mxu1 %v5668_v0 }
 0x378   :  { %4449 = vmatpush1.bf16.msra.mxu0 %v5817_v18  ;;  %4481 = vmatpush1.bf16.msra.mxu1 %v5939_v14 }
 0x379   :  { %4451 = vmatprep.subr.bf16.mxu0 %v5820_v19  ;;  %4483 = vmatprep.subr.bf16.mxu1 %v5943_v15 }
 0x37c   :  { %4453 = vmatpush1.bf16.msra.mxu0 %v5830_v25  ;;  %4485 = vmatpush1.bf16.msra.mxu1 %v5951_v22 }
 0x37d   :  { %4455 = vmatprep.subr.bf16.mxu0 %v5833_v26  ;;  %4487 = vmatprep.subr.bf16.mxu1 %v5954_v23 }
 0x380   :  { %4457 = vmatpush1.bf16.msra.mxu0 %v5847_v34  ;;  %4489 = vmatpush1.bf16.msra.mxu1 %v5961_v30 }
 0x381   :  { %4459 = vmatprep.subr.bf16.mxu0 %v5850_v35  ;;  %4491 = vmatprep.subr.bf16.mxu1 %v5964_v31 }
 0x384   :  { %4461 = vmatpush1.bf16.msra.mxu0 %v5864_v41  ;;  %4493 = vmatpush1.bf16.msra.mxu1 %v5971_v38 }
 0x385   :  { %4463 = vmatprep.subr.bf16.mxu0 %v5867_v42  ;;  %4495 = vmatprep.subr.bf16.mxu1 %v5974_v39 }
 0x388   :  { %4465 = vmatpush1.bf16.msra.mxu0 %v5882_v48  ;;  %4497 = vmatpush1.bf16.msra.mxu1 %v5977_v46 }
 0x389   :  { %4467 = vmatprep.subr.bf16.mxu0 %v5885_v49  ;;  %4499 = vmatprep.subr.bf16.mxu1 %v5980_v47 }
 0x38c   :  { %4469 = vmatpush1.bf16.msra.mxu0 %v5898_v55  ;;  %4501 = vmatpush1.bf16.msra.mxu1 %v5983_v54 }
 0x38d   :  { %4471 = vmatprep.subr.bf16.mxu0 %v5901_v56  ;;  %4503 = vmatprep.subr.bf16.mxu1 %v5986_v57 }
 0x390   :  { %4473 = vmatpush1.bf16.msra.mxu0 %v5914_v62  ;;  %4505 = vmatpush1.bf16.msra.mxu1 %v5989_v60 }
 0x391   :  { %4507 = vmatprep.subr.bf16.mxu0 %v5802_v8  ;;  %4539 = vmatprep.subr.bf16.mxu1 %v5917_v63 }
 0x446   :  { %v1057_v27 = vpop.f32.mrb[6].mxu0  ;;  %v1128_v53 = vpop.f32.mrb[6].mxu1 }
 0x447   :  { %v5314_v58 = vadd.f32 %v1057_v27, %v6021_v11  ;;  %v1059_v59 = vpop.f32.mrb[7].mxu0  ;;  %v1130_v61 = vpop.f32.mrb[7].mxu1  ;;  %v5330_v17 = vadd.f32 %v1128_v53, %v6033_v36 }
 0x448   :  { %v5315_v1 = vadd.f32 %v1059_v59, %v6025_v13  ;;  %v5331_v20 = vadd.f32 %v1130_v61, %v6037_v37 }
 0x449   :  { %v1137_v2 = vmul.f32 0.5, %v5314_v58 }
 0x44a   :  { %v1141_v16 = vmul.f32 0.5, %v5315_v1  ;;  %v1146_v21 = vmul.f32 0.5, %v5331_v20 }
 0x44b   :  { %5412 = vtanh.f32 %v1137_v2 }
 0x44c   :  { %5414 = vtanh.f32 %v1141_v16 }
 0x44d   :  { %5416 = vtanh.f32 %v5330_v17 }
 0x44e   :  { %5418 = vtanh.f32 %v1146_v21 }
 0x455   :  { %v5413_v24 = vpop.eup %5412 }
 0x456   :  { %v5415_v28 = vpop.eup %5414  ;;  %v1139_v29 = vadd.f32 1.0, %v5413_v24 }
 0x457   :  { %v1143_v40 = vadd.f32 1.0, %v5415_v28  ;;  %v5417_v7 = vpop.eup %5416 }
 0x458   :  { %v1140_v43 = vmul.f32 0.5, %v1139_v29  ;;  %v5419_v27 = vpop.eup %5418 }
 0x459   :  { %v1144_v45 = vmul.f32 0.5, %v1143_v40  ;;  %v1148_v53 = vadd.f32 1.0, %v5419_v27 }
 0x45a   :  { %v1151_v50 = vmul.f32 %v5417_v7, %v1140_v43 }
 0x45b   :  { %v1150_v51 = vmul.f32 %v1144_v45, %v6125_v44  ;;  %v1149_v58 = vmul.f32 0.5, %v1148_v53 }
 0x45d   :  { %v6167_v52 = vadd.f32 %v1151_v50, %v1150_v51 }
 0x45f   :  { %5420 = vtanh.f32 %v6167_v52 }
 0x469   :  { %v5421_v59 = vpop.eup %5420 }
 0x46a   :  { %v1154_v61 = vmul.f32 %v5421_v59, %v1149_v58 }
 0x46c   :  { %1225 = vmatmul.mubr.f32.vlgmr.msra.gmra.mrb[8].mxu0 %v1154_v61  ;;  %1296 = vmatmul.mubr.f32.vlgmr.msra.gmra.mrb[8].mxu1 %v1154_v61 }
 0x46d   :  { %4509 = vmatpush1.bf16.msra.mxu0 %v5804_v9  ;;  %4541 = vmatpush1.bf16.msra.mxu1 %v5927_v5 }
 0x46e   :  { %4511 = vmatprep.subr.bf16.mxu0 %v5807_v12  ;;  %4543 = vmatprep.subr.bf16.mxu1 %v5930_v6 }
 0x46f   :  { %1393 = vmatprep.mubr.f32.mxu0 %v5668_v0  ;;  %1464 = vmatprep.mubr.f32.mxu1 %v5668_v0 }
 0x471   :  { %4513 = vmatpush1.bf16.msra.mxu0 %v5817_v18  ;;  %4545 = vmatpush1.bf16.msra.mxu1 %v5939_v14 }
 0x472   :  { %4515 = vmatprep.subr.bf16.mxu0 %v5820_v19  ;;  %4547 = vmatprep.subr.bf16.mxu1 %v5943_v15 }
 0x475   :  { %4517 = vmatpush1.bf16.msra.mxu0 %v5830_v25  ;;  %4549 = vmatpush1.bf16.msra.mxu1 %v5951_v22 }
 0x476   :  { %4519 = vmatprep.subr.bf16.mxu0 %v5833_v26  ;;  %4551 = vmatprep.subr.bf16.mxu1 %v5954_v23 }
 0x479   :  { %4521 = vmatpush1.bf16.msra.mxu0 %v5847_v34  ;;  %4553 = vmatpush1.bf16.msra.mxu1 %v5961_v30 }
 0x47a   :  { %4523 = vmatprep.subr.bf16.mxu0 %v5850_v35  ;;  %4555 = vmatprep.subr.bf16.mxu1 %v5964_v31 }
 0x47d   :  { %4525 = vmatpush1.bf16.msra.mxu0 %v5864_v41  ;;  %4557 = vmatpush1.bf16.msra.mxu1 %v5971_v38 }
 0x47e   :  { %4527 = vmatprep.subr.bf16.mxu0 %v5867_v42  ;;  %4559 = vmatprep.subr.bf16.mxu1 %v5974_v39 }
 0x481   :  { %4529 = vmatpush1.bf16.msra.mxu0 %v5882_v48  ;;  %4561 = vmatpush1.bf16.msra.mxu1 %v5977_v46 }
 0x482   :  { %4531 = vmatprep.subr.bf16.mxu0 %v5885_v49  ;;  %4563 = vmatprep.subr.bf16.mxu1 %v5980_v47 }
 0x485   :  { %4533 = vmatpush1.bf16.msra.mxu0 %v5898_v55  ;;  %4565 = vmatpush1.bf16.msra.mxu1 %v5983_v54 }
 0x486   :  { %4535 = vmatprep.subr.bf16.mxu0 %v5901_v56  ;;  %4567 = vmatprep.subr.bf16.mxu1 %v5986_v57 }
 0x489   :  { %4537 = vmatpush1.bf16.msra.mxu0 %v5914_v62  ;;  %4569 = vmatpush1.bf16.msra.mxu1 %v5989_v60 }
 0x48a   :  { %4571 = vmatprep.subr.bf16.mxu0 %v5802_v8  ;;  %4603 = vmatprep.subr.bf16.mxu1 %v5917_v63 }
 0x53f   :  { %v1226_v44 = vpop.f32.mrb[8].mxu0  ;;  %v1297_v1 = vpop.f32.mrb[8].mxu1 }
 0x540   :  { %v5316_v2 = vadd.f32 %v1226_v44, %v6021_v11  ;;  %v1228_v16 = vpop.f32.mrb[9].mxu0  ;;  %v1299_v17 = vpop.f32.mrb[9].mxu1  ;;  %v5332_v28 = vadd.f32 %v1297_v1, %v6033_v36 }
 0x541   :  { %v5317_v20 = vadd.f32 %v1228_v16, %v6025_v13  ;;  %v5333_v29 = vadd.f32 %v1299_v17, %v6037_v37 }
 0x542   :  { %v1306_v21 = vmul.f32 0.5, %v5316_v2 }
 0x543   :  { %v1310_v24 = vmul.f32 0.5, %v5317_v20  ;;  %v1315_v40 = vmul.f32 0.5, %v5333_v29 }
 0x544   :  { %5422 = vtanh.f32 %v1306_v21 }
 0x545   :  { %5424 = vtanh.f32 %v1310_v24 }
 0x546   :  { %5426 = vtanh.f32 %v5332_v28 }
 0x547   :  { %5428 = vtanh.f32 %v1315_v40 }
 0x54e   :  { %v5423_v43 = vpop.eup %5422 }
 0x54f   :  { %v5425_v7 = vpop.eup %5424  ;;  %v1308_v45 = vadd.f32 1.0, %v5423_v43 }
 0x550   :  { %v1312_v50 = vadd.f32 1.0, %v5425_v7  ;;  %v5427_v27 = vpop.eup %5426 }
 0x551   :  { %v1309_v51 = vmul.f32 0.5, %v1308_v45  ;;  %v5429_v44 = vpop.eup %5428 }
 0x552   :  { %v1313_v53 = vmul.f32 0.5, %v1312_v50  ;;  %v1317_v1 = vadd.f32 1.0, %v5429_v44 }
 0x553   :  { %v1320_v58 = vmul.f32 %v5427_v27, %v1309_v51 }
 0x554   :  { %v1319_v59 = vmul.f32 %v1313_v53, %v6167_v52  ;;  %v1318_v2 = vmul.f32 0.5, %v1317_v1 }
 0x556   :  { %v6209_v61 = vadd.f32 %v1320_v58, %v1319_v59 }
 0x558   :  { %5430 = vtanh.f32 %v6209_v61 }
 0x562   :  { %v5431_v16 = vpop.eup %5430 }
 0x563   :  { %v1323_v17 = vmul.f32 %v5431_v16, %v1318_v2 }
 0x565   :  { %1394 = vmatmul.mubr.f32.vlgmr.msra.gmra.mrb[10].mxu0 %v1323_v17  ;;  %1465 = vmatmul.mubr.f32.vlgmr.msra.gmra.mrb[10].mxu1 %v1323_v17 }
 0x566   :  { %4573 = vmatpush1.bf16.msra.mxu0 %v5804_v9  ;;  %4605 = vmatpush1.bf16.msra.mxu1 %v5927_v5 }
 0x567   :  { %4575 = vmatprep.subr.bf16.mxu0 %v5807_v12  ;;  %4607 = vmatprep.subr.bf16.mxu1 %v5930_v6 }
 0x568   :  { %1562 = vmatprep.mubr.f32.mxu0 %v5668_v0  ;;  %1633 = vmatprep.mubr.f32.mxu1 %v5668_v0 }
 0x56a   :  { %4577 = vmatpush1.bf16.msra.mxu0 %v5817_v18  ;;  %4609 = vmatpush1.bf16.msra.mxu1 %v5939_v14 }
 0x56b   :  { %4579 = vmatprep.subr.bf16.mxu0 %v5820_v19  ;;  %4611 = vmatprep.subr.bf16.mxu1 %v5943_v15 }
 0x56e   :  { %4581 = vmatpush1.bf16.msra.mxu0 %v5830_v25  ;;  %4613 = vmatpush1.bf16.msra.mxu1 %v5951_v22 }
 0x56f   :  { %4583 = vmatprep.subr.bf16.mxu0 %v5833_v26  ;;  %4615 = vmatprep.subr.bf16.mxu1 %v5954_v23 }
 0x572   :  { %4585 = vmatpush1.bf16.msra.mxu0 %v5847_v34  ;;  %4617 = vmatpush1.bf16.msra.mxu1 %v5961_v30 }
 0x573   :  { %4587 = vmatprep.subr.bf16.mxu0 %v5850_v35  ;;  %4619 = vmatprep.subr.bf16.mxu1 %v5964_v31 }
 0x576   :  { %4589 = vmatpush1.bf16.msra.mxu0 %v5864_v41  ;;  %4621 = vmatpush1.bf16.msra.mxu1 %v5971_v38 }
 0x577   :  { %4591 = vmatprep.subr.bf16.mxu0 %v5867_v42  ;;  %4623 = vmatprep.subr.bf16.mxu1 %v5974_v39 }
 0x57a   :  { %4593 = vmatpush1.bf16.msra.mxu0 %v5882_v48  ;;  %4625 = vmatpush1.bf16.msra.mxu1 %v5977_v46 }
 0x57b   :  { %4595 = vmatprep.subr.bf16.mxu0 %v5885_v49  ;;  %4627 = vmatprep.subr.bf16.mxu1 %v5980_v47 }
 0x57e   :  { %4597 = vmatpush1.bf16.msra.mxu0 %v5898_v55  ;;  %4629 = vmatpush1.bf16.msra.mxu1 %v5983_v54 }
 0x57f   :  { %4599 = vmatprep.subr.bf16.mxu0 %v5901_v56  ;;  %4631 = vmatprep.subr.bf16.mxu1 %v5986_v57 }
 0x582   :  { %4601 = vmatpush1.bf16.msra.mxu0 %v5914_v62  ;;  %4633 = vmatpush1.bf16.msra.mxu1 %v5989_v60 }
 0x583   :  { %4635 = vmatprep.subr.bf16.mxu0 %v5802_v8  ;;  %4667 = vmatprep.subr.bf16.mxu1 %v5917_v63 }
 0x638   :  { %v1395_v52 = vpop.f32.mrb[10].mxu0  ;;  %v1466_v20 = vpop.f32.mrb[10].mxu1 }
 0x639   :  { %v5318_v21 = vadd.f32 %v1395_v52, %v6021_v11  ;;  %v1397_v24 = vpop.f32.mrb[11].mxu0  ;;  %v1468_v28 = vpop.f32.mrb[11].mxu1  ;;  %v5334_v7 = vadd.f32 %v1466_v20, %v6033_v36 }
 0x63a   :  { %v5319_v29 = vadd.f32 %v1397_v24, %v6025_v13  ;;  %v5335_v45 = vadd.f32 %v1468_v28, %v6037_v37  ;;  %v1831_v24 = vld [vmem:[#allocation8] sm:$0xff] }
 0x63b   :  { %v1475_v40 = vmul.f32 0.5, %v5318_v21  ;;  %v1835_v28 = vld [vmem:[#allocation8 + $0x20] sm:$0xff] }
 0x63c   :  { %v1479_v43 = vmul.f32 0.5, %v5319_v29  ;;  %v1484_v8 = vmul.f32 0.5, %v5335_v45 }
 0x63d   :  { %5432 = vtanh.f32 %v1475_v40  ;;  %v4700_v40 = vpack.c.bf16 %v1835_v28, %v1831_v24  ;;  %v1869_v24 = vld [vmem:[#allocation8 + $0x130] sm:$0xff] }
 0x63e   :  { %5434 = vtanh.f32 %v1479_v43  ;;  %v1833_v43 = vld [vmem:[#allocation8 + $0x10] sm:$0xff] }
 0x63f   :  { %5436 = vtanh.f32 %v5334_v7  ;;  %v1837_v7 = vld [vmem:[#allocation8 + $0x30] sm:$0xff] }
 0x640   :  { %5438 = vtanh.f32 %v1484_v8  ;;  %v4732_v45 = vpack.c.bf16 %v1837_v7, %v1833_v43  ;;  %v1840_v8 = vld [vmem:[#allocation8 + $0x48] sm:$0xff]  ;;  %v1874_v43 = vld [vmem:[#allocation8 + $0x158] sm:$0xff] }
 0x647   :  { %v5433_v50 = vpop.eup %5432 }
 0x648   :  { %v5435_v63 = vpop.eup %5434  ;;  %v1477_v51 = vadd.f32 1.0, %v5433_v50  ;;  %v1844_v50 = vld [vmem:[#allocation8 + $0x68] sm:$0xff] }
 0x649   :  { %v1481_v27 = vadd.f32 1.0, %v5435_v63  ;;  %v5437_v58 = vpop.eup %5436  ;;  %v1842_v63 = vld [vmem:[#allocation8 + $0x58] sm:$0xff] }
 0x64a   :  { %v1478_v53 = vmul.f32 0.5, %v1477_v51  ;;  %v5439_v16 = vpop.eup %5438  ;;  %v4702_v51 = vpack.c.bf16 %v1844_v50, %v1840_v8  ;;  %v1871_v8 = vld [vmem:[#allocation8 + $0x140] sm:$0xff] }
 0x64b   :  { %v1482_v59 = vmul.f32 0.5, %v1481_v27  ;;  %v1486_v17 = vadd.f32 1.0, %v5439_v16  ;;  %v1846_v27 = vld [vmem:[#allocation8 + $0x78] sm:$0xff]  ;;  %v1875_v50 = vld [vmem:[#allocation8 + $0x160] sm:$0xff] }
 0x64c   :  { %v1489_v44 = vmul.f32 %v5437_v58, %v1478_v53  ;;  %v1839_v53 = vld [vmem:[#allocation8 + $0x40] sm:$0xff] }
 0x64d   :  { %v1488_v1 = vmul.f32 %v1482_v59, %v6209_v61  ;;  %v1487_v52 = vmul.f32 0.5, %v1486_v17  ;;  %v1838_v61 = vld [vmem:[#allocation8 + $0x38] sm:$0xff]  ;;  %v1843_v58 = vld [vmem:[#allocation8 + $0x60] sm:$0xff]  ;;  %v4734_v59 = vpack.c.bf16 %v1846_v27, %v1842_v63  ;;  %v1848_v17 = vld [vmem:[#allocation8 + $0x88] sm:$0xff] }
 0x64e   :  { %v1873_v27 = vld [vmem:[#allocation8 + $0x150] sm:$0xff] }
 0x64f   :  { %v6251_v2 = vadd.f32 %v1489_v44, %v1488_v1  ;;  %v4704_v44 = vpack.c.bf16 %v1843_v58, %v1839_v53  ;;  %v1841_v1 = vld [vmem:[#allocation8 + $0x50] sm:$0xff] }
 0x650   :  { %v1877_v53 = vld [vmem:[#allocation8 + $0x170] sm:$0xff] }
 0x651   :  { %5440 = vtanh.f32 %v6251_v2  ;;  %v4752_v58 = vpack.c.bf16 %v1877_v53, %v1873_v27  ;;  %v2067_v27 = vld [vmem:[#allocation10] sm:$0xff] }
 0x652   :  { %v2071_v53 = vld [vmem:[#allocation10 + $0x20] sm:$0xff] }
 0x65b   :  { %v5441_v20 = vpop.eup %5440 }
 0x65c   :  { %v1492_v21 = vmul.f32 %v5441_v20, %v1487_v52  ;;  %v1852_v52 = vld [vmem:[#allocation8 + $0xa8] sm:$0xff]  ;;  %v1850_v20 = vld [vmem:[#allocation8 + $0x98] sm:$0xff] }
 0x65e   :  { %1563 = vmatmul.mubr.f32.vlgmr.msra.gmra.mrb[12].mxu0 %v1492_v21  ;;  %1634 = vmatmul.mubr.f32.vlgmr.msra.gmra.mrb[12].mxu1 %v1492_v21  ;;  %v4706_v21 = vpack.c.bf16 %v1852_v52, %v1848_v17  ;;  %v1879_v17 = vld [vmem:[#allocation8 + $0x180] sm:$0xff] }
 0x65f   :  { %4637 = vmatpush1.bf16.msra.mxu0 %v5804_v9  ;;  %4669 = vmatpush1.bf16.msra.mxu1 %v5927_v5  ;;  %v1883_v52 = vld [vmem:[#allocation8 + $0x1a0] sm:$0xff] }
 0x660   :  { %4639 = vmatprep.subr.bf16.mxu0 %v5807_v12  ;;  %4671 = vmatprep.subr.bf16.mxu1 %v5930_v6 }
 0x661   :  { %1731 = vmatprep.mubr.f32.mxu0 %v5668_v0  ;;  %1802 = vmatprep.mubr.f32.mxu1 %v5668_v0 }
 0x663   :  { %4641 = vmatpush1.bf16.msra.mxu0 %v5817_v18  ;;  %4673 = vmatpush1.bf16.msra.mxu1 %v5939_v14 }
 0x664   :  { %4643 = vmatprep.subr.bf16.mxu0 %v5820_v19  ;;  %4675 = vmatprep.subr.bf16.mxu1 %v5943_v15 }
 0x667   :  { %4645 = vmatpush1.bf16.msra.mxu0 %v5830_v25  ;;  %4677 = vmatpush1.bf16.msra.mxu1 %v5951_v22 }
 0x668   :  { %4647 = vmatprep.subr.bf16.mxu0 %v5833_v26  ;;  %4679 = vmatprep.subr.bf16.mxu1 %v5954_v23 }
 0x66b   :  { %4649 = vmatpush1.bf16.msra.mxu0 %v5847_v34  ;;  %4681 = vmatpush1.bf16.msra.mxu1 %v5961_v30 }
 0x66c   :  { %4651 = vmatprep.subr.bf16.mxu0 %v5850_v35  ;;  %4683 = vmatprep.subr.bf16.mxu1 %v5964_v31 }
 0x66f   :  { %4653 = vmatpush1.bf16.msra.mxu0 %v5864_v41  ;;  %4685 = vmatpush1.bf16.msra.mxu1 %v5971_v38 }
 0x670   :  { %4655 = vmatprep.subr.bf16.mxu0 %v5867_v42  ;;  %4687 = vmatprep.subr.bf16.mxu1 %v5974_v39 }
 0x673   :  { %4657 = vmatpush1.bf16.msra.mxu0 %v5882_v48  ;;  %4689 = vmatpush1.bf16.msra.mxu1 %v5977_v46 }
 0x674   :  { %4659 = vmatprep.subr.bf16.mxu0 %v5885_v49  ;;  %4691 = vmatprep.subr.bf16.mxu1 %v5980_v47  ;;  %v1832_v47 = vld [vmem:[#allocation8 + $0x8] sm:$0xff] }
 0x677   :  { %4661 = vmatpush1.bf16.msra.mxu0 %v5898_v55  ;;  %4693 = vmatpush1.bf16.msra.mxu1 %v5983_v54  ;;  %v1836_v54 = vld [vmem:[#allocation8 + $0x28] sm:$0xff] }
 0x678   :  { %4663 = vmatprep.subr.bf16.mxu0 %v5901_v56  ;;  %4695 = vmatprep.subr.bf16.mxu1 %v5986_v57  ;;  %v1834_v57 = vld [vmem:[#allocation8 + $0x18] sm:$0xff] }
 0x679   :  { %v4730_v29 = vpack.c.bf16 %v1838_v61, %v1834_v57  ;;  %v1865_v61 = vld [vmem:[#allocation8 + $0x110] sm:$0xff] }
 0x67a   :  { %v4748_v28 = vpack.c.bf16 %v1869_v24, %v1865_v61 }
 0x67b   :  { %4665 = vmatpush1.bf16.msra.mxu0 %v5914_v62  ;;  %4697 = vmatpush1.bf16.msra.mxu1 %v5989_v60  ;;  %v4698_v60 = vpack.c.bf16 %v1836_v54, %v1832_v47  ;;  %v1863_v47 = vld [vmem:[#allocation8 + $0x100] sm:$0xff] }
 0x67c   :  { %4731 = vmatprep.subr.bf16.mxu1 %v4730_v29  ;;  %v1867_v54 = vld [vmem:[#allocation8 + $0x120] sm:$0xff]  ;;  %v1872_v29 = vld [vmem:[#allocation8 + $0x148] sm:$0xff] }
 0x67d   :  { %4699 = vmatprep.subr.bf16.mxu0 %v4698_v60  ;;  %v4716_v60 = vpack.c.bf16 %v1867_v54, %v1863_v47 }
 0x731   :  { %v1564_v9 = vpop.f32.mrb[12].mxu0  ;;  %v1635_v12 = vpop.f32.mrb[12].mxu1 }
 0x732   :  { %v5320_v18 = vadd.f32 %v1564_v9, %v6021_v11  ;;  %v1566_v19 = vpop.f32.mrb[13].mxu0  ;;  %v1637_v25 = vpop.f32.mrb[13].mxu1  ;;  %v5336_v41 = vadd.f32 %v1635_v12, %v6033_v36  ;;  %v1854_v9 = vld [vmem:[#allocation8 + $0xb8] sm:$0xff]  ;;  %v1847_v12 = vld [vmem:[#allocation8 + $0x80] sm:$0xff] }
 0x733   :  { %v5321_v26 = vadd.f32 %v1566_v19, %v6025_v13  ;;  %v5337_v42 = vadd.f32 %v1637_v25, %v6037_v37  ;;  %v4738_v19 = vpack.c.bf16 %v1854_v9, %v1850_v20  ;;  %v1881_v9 = vld [vmem:[#allocation8 + $0x190] sm:$0xff] }
 0x734   :  { %v1644_v34 = vmul.f32 0.5, %v5320_v18  ;;  %v1851_v18 = vld [vmem:[#allocation8 + $0xa0] sm:$0xff] }
 0x735   :  { %v1648_v35 = vmul.f32 0.5, %v5321_v26  ;;  %v1653_v48 = vmul.f32 0.5, %v5337_v42  ;;  %v4708_v25 = vpack.c.bf16 %v1851_v18, %v1847_v12  ;;  %v1849_v26 = vld [vmem:[#allocation8 + $0x90] sm:$0xff]  ;;  %v1860_v42 = vld [vmem:[#allocation8 + $0xe8] sm:$0xff] }
 0x736   :  { %5442 = vtanh.f32 %v1644_v34  ;;  %v1853_v34 = vld [vmem:[#allocation8 + $0xb0] sm:$0xff] }
 0x737   :  { %5444 = vtanh.f32 %v1648_v35  ;;  %v4740_v35 = vpack.c.bf16 %v1853_v34, %v1849_v26  ;;  %v1885_v12 = vld [vmem:[#allocation8 + $0x1b0] sm:$0xff]  ;;  %v1890_v26 = vld [vmem:[#allocation8 + $0x1d8] sm:$0xff] }
 0x738   :  { %5446 = vtanh.f32 %v5336_v41  ;;  %v1856_v41 = vld [vmem:[#allocation8 + $0xc8] sm:$0xff]  ;;  %v4756_v18 = vpack.c.bf16 %v1885_v12, %v1881_v9 }
 0x739   :  { %5448 = vtanh.f32 %v1653_v48  ;;  %v1858_v48 = vld [vmem:[#allocation8 + $0xd8] sm:$0xff] }
 0x740   :  { %v5443_v49 = vpop.eup %5442 }
 0x741   :  { %v5445_v55 = vpop.eup %5444  ;;  %v1646_v56 = vadd.f32 1.0, %v5443_v49  ;;  %v4710_v49 = vpack.c.bf16 %v1860_v42, %v1856_v41  ;;  %v1887_v41 = vld [vmem:[#allocation8 + $0x1c0] sm:$0xff] }
 0x742   :  { %v1650_v62 = vadd.f32 1.0, %v5445_v55  ;;  %v5447_v6 = vpop.eup %5446  ;;  %v1862_v55 = vld [vmem:[#allocation8 + $0xf8] sm:$0xff]  ;;  %v1891_v42 = vld [vmem:[#allocation8 + $0x1e0] sm:$0xff] }
 0x743   :  { %v1647_v5 = vmul.f32 0.5, %v1646_v56  ;;  %v5449_v30 = vpop.eup %5448  ;;  %v1855_v56 = vld [vmem:[#allocation8 + $0xc0] sm:$0xff] }
 0x744   :  { %v1651_v14 = vmul.f32 0.5, %v1650_v62  ;;  %v1655_v31 = vadd.f32 1.0, %v5449_v30  ;;  %v1859_v62 = vld [vmem:[#allocation8 + $0xe0] sm:$0xff]  ;;  %v1864_v30 = vld [vmem:[#allocation8 + $0x108] sm:$0xff] }
 0x745   :  { %v1658_v15 = vmul.f32 %v5447_v6, %v1647_v5  ;;  %v4742_v5 = vpack.c.bf16 %v1862_v55, %v1858_v48  ;;  %v4712_v6 = vpack.c.bf16 %v1859_v62, %v1855_v56  ;;  %v1889_v55 = vld [vmem:[#allocation8 + $0x1d0] sm:$0xff] }
 0x746   :  { %v1657_v22 = vmul.f32 %v1651_v14, %v6251_v2  ;;  %v1656_v38 = vmul.f32 0.5, %v1655_v31  ;;  %v1845_v2 = vld [vmem:[#allocation8 + $0x70] sm:$0xff]  ;;  %v1868_v31 = vld [vmem:[#allocation8 + $0x128] sm:$0xff] }
 0x747   :  { %v4736_v16 = vpack.c.bf16 %v1845_v2, %v1841_v1  ;;  %v1857_v14 = vld [vmem:[#allocation8 + $0xd0] sm:$0xff]  ;;  %v1882_v1 = vld [vmem:[#allocation8 + $0x198] sm:$0xff] }
 0x748   :  { %v6291_v23 = vadd.f32 %v1658_v15, %v1657_v22  ;;  %v1861_v15 = vld [vmem:[#allocation8 + $0xf0] sm:$0xff] }
 0x749   :  { %v4744_v22 = vpack.c.bf16 %v1861_v15, %v1857_v14  ;;  %v1893_v56 = vld [vmem:[#allocation8 + $0x1f0] sm:$0xff]  ;;  %v2070_v14 = vld [vmem:[#allocation10 + $0x18] sm:$0xff] }
 0x74a   :  { %5450 = vtanh.f32 %v6291_v23  ;;  %v4760_v62 = vpack.c.bf16 %v1893_v56, %v1889_v55  ;;  %v2087_v55 = vld [vmem:[#allocation10 + $0xa0] sm:$0xff] }
 0x754   :  { %v5451_v39 = vpop.eup %5450 }
 0x755   :  { %v1661_v46 = vmul.f32 %v5451_v39, %v1656_v38  ;;  %v1866_v38 = vld [vmem:[#allocation8 + $0x118] sm:$0xff]  ;;  %v4714_v39 = vpack.c.bf16 %v1868_v31, %v1864_v30 }
 0x757   :  { %1732 = vmatmul.mubr.f32.vlgmr.msra.gmra.mrb[14].mxu0 %v1661_v46  ;;  %1803 = vmatmul.mubr.f32.vlgmr.msra.gmra.mrb[14].mxu1 %v1661_v46  ;;  %v1870_v46 = vld [vmem:[#allocation8 + $0x138] sm:$0xff] }
 0x758   :  { %1981 = vmatprep.mubr.f32.mxu0 %v5668_v0  ;;  %2052 = vmatprep.mubr.f32.mxu1 %v5668_v0  ;;  %v4746_v57 = vpack.c.bf16 %v1870_v46, %v1866_v38 }
 0x759   :  { %4701 = vmatpush1.bf16.msra.mxu0 %v4700_v40  ;;  %4733 = vmatpush1.bf16.msra.mxu1 %v4732_v45  ;;  %v1876_v40 = vld [vmem:[#allocation8 + $0x168] sm:$0xff]  ;;  %v1878_v45 = vld [vmem:[#allocation8 + $0x178] sm:$0xff] }
 0x75a   :  { %4703 = vmatprep.subr.bf16.mxu0 %v4702_v51  ;;  %4735 = vmatprep.subr.bf16.mxu1 %v4734_v59  ;;  %v4718_v7 = vpack.c.bf16 %v1876_v40, %v1872_v29  ;;  %v4750_v63 = vpack.c.bf16 %v1878_v45, %v1874_v43  ;;  %v4720_v51 = vpack.c.bf16 %v1875_v50, %v1871_v8  ;;  %v1880_v59 = vld [vmem:[#allocation8 + $0x188] sm:$0xff] }
 0x75d   :  { %4705 = vmatpush1.bf16.msra.mxu0 %v4704_v44  ;;  %4737 = vmatpush1.bf16.msra.mxu1 %v4736_v16  ;;  %v1884_v44 = vld [vmem:[#allocation8 + $0x1a8] sm:$0xff]  ;;  %v1886_v16 = vld [vmem:[#allocation8 + $0x1b8] sm:$0xff] }
 0x75e   :  { %4707 = vmatprep.subr.bf16.mxu0 %v4706_v21  ;;  %4739 = vmatprep.subr.bf16.mxu1 %v4738_v19  ;;  %v4722_v2 = vpack.c.bf16 %v1884_v44, %v1880_v59  ;;  %v4754_v20 = vpack.c.bf16 %v1886_v16, %v1882_v1  ;;  %v4724_v21 = vpack.c.bf16 %v1883_v52, %v1879_v17  ;;  %v1888_v19 = vld [vmem:[#allocation8 + $0x1c8] sm:$0xff]  ;;  %v2078_v1 = vld [vmem:[#allocation10 + $0x58] sm:$0xff] }
 0x75f   :  { %v2076_v59 = vld [vmem:[#allocation10 + $0x48] sm:$0xff]  ;;  %v6307_v52 = vpack.c.bf16 %v2071_v53, %v2067_v27  ;;  %v2110_v53 = vld [vmem:[#allocation10 + $0x158] sm:$0xff] }
 0x760   :  { %v2080_v44 = vld [vmem:[#allocation10 + $0x68] sm:$0xff] }
 0x761   :  { %4709 = vmatpush1.bf16.msra.mxu0 %v4708_v25  ;;  %4741 = vmatpush1.bf16.msra.mxu1 %v4740_v35  ;;  %v1892_v25 = vld [vmem:[#allocation8 + $0x1e8] sm:$0xff]  ;;  %v1894_v35 = vld [vmem:[#allocation8 + $0x1f8] sm:$0xff]  ;;  %v6311_v12 = vpack.c.bf16 %v2080_v44, %v2076_v59  ;;  %v2107_v44 = vld [vmem:[#allocation10 + $0x140] sm:$0xff] }
 0x762   :  { %4711 = vmatprep.subr.bf16.mxu0 %v4710_v49  ;;  %4743 = vmatprep.subr.bf16.mxu1 %v4742_v5  ;;  %v4726_v34 = vpack.c.bf16 %v1892_v25, %v1888_v19  ;;  %v4758_v48 = vpack.c.bf16 %v1894_v35, %v1890_v26  ;;  %v4728_v49 = vpack.c.bf16 %v1891_v42, %v1887_v41  ;;  %v2068_v5 = vld [vmem:[#allocation10 + $0x8] sm:$0xff]  ;;  %v2077_v19 = vld [vmem:[#allocation10 + $0x50] sm:$0xff]  ;;  %v2086_v35 = vld [vmem:[#allocation10 + $0x98] sm:$0xff] }
 0x763   :  { %v2081_v25 = vld [vmem:[#allocation10 + $0x70] sm:$0xff]  ;;  %v2084_v26 = vld [vmem:[#allocation10 + $0x88] sm:$0xff]  ;;  %v2090_v41 = vld [vmem:[#allocation10 + $0xb8] sm:$0xff] }
 0x764   :  { %v2112_v27 = vld [vmem:[#allocation10 + $0x168] sm:$0xff] }
 0x765   :  { %4713 = vmatpush1.bf16.msra.mxu0 %v4712_v6  ;;  %4745 = vmatpush1.bf16.msra.mxu1 %v4744_v22  ;;  %v2072_v6 = vld [vmem:[#allocation10 + $0x28] sm:$0xff]  ;;  %v2074_v22 = vld [vmem:[#allocation10 + $0x38] sm:$0xff] }
 0x766   :  { %4715 = vmatprep.subr.bf16.mxu0 %v4714_v39  ;;  %4747 = vmatprep.subr.bf16.mxu1 %v4746_v57  ;;  %v6296_v15 = vpack.c.bf16 %v2072_v6, %v2068_v5  ;;  %v6298_v30 = vpack.c.bf16 %v2074_v22, %v2070_v14  ;;  %v2085_v5 = vld [vmem:[#allocation10 + $0x90] sm:$0xff]  ;;  %v2092_v14 = vld [vmem:[#allocation10 + $0xc8] sm:$0xff] }
 0x767   :  { %v2089_v6 = vld [vmem:[#allocation10 + $0xb0] sm:$0xff]  ;;  %v2096_v22 = vld [vmem:[#allocation10 + $0xe8] sm:$0xff] }
 0x769   :  { %4717 = vmatpush1.bf16.msra.mxu0 %v4716_v60  ;;  %4749 = vmatpush1.bf16.msra.mxu1 %v4748_v28 }
 0x76a   :  { %4719 = vmatprep.subr.bf16.mxu0 %v4718_v7  ;;  %4751 = vmatprep.subr.bf16.mxu1 %v4750_v63 }
 0x76d   :  { %4721 = vmatpush1.bf16.msra.mxu0 %v4720_v51  ;;  %4753 = vmatpush1.bf16.msra.mxu1 %v4752_v58  ;;  %v2069_v58 = vld [vmem:[#allocation10 + $0x10] sm:$0xff] }
 0x76e   :  { %4723 = vmatprep.subr.bf16.mxu0 %v4722_v2  ;;  %4755 = vmatprep.subr.bf16.mxu1 %v4754_v20  ;;  %v2082_v2 = vld [vmem:[#allocation10 + $0x78] sm:$0xff] }
 0x771   :  { %4725 = vmatpush1.bf16.msra.mxu0 %v4724_v21  ;;  %4757 = vmatpush1.bf16.msra.mxu1 %v4756_v18  ;;  %v2075_v21 = vld [vmem:[#allocation10 + $0x40] sm:$0xff]  ;;  %v6313_v18 = vpack.c.bf16 %v2082_v2, %v2078_v1 }
 0x772   :  { %4727 = vmatprep.subr.bf16.mxu0 %v4726_v34  ;;  %4759 = vmatprep.subr.bf16.mxu1 %v4758_v48  ;;  %v2088_v34 = vld [vmem:[#allocation10 + $0xa8] sm:$0xff]  ;;  %v6319_v48 = vpack.c.bf16 %v2081_v25, %v2077_v19  ;;  %v2111_v1 = vld [vmem:[#allocation10 + $0x160] sm:$0xff]  ;;  %v2118_v19 = vld [vmem:[#allocation10 + $0x198] sm:$0xff] }
 0x773   :  { %v6323_v56 = vpack.c.bf16 %v2088_v34, %v2084_v26  ;;  %v2122_v25 = vld [vmem:[#allocation10 + $0x1b8] sm:$0xff]  ;;  %v6367_v26 = vpack.c.bf16 %v2111_v1, %v2107_v44 }
 0x775   :  { %4729 = vmatpush1.bf16.msra.mxu0 %v4728_v49  ;;  %4761 = vmatpush1.bf16.msra.mxu1 %v4760_v62  ;;  %v2083_v49 = vld [vmem:[#allocation10 + $0x80] sm:$0xff]  ;;  %v6325_v62 = vpack.c.bf16 %v2090_v41, %v2086_v35 }
 0x776   :  { %4763 = vmatprep.subr.bf16.mxu0 %v6296_v15  ;;  %4795 = vmatprep.subr.bf16.mxu1 %v6298_v30  ;;  %v2115_v35 = vld [vmem:[#allocation10 + $0x180] sm:$0xff] }
 0x777   :  { %v2119_v41 = vld [vmem:[#allocation10 + $0x1a0] sm:$0xff] }
 0x82a   :  { %v1733_v31 = vpop.f32.mrb[14].mxu0  ;;  %v1804_v38 = vpop.f32.mrb[14].mxu1 }
 0x82b   :  { %v5322_v39 = vadd.f32 %v1733_v31, %v6021_v11  ;;  %v1735_v46 = vpop.f32.mrb[15].mxu0  ;;  %v1806_v47 = vpop.f32.mrb[15].mxu1  ;;  %v5338_v61 = vadd.f32 %v1804_v38, %v6033_v36  ;;  %v2094_v31 = vld [vmem:[#allocation10 + $0xd8] sm:$0xff] }
 0x82c   :  { %v5323_v54 = vadd.f32 %v1735_v46, %v6025_v13  ;;  %v5339_v24 = vadd.f32 %v1806_v47, %v6037_v37  ;;  %v2073_v37 = vld [vmem:[#allocation10 + $0x30] sm:$0xff]  ;;  %v2098_v38 = vld [vmem:[#allocation10 + $0xf8] sm:$0xff]  ;;  %v6333_v46 = vpack.c.bf16 %v2089_v6, %v2085_v5  ;;  %v2091_v47 = vld [vmem:[#allocation10 + $0xc0] sm:$0xff] }
 0x82d   :  { %v1813_v57 = vmul.f32 0.5, %v5322_v39  ;;  %v6309_v20 = vpack.c.bf16 %v2073_v37, %v2069_v58  ;;  %v6331_v39 = vpack.c.bf16 %v2087_v55, %v2083_v49  ;;  %v2114_v58 = vld [vmem:[#allocation10 + $0x178] sm:$0xff]  ;;  %v6375_v55 = vpack.c.bf16 %v2122_v25, %v2118_v19  ;;  %v2117_v5 = vld [vmem:[#allocation10 + $0x190] sm:$0xff] }
 0x82e   :  { %v1817_v60 = vmul.f32 0.5, %v5323_v54  ;;  %v1822_v28 = vmul.f32 0.5, %v5339_v24  ;;  %v2095_v54 = vld [vmem:[#allocation10 + $0xe0] sm:$0xff]  ;;  %v2097_v24 = vld [vmem:[#allocation10 + $0xf0] sm:$0xff] }
 0x82f   :  { %5452 = vtanh.f32 %v1813_v57  ;;  %v6337_v57 = vpack.c.bf16 %v2096_v22, %v2092_v14  ;;  %v2121_v6 = vld [vmem:[#allocation10 + $0x1b0] sm:$0xff]  ;;  %v2124_v14 = vld [vmem:[#allocation10 + $0x1c8] sm:$0xff] }
 0x830   :  { %5454 = vtanh.f32 %v1817_v60  ;;  %v6339_v60 = vpack.c.bf16 %v2098_v38, %v2094_v31  ;;  %v2128_v22 = vld [vmem:[#allocation10 + $0x1e8] sm:$0xff]  ;;  %v2126_v31 = vld [vmem:[#allocation10 + $0x1d8] sm:$0xff] }
 0x831   :  { %5456 = vtanh.f32 %v5338_v61  ;;  %v2093_v61 = vld [vmem:[#allocation10 + $0xd0] sm:$0xff]  ;;  %v2130_v38 = vld [vmem:[#allocation10 + $0x1f8] sm:$0xff] }
 0x832   :  { %5458 = vtanh.f32 %v1822_v28  ;;  %v2100_v28 = vld [vmem:[#allocation10 + $0x108] sm:$0xff] }
 0x839   :  { %v5453_v29 = vpop.eup %5452 }
 0x83a   :  { %v5455_v40 = vpop.eup %5454  ;;  %v1815_v43 = vadd.f32 1.0, %v5453_v29  ;;  %v2104_v29 = vld [vmem:[#allocation10 + $0x128] sm:$0xff] }
 0x83b   :  { %v1819_v7 = vadd.f32 1.0, %v5455_v40  ;;  %v5457_v45 = vpop.eup %5456  ;;  %v2102_v40 = vld [vmem:[#allocation10 + $0x118] sm:$0xff] }
 0x83c   :  { %v1816_v11 = vmul.f32 0.5, %v1815_v43  ;;  %v5459_v51 = vpop.eup %5458  ;;  %v2106_v43 = vld [vmem:[#allocation10 + $0x138] sm:$0xff] }
 0x83d   :  { %v1820_v8 = vmul.f32 0.5, %v1819_v7  ;;  %v1824_v36 = vadd.f32 1.0, %v5459_v51  ;;  %v6343_v7 = vpack.c.bf16 %v2095_v54, %v2091_v47  ;;  %v2105_v51 = vld [vmem:[#allocation10 + $0x130] sm:$0xff]  ;;  %v6379_v47 = vpack.c.bf16 %v2119_v41, %v2115_v35 }
 0x83e   :  { %v1827_v50 = vmul.f32 %v5457_v45, %v1816_v11  ;;  %v6345_v11 = vpack.c.bf16 %v2097_v24, %v2093_v61  ;;  %v2099_v45 = vld [vmem:[#allocation10 + $0x100] sm:$0xff]  ;;  %v6381_v54 = vpack.c.bf16 %v2121_v6, %v2117_v5  ;;  %v6385_v24 = vpack.c.bf16 %v2128_v22, %v2124_v14 }
 0x83f   :  { %v1826_v13 = vmul.f32 %v1820_v8, %v6291_v23  ;;  %v1825_v16 = vmul.f32 0.5, %v1824_v36  ;;  %v2079_v23 = vld [vmem:[#allocation10 + $0x60] sm:$0xff]  ;;  %v2108_v36 = vld [vmem:[#allocation10 + $0x148] sm:$0xff] }
 0x840   :  { %v6317_v42 = vpack.c.bf16 %v2079_v23, %v2075_v21  ;;  %v2103_v8 = vld [vmem:[#allocation10 + $0x120] sm:$0xff]  ;;  %v6361_v2 = vpack.c.bf16 %v2112_v27, %v2108_v36  ;;  %v2113_v21 = vld [vmem:[#allocation10 + $0x170] sm:$0xff]  ;;  %v2116_v23 = vld [vmem:[#allocation10 + $0x188] sm:$0xff] }
 0x841   :  { %v1828_v63 = vadd.f32 %v1827_v50, %v1826_v13  ;;  %v6349_v50 = vpack.c.bf16 %v2104_v29, %v2100_v28  ;;  %v6351_v13 = vpack.c.bf16 %v2106_v43, %v2102_v40  ;;  %v6355_v37 = vpack.c.bf16 %v2103_v8, %v2099_v45  ;;  %v2123_v61 = vld [vmem:[#allocation10 + $0x1c0] sm:$0xff]  ;;  %v2125_v40 = vld [vmem:[#allocation10 + $0x1d0] sm:$0xff] }
 0x842   :  { %v6387_v28 = vpack.c.bf16 %v2130_v38, %v2126_v31  ;;  %v2127_v29 = vld [vmem:[#allocation10 + $0x1e0] sm:$0xff]  ;;  %v2129_v43 = vld [vmem:[#allocation10 + $0x1f0] sm:$0xff] }
 0x843   :  { %5460 = vtanh.f32 %v1828_v63  ;;  %v2101_v63 = vld [vmem:[#allocation10 + $0x110] sm:$0xff]  ;;  %v6391_v45 = vpack.c.bf16 %v2127_v29, %v2123_v61  ;;  %v6393_v8 = vpack.c.bf16 %v2129_v43, %v2125_v40 }
 0x844   :  { %v6357_v59 = vpack.c.bf16 %v2105_v51, %v2101_v63 }
 0x84d   :  { %v5461_v17 = vpop.eup %5460 }
 0x84e   :  { %v1830_v9 = vmul.f32 %v5461_v17, %v1825_v16  ;;  %v6363_v16 = vpack.c.bf16 %v2114_v58, %v2110_v53  ;;  %v2109_v17 = vld [vmem:[#allocation10 + $0x150] sm:$0xff]  ;;  %v1895_v53 = vld [vmem:[%s6836_s6] sm:$0xf] }
 0x84f   :  { %v6369_v34 = vpack.c.bf16 %v2113_v21, %v2109_v17  ;;  %v1900_v58 = vrot.slane %v1895_v53, %v102_v4  ;;  %v1904_v44 = vrot.slane %v1895_v53, %v106_v10  ;;  %v1908_v17 = vrot.slane %v1895_v53, %v110_v32 }
 0x850   :  { %1982 = vmatmul.mubr.f32.vlgmr.msra.gmra.mrb[16].mxu0 %v1830_v9  ;;  %2053 = vmatmul.mubr.f32.vlgmr.msra.gmra.mrb[18].mxu1 %v1830_v9  ;;  %v2120_v9 = vld [vmem:[#allocation10 + $0x1a8] sm:$0xff]  ;;  %v1912_v4 = vrot.slane %v1895_v53, %v114_v33 }
 0x851   :  { %4765 = vmatpush1.bf16.msra.mxu0 %v6307_v52  ;;  %4797 = vmatpush1.bf16.msra.mxu1 %v6309_v20  ;;  %v6373_v49 = vpack.c.bf16 %v2120_v9, %v2116_v23 }
 0x852   :  { %4767 = vmatprep.subr.bf16.mxu0 %v6311_v12  ;;  %4799 = vmatprep.subr.bf16.mxu1 %v6313_v18 }
 0x853   :  { %2195 = vmatprep.mubr.f32.mxu0 %v5668_v0  ;;  %2266 = vmatprep.mubr.f32.mxu1 %v5668_v0 }
 0x855   :  { %4769 = vmatpush1.bf16.msra.mxu0 %v6317_v42  ;;  %4801 = vmatpush1.bf16.msra.mxu1 %v6319_v48 }
 0x856   :  { %4771 = vmatprep.subr.bf16.mxu0 %v6323_v56  ;;  %4803 = vmatprep.subr.bf16.mxu1 %v6325_v62 }
 0x859   :  { %4773 = vmatpush1.bf16.msra.mxu0 %v6331_v39  ;;  %4805 = vmatpush1.bf16.msra.mxu1 %v6333_v46 }
 0x85a   :  { %4775 = vmatprep.subr.bf16.mxu0 %v6337_v57  ;;  %4807 = vmatprep.subr.bf16.mxu1 %v6339_v60 }
 0x85d   :  { %4777 = vmatpush1.bf16.msra.mxu0 %v6343_v7  ;;  %4809 = vmatpush1.bf16.msra.mxu1 %v6345_v11 }
 0x85e   :  { %4779 = vmatprep.subr.bf16.mxu0 %v6349_v50  ;;  %4811 = vmatprep.subr.bf16.mxu1 %v6351_v13 }
 0x861   :  { %4781 = vmatpush1.bf16.msra.mxu0 %v6355_v37  ;;  %4813 = vmatpush1.bf16.msra.mxu1 %v6357_v59 }
 0x862   :  { %4783 = vmatprep.subr.bf16.mxu0 %v6361_v2  ;;  %4815 = vmatprep.subr.bf16.mxu1 %v6363_v16 }
 0x865   :  { %4785 = vmatpush1.bf16.msra.mxu0 %v6367_v26  ;;  %4817 = vmatpush1.bf16.msra.mxu1 %v6369_v34 }
 0x866   :  { %4787 = vmatprep.subr.bf16.mxu0 %v6373_v49  ;;  %4819 = vmatprep.subr.bf16.mxu1 %v6375_v55 }
 0x869   :  { %4789 = vmatpush1.bf16.msra.mxu0 %v6379_v47  ;;  %4821 = vmatpush1.bf16.msra.mxu1 %v6381_v54 }
 0x86a   :  { %4791 = vmatprep.subr.bf16.mxu0 %v6385_v24  ;;  %4823 = vmatprep.subr.bf16.mxu1 %v6387_v28 }
 0x86d   :  { %4793 = vmatpush1.bf16.msra.mxu0 %v6391_v45  ;;  %4825 = vmatpush1.bf16.msra.mxu1 %v6393_v8 }
 0x86e   :  { %4827 = vmatprep.subr.bf16.mxu0 %v6296_v15  ;;  %4859 = vmatprep.subr.bf16.mxu1 %v6298_v30 }
 0x870   :  { %2196 = vmatmul.mubr.f32.vlgmr.msra.gmra.mrb[18].mxu0 %v5668_v0  ;;  %2267 = vmatmul.mubr.f32.vlgmr.msra.gmra.mrb[20].mxu1 %v5668_v0 }
 0x871   :  { %4829 = vmatpush1.bf16.msra.mxu0 %v6307_v52  ;;  %4861 = vmatpush1.bf16.msra.mxu1 %v6309_v20 }
 0x872   :  { %4831 = vmatprep.subr.bf16.mxu0 %v6311_v12  ;;  %4863 = vmatprep.subr.bf16.mxu1 %v6313_v18 }
 0x873   :  { %2428 = vmatprep.mubr.f32.mxu0 %v5668_v0  ;;  %2499 = vmatprep.mubr.f32.mxu1 %v5668_v0 }
 0x875   :  { %4833 = vmatpush1.bf16.msra.mxu0 %v6317_v42  ;;  %4865 = vmatpush1.bf16.msra.mxu1 %v6319_v48 }
 0x876   :  { %4835 = vmatprep.subr.bf16.mxu0 %v6323_v56  ;;  %4867 = vmatprep.subr.bf16.mxu1 %v6325_v62 }
 0x879   :  { %4837 = vmatpush1.bf16.msra.mxu0 %v6331_v39  ;;  %4869 = vmatpush1.bf16.msra.mxu1 %v6333_v46 }
 0x87a   :  { %4839 = vmatprep.subr.bf16.mxu0 %v6337_v57  ;;  %4871 = vmatprep.subr.bf16.mxu1 %v6339_v60 }
 0x87d   :  { %4841 = vmatpush1.bf16.msra.mxu0 %v6343_v7  ;;  %4873 = vmatpush1.bf16.msra.mxu1 %v6345_v11 }
 0x87e   :  { %4843 = vmatprep.subr.bf16.mxu0 %v6349_v50  ;;  %4875 = vmatprep.subr.bf16.mxu1 %v6351_v13 }
 0x881   :  { %4845 = vmatpush1.bf16.msra.mxu0 %v6355_v37  ;;  %4877 = vmatpush1.bf16.msra.mxu1 %v6357_v59 }
 0x882   :  { %4847 = vmatprep.subr.bf16.mxu0 %v6361_v2  ;;  %4879 = vmatprep.subr.bf16.mxu1 %v6363_v16 }
 0x885   :  { %4849 = vmatpush1.bf16.msra.mxu0 %v6367_v26  ;;  %4881 = vmatpush1.bf16.msra.mxu1 %v6369_v34 }
 0x886   :  { %4851 = vmatprep.subr.bf16.mxu0 %v6373_v49  ;;  %4883 = vmatprep.subr.bf16.mxu1 %v6375_v55 }
 0x889   :  { %4853 = vmatpush1.bf16.msra.mxu0 %v6379_v47  ;;  %4885 = vmatpush1.bf16.msra.mxu1 %v6381_v54 }
 0x88a   :  { %4855 = vmatprep.subr.bf16.mxu0 %v6385_v24  ;;  %4887 = vmatprep.subr.bf16.mxu1 %v6387_v28 }
 0x88d   :  { %4857 = vmatpush1.bf16.msra.mxu0 %v6391_v45  ;;  %4889 = vmatpush1.bf16.msra.mxu1 %v6393_v8 }
 0x88e   :  { %4891 = vmatprep.subr.bf16.mxu0 %v6296_v15  ;;  %4923 = vmatprep.subr.bf16.mxu1 %v6298_v30 }
 0x923   :  { %v1983_v63 = vpop.f32.mrb[16].mxu0  ;;  %v2054_v51 = vpop.f32.mrb[18].mxu1 }
 0x924   :  { %v1985_v36 = vpop.f32.mrb[17].mxu0  ;;  %v2056_v27 = vpop.f32.mrb[19].mxu1  ;;  %v6444_v1 = vadd.f32 %v1983_v63, %v1900_v58  ;;  %v6452_v5 = vadd.f32 %v2054_v51, %v1908_v17 }
 0x925   :  { %v6448_v21 = vadd.f32 %v1985_v36, %v1904_v44  ;;  %v6457_v14 = vadd.f32 %v2056_v27, %v1912_v4 }
 0x943   :  { %v2197_v23 = vpop.f32.mrb[18].mxu0  ;;  %v2268_v9 = vpop.f32.mrb[20].mxu1 }
 0x944   :  { %v2273_v19 = vadd.f32 %v2197_v23, %v6444_v1  ;;  %v2199_v25 = vpop.f32.mrb[19].mxu0  ;;  %v2270_v35 = vpop.f32.mrb[21].mxu1  ;;  %v2275_v32 = vadd.f32 %v2268_v9, %v6452_v5 }
 0x945   :  { %v2274_v41 = vadd.f32 %v2199_v25, %v6448_v21  ;;  %v2276_v22 = vadd.f32 %v2270_v35, %v6457_v14 }
 0x946   :  { %v2277_v10 = vmul.f32 0.5, %v2273_v19 }
 0x947   :  { %v2281_v6 = vmul.f32 0.5, %v2274_v41  ;;  %v2286_v31 = vmul.f32 0.5, %v2276_v22 }
 0x948   :  { %5462 = vtanh.f32 %v2277_v10 }
 0x949   :  { %5464 = vtanh.f32 %v2281_v6 }
 0x94a   :  { %5466 = vtanh.f32 %v2275_v32 }
 0x94b   :  { %5468 = vtanh.f32 %v2286_v31 }
 0x952   :  { %v5463_v38 = vpop.eup %5462 }
 0x953   :  { %v5465_v61 = vpop.eup %5464  ;;  %v2279_v29 = vadd.f32 1.0, %v5463_v38 }
 0x954   :  { %v2283_v40 = vadd.f32 1.0, %v5465_v61  ;;  %v5467_v3 = vpop.eup %5466 }
 0x955   :  { %v2280_v43 = vmul.f32 0.5, %v2279_v29  ;;  %v5469_v27 = vpop.eup %5468 }
 0x956   :  { %v2284_v33 = vmul.f32 0.5, %v2283_v40  ;;  %v2288_v53 = vadd.f32 1.0, %v5469_v27 }
 0x957   :  { %v2291_v63 = vmul.f32 %v5467_v3, %v2280_v43 }
 0x958   :  { %v2290_v51 = vmul.f32 0.0, %v2284_v33  ;;  %v2289_v58 = vmul.f32 0.5, %v2288_v53 }
 0x95a   :  { %v6460_v36 = vadd.f32 %v2291_v63, %v2290_v51 }
 0x95c   :  { %5470 = vtanh.f32 %v6460_v36 }
 0x966   :  { %v5471_v44 = vpop.eup %5470 }
 0x967   :  { %v6463_v17 = vmul.f32 %v5471_v44, %v2289_v58  ;;  %v3002_v44 = vld [vmem:[#allocation10] sm:$0xff] }
 0x969   :  { %2429 = vmatmul.mubr.f32.vlgmr.msra.gmra.mrb[20].mxu0 %v6463_v17  ;;  %2500 = vmatmul.mubr.f32.vlgmr.msra.gmra.mrb[22].mxu1 %v6463_v17 }
 0x96a   :  { %4893 = vmatpush1.bf16.msra.mxu0 %v6307_v52  ;;  %4925 = vmatpush1.bf16.msra.mxu1 %v6309_v20 }
 0x96b   :  { %4895 = vmatprep.subr.bf16.mxu0 %v6311_v12  ;;  %4927 = vmatprep.subr.bf16.mxu1 %v6313_v18 }
 0x96c   :  { %2662 = vmatprep.mubr.f32.mxu0 %v5668_v0  ;;  %2733 = vmatprep.mubr.f32.mxu1 %v5668_v0 }
 0x96e   :  { %4897 = vmatpush1.bf16.msra.mxu0 %v6317_v42  ;;  %4929 = vmatpush1.bf16.msra.mxu1 %v6319_v48 }
 0x96f   :  { %4899 = vmatprep.subr.bf16.mxu0 %v6323_v56  ;;  %4931 = vmatprep.subr.bf16.mxu1 %v6325_v62 }
 0x972   :  { %4901 = vmatpush1.bf16.msra.mxu0 %v6331_v39  ;;  %4933 = vmatpush1.bf16.msra.mxu1 %v6333_v46 }
 0x973   :  { %4903 = vmatprep.subr.bf16.mxu0 %v6337_v57  ;;  %4935 = vmatprep.subr.bf16.mxu1 %v6339_v60 }
 0x976   :  { %4905 = vmatpush1.bf16.msra.mxu0 %v6343_v7  ;;  %4937 = vmatpush1.bf16.msra.mxu1 %v6345_v11 }
 0x977   :  { %4907 = vmatprep.subr.bf16.mxu0 %v6349_v50  ;;  %4939 = vmatprep.subr.bf16.mxu1 %v6351_v13 }
 0x97a   :  { %4909 = vmatpush1.bf16.msra.mxu0 %v6355_v37  ;;  %4941 = vmatpush1.bf16.msra.mxu1 %v6357_v59 }
 0x97b   :  { %4911 = vmatprep.subr.bf16.mxu0 %v6361_v2  ;;  %4943 = vmatprep.subr.bf16.mxu1 %v6363_v16 }
 0x97e   :  { %4913 = vmatpush1.bf16.msra.mxu0 %v6367_v26  ;;  %4945 = vmatpush1.bf16.msra.mxu1 %v6369_v34 }
 0x97f   :  { %4915 = vmatprep.subr.bf16.mxu0 %v6373_v49  ;;  %4947 = vmatprep.subr.bf16.mxu1 %v6375_v55 }
 0x982   :  { %4917 = vmatpush1.bf16.msra.mxu0 %v6379_v47  ;;  %4949 = vmatpush1.bf16.msra.mxu1 %v6381_v54 }
 0x983   :  { %4919 = vmatprep.subr.bf16.mxu0 %v6385_v24  ;;  %4951 = vmatprep.subr.bf16.mxu1 %v6387_v28 }
 0x986   :  { %4921 = vmatpush1.bf16.msra.mxu0 %v6391_v45  ;;  %4953 = vmatpush1.bf16.msra.mxu1 %v6393_v8 }
 0x987   :  { %4955 = vmatprep.subr.bf16.mxu0 %v6296_v15  ;;  %4987 = vmatprep.subr.bf16.mxu1 %v6298_v30 }
 0xa3c   :  { %v2430_v23 = vpop.f32.mrb[20].mxu0  ;;  %v2501_v9 = vpop.f32.mrb[22].mxu1 }
 0xa3d   :  { %v2506_v19 = vadd.f32 %v2430_v23, %v6444_v1  ;;  %v2432_v25 = vpop.f32.mrb[21].mxu0  ;;  %v2503_v35 = vpop.f32.mrb[23].mxu1  ;;  %v2508_v6 = vadd.f32 %v2501_v9, %v6452_v5  ;;  %v3006_v23 = vld [vmem:[#allocation10 + $0x20] sm:$0xff] }
 0xa3e   :  { %v2507_v41 = vadd.f32 %v2432_v25, %v6448_v21  ;;  %v2509_v32 = vadd.f32 %v2503_v35, %v6457_v14  ;;  %v3004_v25 = vld [vmem:[#allocation10 + $0x10] sm:$0xff] }
 0xa3f   :  { %v2510_v4 = vmul.f32 0.5, %v2506_v19  ;;  %v6563_v19 = vpack.c.bf16 %v3006_v23, %v3002_v44  ;;  %v3008_v35 = vld [vmem:[#allocation10 + $0x30] sm:$0xff]  ;;  %v3043_v23 = vld [vmem:[#allocation10 + $0x148] sm:$0xff] }
 0xa40   :  { %v2514_v10 = vmul.f32 0.5, %v2507_v41  ;;  %v2519_v15 = vmul.f32 0.5, %v2509_v32  ;;  %v6566_v41 = vpack.c.bf16 %v3008_v35, %v3004_v25  ;;  %v3047_v25 = vld [vmem:[#allocation10 + $0x168] sm:$0xff]  ;;  %v3045_v35 = vld [vmem:[#allocation10 + $0x158] sm:$0xff] }
 0xa41   :  { %5472 = vtanh.f32 %v2510_v4  ;;  %v3011_v4 = vld [vmem:[#allocation10 + $0x48] sm:$0xff] }
 0xa42   :  { %5474 = vtanh.f32 %v2514_v10  ;;  %v3015_v10 = vld [vmem:[#allocation10 + $0x68] sm:$0xff] }
 0xa43   :  { %5476 = vtanh.f32 %v2508_v6  ;;  %v3013_v6 = vld [vmem:[#allocation10 + $0x58] sm:$0xff]  ;;  %v6571_v32 = vpack.c.bf16 %v3015_v10, %v3011_v4  ;;  %v6619_v4 = vpack.c.bf16 %v3047_v25, %v3043_v23 }
 0xa44   :  { %5478 = vtanh.f32 %v2519_v15  ;;  %v3017_v15 = vld [vmem:[#allocation10 + $0x78] sm:$0xff] }
 0xa45   :  { %v3049_v10 = vld [vmem:[#allocation10 + $0x178] sm:$0xff] }
 0xa4b   :  { %v5473_v22 = vpop.eup %5472 }
 0xa4c   :  { %v5475_v30 = vpop.eup %5474  ;;  %v2512_v31 = vadd.f32 1.0, %v5473_v22  ;;  %v3010_v22 = vld [vmem:[#allocation10 + $0x40] sm:$0xff] }
 0xa4d   :  { %v2516_v38 = vadd.f32 1.0, %v5475_v30  ;;  %v5477_v29 = vpop.eup %5476  ;;  %v3014_v30 = vld [vmem:[#allocation10 + $0x60] sm:$0xff] }
 0xa4e   :  { %v2513_v61 = vmul.f32 0.5, %v2512_v31  ;;  %v5479_v63 = vpop.eup %5478  ;;  %v6573_v31 = vpack.c.bf16 %v3017_v15, %v3013_v6  ;;  %v3042_v6 = vld [vmem:[#allocation10 + $0x140] sm:$0xff] }
 0xa4f   :  { %v2517_v40 = vmul.f32 0.5, %v2516_v38  ;;  %v2521_v51 = vadd.f32 1.0, %v5479_v63  ;;  %v6575_v38 = vpack.c.bf16 %v3014_v30, %v3010_v22  ;;  %v3046_v15 = vld [vmem:[#allocation10 + $0x160] sm:$0xff]  ;;  %v6621_v22 = vpack.c.bf16 %v3049_v10, %v3045_v35 }
 0xa50   :  { %v2524_v43 = vmul.f32 %v5477_v29, %v2513_v61  ;;  %v3012_v61 = vld [vmem:[#allocation10 + $0x50] sm:$0xff]  ;;  %v6623_v30 = vpack.c.bf16 %v3046_v15, %v3042_v6 }
 0xa51   :  { %v2523_v3 = vmul.f32 %v2517_v40, %v6460_v36  ;;  %v2522_v27 = vmul.f32 0.5, %v2521_v51  ;;  %v3009_v36 = vld [vmem:[#allocation10 + $0x38] sm:$0xff]  ;;  %v3016_v29 = vld [vmem:[#allocation10 + $0x70] sm:$0xff] }
 0xa52   :  { %v6578_v40 = vpack.c.bf16 %v3016_v29, %v3012_v61  ;;  %v3025_v51 = vld [vmem:[#allocation10 + $0xb8] sm:$0xff]  ;;  %v3044_v61 = vld [vmem:[#allocation10 + $0x150] sm:$0xff] }
 0xa53   :  { %v6506_v33 = vadd.f32 %v2524_v43, %v2523_v3  ;;  %v3019_v43 = vld [vmem:[#allocation10 + $0x88] sm:$0xff]  ;;  %v3048_v29 = vld [vmem:[#allocation10 + $0x170] sm:$0xff] }
 0xa54   :  { %v3023_v3 = vld [vmem:[#allocation10 + $0xa8] sm:$0xff] }
 0xa55   :  { %5480 = vtanh.f32 %v6506_v33  ;;  %v6583_v63 = vpack.c.bf16 %v3023_v3, %v3019_v43  ;;  %v6626_v43 = vpack.c.bf16 %v3048_v29, %v3044_v61  ;;  %v3051_v3 = vld [vmem:[#allocation10 + $0x188] sm:$0xff] }
 0xa5f   :  { %v5481_v53 = vpop.eup %5480 }
 0xa60   :  { %v6509_v58 = vmul.f32 %v5481_v53, %v2522_v27  ;;  %v3018_v27 = vld [vmem:[#allocation10 + $0x80] sm:$0xff] }
 0xa61   :  { %v3022_v53 = vld [vmem:[#allocation10 + $0xa0] sm:$0xff] }
 0xa62   :  { %2663 = vmatmul.mubr.f32.vlgmr.msra.gmra.mrb[22].mxu0 %v6509_v58  ;;  %2734 = vmatmul.mubr.f32.vlgmr.msra.gmra.mrb[24].mxu1 %v6509_v58 }
 0xa63   :  { %4957 = vmatpush1.bf16.msra.mxu0 %v6307_v52  ;;  %4989 = vmatpush1.bf16.msra.mxu1 %v6309_v20 }
 0xa64   :  { %4959 = vmatprep.subr.bf16.mxu0 %v6311_v12  ;;  %4991 = vmatprep.subr.bf16.mxu1 %v6313_v18 }
 0xa65   :  { %2896 = vmatprep.mubr.f32.mxu0 %v5668_v0  ;;  %2967 = vmatprep.mubr.f32.mxu1 %v5668_v0 }
 0xa67   :  { %4961 = vmatpush1.bf16.msra.mxu0 %v6317_v42  ;;  %4993 = vmatpush1.bf16.msra.mxu1 %v6319_v48 }
 0xa68   :  { %4963 = vmatprep.subr.bf16.mxu0 %v6323_v56  ;;  %4995 = vmatprep.subr.bf16.mxu1 %v6325_v62 }
 0xa6b   :  { %4965 = vmatpush1.bf16.msra.mxu0 %v6331_v39  ;;  %4997 = vmatpush1.bf16.msra.mxu1 %v6333_v46 }
 0xa6c   :  { %4967 = vmatprep.subr.bf16.mxu0 %v6337_v57  ;;  %4999 = vmatprep.subr.bf16.mxu1 %v6339_v60 }
 0xa6f   :  { %4969 = vmatpush1.bf16.msra.mxu0 %v6343_v7  ;;  %5001 = vmatpush1.bf16.msra.mxu1 %v6345_v11 }
 0xa70   :  { %4971 = vmatprep.subr.bf16.mxu0 %v6349_v50  ;;  %5003 = vmatprep.subr.bf16.mxu1 %v6351_v13 }
 0xa73   :  { %4973 = vmatpush1.bf16.msra.mxu0 %v6355_v37  ;;  %5005 = vmatpush1.bf16.msra.mxu1 %v6357_v59 }
 0xa74   :  { %4975 = vmatprep.subr.bf16.mxu0 %v6361_v2  ;;  %5007 = vmatprep.subr.bf16.mxu1 %v6363_v16 }
 0xa77   :  { %4977 = vmatpush1.bf16.msra.mxu0 %v6367_v26  ;;  %5009 = vmatpush1.bf16.msra.mxu1 %v6369_v34 }
 0xa78   :  { %4979 = vmatprep.subr.bf16.mxu0 %v6373_v49  ;;  %5011 = vmatprep.subr.bf16.mxu1 %v6375_v55 }
 0xa7b   :  { %4981 = vmatpush1.bf16.msra.mxu0 %v6379_v47  ;;  %5013 = vmatpush1.bf16.msra.mxu1 %v6381_v54 }
 0xa7c   :  { %4983 = vmatprep.subr.bf16.mxu0 %v6385_v24  ;;  %5015 = vmatprep.subr.bf16.mxu1 %v6387_v28  ;;  %v3003_v24 = vld [vmem:[#allocation10 + $0x8] sm:$0xff] }
 0xa7d   :  { %v3007_v28 = vld [vmem:[#allocation10 + $0x28] sm:$0xff] }
 0xa7f   :  { %4985 = vmatpush1.bf16.msra.mxu0 %v6391_v45  ;;  %5017 = vmatpush1.bf16.msra.mxu1 %v6393_v8  ;;  %v3005_v45 = vld [vmem:[#allocation10 + $0x18] sm:$0xff]  ;;  %v6559_v8 = vpack.c.bf16 %v3007_v28, %v3003_v24 }
 0xa80   :  { %v6561_v9 = vpack.c.bf16 %v3009_v36, %v3005_v45  ;;  %v3036_v45 = vld [vmem:[#allocation10 + $0x110] sm:$0xff] }
 0xa81   :  { %5019 = vmatprep.subr.bf16.mxu0 %v6559_v8  ;;  %v3040_v36 = vld [vmem:[#allocation10 + $0x130] sm:$0xff] }
 0xa82   :  { %5051 = vmatprep.subr.bf16.mxu1 %v6561_v9  ;;  %v6614_v44 = vpack.c.bf16 %v3040_v36, %v3036_v45  ;;  %v3060_v45 = vld [vmem:[#allocation10 + $0x1d0] sm:$0xff] }
 0xa83   :  { %v3064_v36 = vld [vmem:[#allocation10 + $0x1f0] sm:$0xff] }
 0xa84   :  { %v6650_v23 = vpack.c.bf16 %v3064_v36, %v3060_v45 }
 0xb35   :  { %v2664_v52 = vpop.f32.mrb[22].mxu0  ;;  %v2735_v20 = vpop.f32.mrb[24].mxu1 }
 0xb36   :  { %v2740_v12 = vadd.f32 %v2664_v52, %v6444_v1  ;;  %v2666_v18 = vpop.f32.mrb[23].mxu0  ;;  %v2737_v42 = vpop.f32.mrb[25].mxu1  ;;  %v2742_v39 = vadd.f32 %v2735_v20, %v6452_v5  ;;  %v6587_v20 = vpack.c.bf16 %v3022_v53, %v3018_v27  ;;  %v3057_v53 = vld [vmem:[#allocation10 + $0x1b8] sm:$0xff] }
 0xb37   :  { %v2741_v48 = vadd.f32 %v2666_v18, %v6448_v21  ;;  %v2743_v46 = vadd.f32 %v2737_v42, %v6457_v14  ;;  %v3024_v18 = vld [vmem:[#allocation10 + $0xb0] sm:$0xff] }
 0xb38   :  { %v2744_v56 = vmul.f32 0.5, %v2740_v12  ;;  %v3020_v12 = vld [vmem:[#allocation10 + $0x90] sm:$0xff] }
 0xb39   :  { %v2748_v62 = vmul.f32 0.5, %v2741_v48  ;;  %v2753_v57 = vmul.f32 0.5, %v2743_v46  ;;  %v6590_v42 = vpack.c.bf16 %v3024_v18, %v3020_v12  ;;  %v3027_v48 = vld [vmem:[#allocation10 + $0xc8] sm:$0xff]  ;;  %v3033_v46 = vld [vmem:[#allocation10 + $0xf8] sm:$0xff]  ;;  %v3050_v12 = vld [vmem:[#allocation10 + $0x180] sm:$0xff] }
 0xb3a   :  { %5482 = vtanh.f32 %v2744_v56  ;;  %v3031_v56 = vld [vmem:[#allocation10 + $0xe8] sm:$0xff]  ;;  %v3054_v18 = vld [vmem:[#allocation10 + $0x1a0] sm:$0xff] }
 0xb3b   :  { %5484 = vtanh.f32 %v2748_v62  ;;  %v3029_v62 = vld [vmem:[#allocation10 + $0xd8] sm:$0xff] }
 0xb3c   :  { %5486 = vtanh.f32 %v2742_v39  ;;  %v6595_v39 = vpack.c.bf16 %v3031_v56, %v3027_v48  ;;  %v6635_v56 = vpack.c.bf16 %v3054_v18, %v3050_v12 }
 0xb3d   :  { %5488 = vtanh.f32 %v2753_v57  ;;  %v3026_v57 = vld [vmem:[#allocation10 + $0xc0] sm:$0xff] }
 0xb44   :  { %v5483_v60 = vpop.eup %5482 }
 0xb45   :  { %v5485_v7 = vpop.eup %5484  ;;  %v2746_v11 = vadd.f32 1.0, %v5483_v60  ;;  %v3030_v60 = vld [vmem:[#allocation10 + $0xe0] sm:$0xff] }
 0xb46   :  { %v2750_v50 = vadd.f32 1.0, %v5485_v7  ;;  %v5487_v37 = vpop.eup %5486  ;;  %v6597_v7 = vpack.c.bf16 %v3033_v46, %v3029_v62  ;;  %v3052_v62 = vld [vmem:[#allocation10 + $0x190] sm:$0xff] }
 0xb47   :  { %v2747_v13 = vmul.f32 0.5, %v2746_v11  ;;  %v5489_v34 = vpop.eup %5488  ;;  %v6599_v11 = vpack.c.bf16 %v3030_v60, %v3026_v57  ;;  %v3056_v46 = vld [vmem:[#allocation10 + $0x1b0] sm:$0xff]  ;;  %v3059_v60 = vld [vmem:[#allocation10 + $0x1c8] sm:$0xff] }
 0xb48   :  { %v2751_v59 = vmul.f32 0.5, %v2750_v50  ;;  %v2755_v49 = vadd.f32 1.0, %v5489_v34  ;;  %v3028_v50 = vld [vmem:[#allocation10 + $0xd0] sm:$0xff]  ;;  %v6638_v57 = vpack.c.bf16 %v3056_v46, %v3052_v62 }
 0xb49   :  { %v2758_v2 = vmul.f32 %v5487_v37, %v2747_v13  ;;  %v3032_v13 = vld [vmem:[#allocation10 + $0xf0] sm:$0xff] }
 0xb4a   :  { %v2757_v16 = vmul.f32 %v2751_v59, %v6506_v33  ;;  %v2756_v55 = vmul.f32 0.5, %v2755_v49  ;;  %v3021_v33 = vld [vmem:[#allocation10 + $0x98] sm:$0xff]  ;;  %v6602_v37 = vpack.c.bf16 %v3032_v13, %v3028_v50  ;;  %v3035_v59 = vld [vmem:[#allocation10 + $0x108] sm:$0xff] }
 0xb4b   :  { %v6585_v52 = vpack.c.bf16 %v3025_v51, %v3021_v33  ;;  %v3041_v49 = vld [vmem:[#allocation10 + $0x138] sm:$0xff]  ;;  %v3055_v33 = vld [vmem:[#allocation10 + $0x1a8] sm:$0xff] }
 0xb4c   :  { %v6550_v26 = vadd.f32 %v2758_v2, %v2757_v16  ;;  %v3039_v2 = vld [vmem:[#allocation10 + $0x128] sm:$0xff]  ;;  %v3037_v16 = vld [vmem:[#allocation10 + $0x118] sm:$0xff]  ;;  %v6631_v27 = vpack.c.bf16 %v3055_v33, %v3051_v3 }
 0xb4d   :  { %v6607_v34 = vpack.c.bf16 %v3039_v2, %v3035_v59  ;;  %v6609_v24 = vpack.c.bf16 %v3041_v49, %v3037_v16  ;;  %v3053_v51 = vld [vmem:[#allocation10 + $0x198] sm:$0xff]  ;;  %v3063_v50 = vld [vmem:[#allocation10 + $0x1e8] sm:$0xff]  ;;  %v3058_v16 = vld [vmem:[#allocation10 + $0x1c0] sm:$0xff] }
 0xb4e   :  { %5490 = vtanh.f32 %v6550_v26  ;;  %v6633_v48 = vpack.c.bf16 %v3057_v53, %v3053_v51  ;;  %v3061_v13 = vld [vmem:[#allocation10 + $0x1d8] sm:$0xff]  ;;  %v6643_v59 = vpack.c.bf16 %v3063_v50, %v3059_v60  ;;  %v3062_v49 = vld [vmem:[#allocation10 + $0x1e0] sm:$0xff] }
 0xb4f   :  { %v3065_v2 = vld [vmem:[#allocation10 + $0x1f8] sm:$0xff] }
 0xb58   :  { %v5491_v47 = vpop.eup %5490 }
 0xb59   :  { %v6553_v54 = vmul.f32 %v5491_v47, %v2756_v55  ;;  %v3034_v55 = vld [vmem:[#allocation10 + $0x100] sm:$0xff] }
 0xb5a   :  { %v3038_v47 = vld [vmem:[#allocation10 + $0x120] sm:$0xff] }
 0xb5b   :  { %2897 = vmatmul.mubr.f32.vlgmr.msra.gmra.mrb[24].mxu0 %v6553_v54  ;;  %2968 = vmatmul.mubr.f32.vlgmr.msra.gmra.mrb[26].mxu1 %v6553_v54  ;;  %v6611_v28 = vpack.c.bf16 %v3038_v47, %v3034_v55  ;;  %v6645_v55 = vpack.c.bf16 %v3065_v2, %v3061_v13  ;;  %v6647_v47 = vpack.c.bf16 %v3062_v49, %v3058_v16 }
 0xb5c   :  { %3130 = vmatprep.mubr.f32.mxu0 %v5668_v0  ;;  %3201 = vmatprep.mubr.f32.mxu1 %v5668_v0 }
 0xb5d   :  { %5021 = vmatpush1.bf16.msra.mxu0 %v6563_v19  ;;  %5053 = vmatpush1.bf16.msra.mxu1 %v6566_v41 }
 0xb5e   :  { %5023 = vmatprep.subr.bf16.mxu0 %v6571_v32  ;;  %5055 = vmatprep.subr.bf16.mxu1 %v6573_v31 }
 0xb61   :  { %5025 = vmatpush1.bf16.msra.mxu0 %v6575_v38  ;;  %5057 = vmatpush1.bf16.msra.mxu1 %v6578_v40 }
 0xb62   :  { %5027 = vmatprep.subr.bf16.mxu0 %v6583_v63  ;;  %5059 = vmatprep.subr.bf16.mxu1 %v6585_v52 }
 0xb65   :  { %5029 = vmatpush1.bf16.msra.mxu0 %v6587_v20  ;;  %5061 = vmatpush1.bf16.msra.mxu1 %v6590_v42 }
 0xb66   :  { %5031 = vmatprep.subr.bf16.mxu0 %v6595_v39  ;;  %5063 = vmatprep.subr.bf16.mxu1 %v6597_v7 }
 0xb69   :  { %5033 = vmatpush1.bf16.msra.mxu0 %v6599_v11  ;;  %5065 = vmatpush1.bf16.msra.mxu1 %v6602_v37 }
 0xb6a   :  { %5035 = vmatprep.subr.bf16.mxu0 %v6607_v34  ;;  %5067 = vmatprep.subr.bf16.mxu1 %v6609_v24 }
 0xb6d   :  { %5037 = vmatpush1.bf16.msra.mxu0 %v6611_v28  ;;  %5069 = vmatpush1.bf16.msra.mxu1 %v6614_v44 }
 0xb6e   :  { %5039 = vmatprep.subr.bf16.mxu0 %v6619_v4  ;;  %5071 = vmatprep.subr.bf16.mxu1 %v6621_v22 }
 0xb71   :  { %5041 = vmatpush1.bf16.msra.mxu0 %v6623_v30  ;;  %5073 = vmatpush1.bf16.msra.mxu1 %v6626_v43 }
 0xb72   :  { %5043 = vmatprep.subr.bf16.mxu0 %v6631_v27  ;;  %5075 = vmatprep.subr.bf16.mxu1 %v6633_v48 }
 0xb75   :  { %5045 = vmatpush1.bf16.msra.mxu0 %v6635_v56  ;;  %5077 = vmatpush1.bf16.msra.mxu1 %v6638_v57 }
 0xb76   :  { %5047 = vmatprep.subr.bf16.mxu0 %v6643_v59  ;;  %5079 = vmatprep.subr.bf16.mxu1 %v6645_v55 }
 0xb79   :  { %5049 = vmatpush1.bf16.msra.mxu0 %v6647_v47  ;;  %5081 = vmatpush1.bf16.msra.mxu1 %v6650_v23 }
 0xb7a   :  { %5083 = vmatprep.subr.bf16.mxu0 %v6559_v8  ;;  %5115 = vmatprep.subr.bf16.mxu1 %v6561_v9 }
 0xc2e   :  { %v2898_v25 = vpop.f32.mrb[24].mxu0  ;;  %v2969_v35 = vpop.f32.mrb[26].mxu1 }
 0xc2f   :  { %v2974_v10 = vadd.f32 %v2898_v25, %v6444_v1  ;;  %v2900_v6 = vpop.f32.mrb[25].mxu0  ;;  %v2971_v15 = vpop.f32.mrb[27].mxu1  ;;  %v2976_v33 = vadd.f32 %v2969_v35, %v6452_v5 }
 0xc30   :  { %v2975_v61 = vadd.f32 %v2900_v6, %v6448_v21  ;;  %v2977_v51 = vadd.f32 %v2971_v15, %v6457_v14 }
 0xc31   :  { %v2978_v29 = vmul.f32 0.5, %v2974_v10 }
 0xc32   :  { %v2982_v3 = vmul.f32 0.5, %v2975_v61  ;;  %v2987_v53 = vmul.f32 0.5, %v2977_v51 }
 0xc33   :  { %5492 = vtanh.f32 %v2978_v29 }
 0xc34   :  { %5494 = vtanh.f32 %v2982_v3 }
 0xc35   :  { %5496 = vtanh.f32 %v2976_v33 }
 0xc36   :  { %5498 = vtanh.f32 %v2987_v53 }
 0xc3d   :  { %v5493_v12 = vpop.eup %5492 }
 0xc3e   :  { %v5495_v18 = vpop.eup %5494  ;;  %v2980_v62 = vadd.f32 1.0, %v5493_v12 }
 0xc3f   :  { %v2984_v46 = vadd.f32 1.0, %v5495_v18  ;;  %v5497_v50 = vpop.eup %5496 }
 0xc40   :  { %v2981_v60 = vmul.f32 0.5, %v2980_v62  ;;  %v5499_v45 = vpop.eup %5498 }
 0xc41   :  { %v2985_v13 = vmul.f32 0.5, %v2984_v46  ;;  %v2989_v36 = vadd.f32 1.0, %v5499_v45 }
 0xc42   :  { %v2992_v2 = vmul.f32 %v5497_v50, %v2981_v60 }
 0xc43   :  { %v2991_v16 = vmul.f32 %v2985_v13, %v6550_v26  ;;  %v2990_v25 = vmul.f32 0.5, %v2989_v36 }
 0xc45   :  { %v6662_v49 = vadd.f32 %v2992_v2, %v2991_v16 }
 0xc47   :  { %5500 = vtanh.f32 %v6662_v49 }
 0xc51   :  { %v5501_v35 = vpop.eup %5500 }
 0xc52   :  { %v6665_v10 = vmul.f32 %v5501_v35, %v2990_v25 }
 0xc54   :  { %3131 = vmatmul.mubr.f32.vlgmr.msra.gmra.mrb[26].mxu0 %v6665_v10  ;;  %3202 = vmatmul.mubr.f32.vlgmr.msra.gmra.mrb[28].mxu1 %v6665_v10 }
 0xc55   :  { %5085 = vmatpush1.bf16.msra.mxu0 %v6563_v19  ;;  %5117 = vmatpush1.bf16.msra.mxu1 %v6566_v41 }
 0xc56   :  { %5087 = vmatprep.subr.bf16.mxu0 %v6571_v32  ;;  %5119 = vmatprep.subr.bf16.mxu1 %v6573_v31 }
 0xc57   :  { %3364 = vmatprep.mubr.f32.mxu0 %v5668_v0  ;;  %3435 = vmatprep.mubr.f32.mxu1 %v5668_v0 }
 0xc59   :  { %5089 = vmatpush1.bf16.msra.mxu0 %v6575_v38  ;;  %5121 = vmatpush1.bf16.msra.mxu1 %v6578_v40 }
 0xc5a   :  { %5091 = vmatprep.subr.bf16.mxu0 %v6583_v63  ;;  %5123 = vmatprep.subr.bf16.mxu1 %v6585_v52 }
 0xc5d   :  { %5093 = vmatpush1.bf16.msra.mxu0 %v6587_v20  ;;  %5125 = vmatpush1.bf16.msra.mxu1 %v6590_v42 }
 0xc5e   :  { %5095 = vmatprep.subr.bf16.mxu0 %v6595_v39  ;;  %5127 = vmatprep.subr.bf16.mxu1 %v6597_v7 }
 0xc61   :  { %5097 = vmatpush1.bf16.msra.mxu0 %v6599_v11  ;;  %5129 = vmatpush1.bf16.msra.mxu1 %v6602_v37 }
 0xc62   :  { %5099 = vmatprep.subr.bf16.mxu0 %v6607_v34  ;;  %5131 = vmatprep.subr.bf16.mxu1 %v6609_v24 }
 0xc65   :  { %5101 = vmatpush1.bf16.msra.mxu0 %v6611_v28  ;;  %5133 = vmatpush1.bf16.msra.mxu1 %v6614_v44 }
 0xc66   :  { %5103 = vmatprep.subr.bf16.mxu0 %v6619_v4  ;;  %5135 = vmatprep.subr.bf16.mxu1 %v6621_v22 }
 0xc69   :  { %5105 = vmatpush1.bf16.msra.mxu0 %v6623_v30  ;;  %5137 = vmatpush1.bf16.msra.mxu1 %v6626_v43 }
 0xc6a   :  { %5107 = vmatprep.subr.bf16.mxu0 %v6631_v27  ;;  %5139 = vmatprep.subr.bf16.mxu1 %v6633_v48 }
 0xc6d   :  { %5109 = vmatpush1.bf16.msra.mxu0 %v6635_v56  ;;  %5141 = vmatpush1.bf16.msra.mxu1 %v6638_v57 }
 0xc6e   :  { %5111 = vmatprep.subr.bf16.mxu0 %v6643_v59  ;;  %5143 = vmatprep.subr.bf16.mxu1 %v6645_v55 }
 0xc71   :  { %5113 = vmatpush1.bf16.msra.mxu0 %v6647_v47  ;;  %5145 = vmatpush1.bf16.msra.mxu1 %v6650_v23 }
 0xc72   :  { %5147 = vmatprep.subr.bf16.mxu0 %v6559_v8  ;;  %5179 = vmatprep.subr.bf16.mxu1 %v6561_v9 }
 0xd27   :  { %v3132_v26 = vpop.f32.mrb[26].mxu0  ;;  %v3203_v6 = vpop.f32.mrb[28].mxu1 }
 0xd28   :  { %v3208_v15 = vadd.f32 %v3132_v26, %v6444_v1  ;;  %v3134_v61 = vpop.f32.mrb[27].mxu0  ;;  %v3205_v29 = vpop.f32.mrb[29].mxu1  ;;  %v3210_v53 = vadd.f32 %v3203_v6, %v6452_v5 }
 0xd29   :  { %v3209_v3 = vadd.f32 %v3134_v61, %v6448_v21  ;;  %v3211_v12 = vadd.f32 %v3205_v29, %v6457_v14 }
 0xd2a   :  { %v3212_v33 = vmul.f32 0.5, %v3208_v15 }
 0xd2b   :  { %v3216_v51 = vmul.f32 0.5, %v3209_v3  ;;  %v3221_v18 = vmul.f32 0.5, %v3211_v12 }
 0xd2c   :  { %5502 = vtanh.f32 %v3212_v33 }
 0xd2d   :  { %5504 = vtanh.f32 %v3216_v51 }
 0xd2e   :  { %5506 = vtanh.f32 %v3210_v53 }
 0xd2f   :  { %5508 = vtanh.f32 %v3221_v18 }
 0xd36   :  { %v5503_v62 = vpop.eup %5502 }
 0xd37   :  { %v5505_v46 = vpop.eup %5504  ;;  %v3214_v60 = vadd.f32 1.0, %v5503_v62 }
 0xd38   :  { %v3218_v50 = vadd.f32 1.0, %v5505_v46  ;;  %v5507_v2 = vpop.eup %5506 }
 0xd39   :  { %v3215_v13 = vmul.f32 0.5, %v3214_v60  ;;  %v5509_v35 = vpop.eup %5508 }
 0xd3a   :  { %v3219_v16 = vmul.f32 0.5, %v3218_v50  ;;  %v3223_v26 = vadd.f32 1.0, %v5509_v35 }
 0xd3b   :  { %v3226_v45 = vmul.f32 %v5507_v2, %v3215_v13 }
 0xd3c   :  { %v3225_v36 = vmul.f32 %v3219_v16, %v6662_v49  ;;  %v3224_v6 = vmul.f32 0.5, %v3223_v26 }
 0xd3e   :  { %v6708_v25 = vadd.f32 %v3226_v45, %v3225_v36 }
 0xd40   :  { %5510 = vtanh.f32 %v6708_v25 }
 0xd4a   :  { %v5511_v15 = vpop.eup %5510 }
 0xd4b   :  { %v6711_v61 = vmul.f32 %v5511_v15, %v3224_v6 }
 0xd4d   :  { %3365 = vmatmul.mubr.f32.vlgmr.msra.gmra.mrb[28].mxu0 %v6711_v61  ;;  %3436 = vmatmul.mubr.f32.vlgmr.msra.gmra.mrb[30].mxu1 %v6711_v61 }
 0xd4e   :  { %5149 = vmatpush1.bf16.msra.mxu0 %v6563_v19  ;;  %5181 = vmatpush1.bf16.msra.mxu1 %v6566_v41 }
 0xd4f   :  { %5151 = vmatprep.subr.bf16.mxu0 %v6571_v32  ;;  %5183 = vmatprep.subr.bf16.mxu1 %v6573_v31 }
 0xd50   :  { %3598 = vmatprep.mubr.f32.mxu0 %v5668_v0  ;;  %3669 = vmatprep.mubr.f32.mxu1 %v5668_v0 }
 0xd52   :  { %5153 = vmatpush1.bf16.msra.mxu0 %v6575_v38  ;;  %5185 = vmatpush1.bf16.msra.mxu1 %v6578_v40 }
 0xd53   :  { %5155 = vmatprep.subr.bf16.mxu0 %v6583_v63  ;;  %5187 = vmatprep.subr.bf16.mxu1 %v6585_v52 }
 0xd56   :  { %5157 = vmatpush1.bf16.msra.mxu0 %v6587_v20  ;;  %5189 = vmatpush1.bf16.msra.mxu1 %v6590_v42 }
 0xd57   :  { %5159 = vmatprep.subr.bf16.mxu0 %v6595_v39  ;;  %5191 = vmatprep.subr.bf16.mxu1 %v6597_v7 }
 0xd5a   :  { %5161 = vmatpush1.bf16.msra.mxu0 %v6599_v11  ;;  %5193 = vmatpush1.bf16.msra.mxu1 %v6602_v37 }
 0xd5b   :  { %5163 = vmatprep.subr.bf16.mxu0 %v6607_v34  ;;  %5195 = vmatprep.subr.bf16.mxu1 %v6609_v24 }
 0xd5e   :  { %5165 = vmatpush1.bf16.msra.mxu0 %v6611_v28  ;;  %5197 = vmatpush1.bf16.msra.mxu1 %v6614_v44 }
 0xd5f   :  { %5167 = vmatprep.subr.bf16.mxu0 %v6619_v4  ;;  %5199 = vmatprep.subr.bf16.mxu1 %v6621_v22 }
 0xd62   :  { %5169 = vmatpush1.bf16.msra.mxu0 %v6623_v30  ;;  %5201 = vmatpush1.bf16.msra.mxu1 %v6626_v43 }
 0xd63   :  { %5171 = vmatprep.subr.bf16.mxu0 %v6631_v27  ;;  %5203 = vmatprep.subr.bf16.mxu1 %v6633_v48 }
 0xd66   :  { %5173 = vmatpush1.bf16.msra.mxu0 %v6635_v56  ;;  %5205 = vmatpush1.bf16.msra.mxu1 %v6638_v57 }
 0xd67   :  { %5175 = vmatprep.subr.bf16.mxu0 %v6643_v59  ;;  %5207 = vmatprep.subr.bf16.mxu1 %v6645_v55 }
 0xd6a   :  { %5177 = vmatpush1.bf16.msra.mxu0 %v6647_v47  ;;  %5209 = vmatpush1.bf16.msra.mxu1 %v6650_v23 }
 0xd6b   :  { %5211 = vmatprep.subr.bf16.mxu0 %v6559_v8  ;;  %5243 = vmatprep.subr.bf16.mxu1 %v6561_v9 }
 0xe20   :  { %v3366_v49 = vpop.f32.mrb[28].mxu0  ;;  %v3437_v29 = vpop.f32.mrb[30].mxu1 }
 0xe21   :  { %v3442_v3 = vadd.f32 %v3366_v49, %v6444_v1  ;;  %v3368_v33 = vpop.f32.mrb[29].mxu0  ;;  %v3439_v51 = vpop.f32.mrb[31].mxu1  ;;  %v3444_v62 = vadd.f32 %v3437_v29, %v6452_v5 }
 0xe22   :  { %v3443_v53 = vadd.f32 %v3368_v33, %v6448_v21  ;;  %v3445_v46 = vadd.f32 %v3439_v51, %v6457_v14  ;;  %v3946_v33 = vld [vmem:[#allocation11 + $0x20] sm:$0xff]  ;;  %v3947_v51 = vld [vmem:[#allocation11 + $0x28] sm:$0xff] }
 0xe23   :  { %v3446_v12 = vmul.f32 0.5, %v3442_v3 }
 0xe24   :  { %v3450_v18 = vmul.f32 0.5, %v3443_v53  ;;  %v3455_v8 = vmul.f32 0.5, %v3445_v46  ;;  %v5282_v53 = vpack.c.bf16 %v3947_v51, %v3946_v33  ;;  %v3950_v46 = vld [vmem:[#allocation11 + $0x40] sm:$0xff] }
 0xe25   :  { %5512 = vtanh.f32 %v3446_v12  ;;  %v3948_v12 = vld [vmem:[#allocation11 + $0x30] sm:$0xff] }
 0xe26   :  { %5514 = vtanh.f32 %v3450_v18  ;;  %v3949_v18 = vld [vmem:[#allocation11 + $0x38] sm:$0xff] }
 0xe27   :  { %5516 = vtanh.f32 %v3444_v62  ;;  %v5286_v62 = vpack.c.bf16 %v3949_v18, %v3948_v12 }
 0xe28   :  { %5518 = vtanh.f32 %v3455_v8  ;;  %v3951_v8 = vld [vmem:[#allocation11 + $0x48] sm:$0xff] }
 0xe2f   :  { %v5513_v60 = vpop.eup %5512 }
 0xe30   :  { %v5515_v9 = vpop.eup %5514  ;;  %v3448_v50 = vadd.f32 1.0, %v5513_v60  ;;  %v5290_v60 = vpack.c.bf16 %v3951_v8, %v3950_v46 }
 0xe31   :  { %v3452_v13 = vadd.f32 1.0, %v5515_v9  ;;  %v5517_v16 = vpop.eup %5516  ;;  %v3952_v9 = vld [vmem:[#allocation11 + $0x50] sm:$0xff] }
 0xe32   :  { %v3449_v2 = vmul.f32 0.5, %v3448_v50  ;;  %v5519_v6 = vpop.eup %5518  ;;  %v3953_v50 = vld [vmem:[#allocation11 + $0x58] sm:$0xff] }
 0xe33   :  { %v3453_v45 = vmul.f32 0.5, %v3452_v13  ;;  %v3457_v15 = vadd.f32 1.0, %v5519_v6  ;;  %v5294_v13 = vpack.c.bf16 %v3953_v50, %v3952_v9 }
 0xe34   :  { %v3460_v36 = vmul.f32 %v5517_v16, %v3449_v2  ;;  %v3954_v2 = vld [vmem:[#allocation11 + $0x60] sm:$0xff]  ;;  %v3955_v16 = vld [vmem:[#allocation11 + $0x68] sm:$0xff] }
 0xe35   :  { %v3459_v35 = vmul.f32 %v3453_v45, %v6708_v25  ;;  %v3458_v49 = vmul.f32 0.5, %v3457_v15  ;;  %v3956_v45 = vld [vmem:[#allocation11 + $0x70] sm:$0xff] }
 0xe37   :  { %v6754_v26 = vadd.f32 %v3460_v36, %v3459_v35  ;;  %v3957_v36 = vld [vmem:[#allocation11 + $0x78] sm:$0xff] }
 0xe38   :  { %v5302_v35 = vpack.c.bf16 %v3957_v36, %v3956_v45 }
 0xe39   :  { %5520 = vtanh.f32 %v6754_v26 }
 0xe43   :  { %v5521_v29 = vpop.eup %5520 }
 0xe44   :  { %v6757_v3 = vmul.f32 %v5521_v29, %v3458_v49 }
 0xe46   :  { %3599 = vmatmul.mubr.f32.vlgmr.msra.gmra.mrb[30].mxu0 %v6757_v3  ;;  %3670 = vmatmul.mubr.f32.vlgmr.msra.gmra.mrb[32].mxu1 %v6757_v3 }
 0xe47   :  { %5213 = vmatpush1.bf16.msra.mxu0 %v6563_v19  ;;  %5245 = vmatpush1.bf16.msra.mxu1 %v6566_v41  ;;  %v3943_v19 = vld [vmem:[#allocation11 + $0x8] sm:$0xff] }
 0xe48   :  { %5215 = vmatprep.subr.bf16.mxu0 %v6571_v32  ;;  %5247 = vmatprep.subr.bf16.mxu1 %v6573_v31 }
 0xe49   :  { %3832 = vmatprep.mubr.f32.mxu0 %v5668_v0  ;;  %3903 = vmatprep.mubr.f32.mxu1 %v5668_v0  ;;  %v3942_v0 = vld [vmem:[#allocation11] sm:$0xff] }
 0xe4a   :  { %v5274_v41 = vpack.c.bf16 %v3943_v19, %v3942_v0 }
 0xe4b   :  { %5217 = vmatpush1.bf16.msra.mxu0 %v6575_v38  ;;  %5249 = vmatpush1.bf16.msra.mxu1 %v6578_v40 }
 0xe4c   :  { %5219 = vmatprep.subr.bf16.mxu0 %v6583_v63  ;;  %5251 = vmatprep.subr.bf16.mxu1 %v6585_v52 }
 0xe4f   :  { %5221 = vmatpush1.bf16.msra.mxu0 %v6587_v20  ;;  %5253 = vmatpush1.bf16.msra.mxu1 %v6590_v42 }
 0xe50   :  { %5223 = vmatprep.subr.bf16.mxu0 %v6595_v39  ;;  %5255 = vmatprep.subr.bf16.mxu1 %v6597_v7 }
 0xe53   :  { %5225 = vmatpush1.bf16.msra.mxu0 %v6599_v11  ;;  %5257 = vmatpush1.bf16.msra.mxu1 %v6602_v37 }
 0xe54   :  { %5227 = vmatprep.subr.bf16.mxu0 %v6607_v34  ;;  %5259 = vmatprep.subr.bf16.mxu1 %v6609_v24 }
 0xe57   :  { %5229 = vmatpush1.bf16.msra.mxu0 %v6611_v28  ;;  %5261 = vmatpush1.bf16.msra.mxu1 %v6614_v44 }
 0xe58   :  { %5231 = vmatprep.subr.bf16.mxu0 %v6619_v4  ;;  %5263 = vmatprep.subr.bf16.mxu1 %v6621_v22 }
 0xe5b   :  { %5233 = vmatpush1.bf16.msra.mxu0 %v6623_v30  ;;  %5265 = vmatpush1.bf16.msra.mxu1 %v6626_v43 }
 0xe5c   :  { %5235 = vmatprep.subr.bf16.mxu0 %v6631_v27  ;;  %5267 = vmatprep.subr.bf16.mxu1 %v6633_v48 }
 0xe5f   :  { %5237 = vmatpush1.bf16.msra.mxu0 %v6635_v56  ;;  %5269 = vmatpush1.bf16.msra.mxu1 %v6638_v57  ;;  %v3944_v57 = vld [vmem:[#allocation11 + $0x10] sm:$0xff] }
 0xe60   :  { %5239 = vmatprep.subr.bf16.mxu0 %v6643_v59  ;;  %5271 = vmatprep.subr.bf16.mxu1 %v6645_v55  ;;  %v3945_v59 = vld [vmem:[#allocation11 + $0x18] sm:$0xff] }
 0xe61   :  { %v5278_v25 = vpack.c.bf16 %v3945_v59, %v3944_v57 }
 0xe63   :  { %5241 = vmatpush1.bf16.msra.mxu0 %v6647_v47  ;;  %5273 = vmatpush1.bf16.msra.mxu1 %v6650_v23 }
 0xe64   :  { %5275 = vmatprep.subr.bf16.mxu0 %v5274_v41 }
 0xf19   :  { %v3600_v32 = vpop.f32.mrb[30].mxu0  ;;  %v3671_v31 = vpop.f32.mrb[32].mxu1 }
 0xf1a   :  { %v3676_v38 = vadd.f32 %v3600_v32, %v6444_v1  ;;  %v3602_v40 = vpop.f32.mrb[31].mxu0  ;;  %v3673_v63 = vpop.f32.mrb[33].mxu1  ;;  %v3678_v39 = vadd.f32 %v3671_v31, %v6452_v5 }
 0xf1b   :  { %v3677_v52 = vadd.f32 %v3602_v40, %v6448_v21  ;;  %v3679_v7 = vadd.f32 %v3673_v63, %v6457_v14 }
 0xf1c   :  { %v3680_v20 = vmul.f32 0.5, %v3676_v38 }
 0xf1d   :  { %v3684_v42 = vmul.f32 0.5, %v3677_v52  ;;  %v3689_v11 = vmul.f32 0.5, %v3679_v7 }
 0xf1e   :  { %5522 = vtanh.f32 %v3680_v20 }
 0xf1f   :  { %5524 = vtanh.f32 %v3684_v42 }
 0xf20   :  { %5526 = vtanh.f32 %v3678_v39 }
 0xf21   :  { %5528 = vtanh.f32 %v3689_v11 }
 0xf28   :  { %v5523_v37 = vpop.eup %5522 }
 0xf29   :  { %v5525_v34 = vpop.eup %5524  ;;  %v3682_v24 = vadd.f32 1.0, %v5523_v37 }
 0xf2a   :  { %v3686_v28 = vadd.f32 1.0, %v5525_v34  ;;  %v5527_v4 = vpop.eup %5526 }
 0xf2b   :  { %v3683_v44 = vmul.f32 0.5, %v3682_v24  ;;  %v5529_v48 = vpop.eup %5528 }
 0xf2c   :  { %v3687_v22 = vmul.f32 0.5, %v3686_v28  ;;  %v3691_v56 = vadd.f32 1.0, %v5529_v48 }
 0xf2d   :  { %v3694_v30 = vmul.f32 %v5527_v4, %v3683_v44 }
 0xf2e   :  { %v3693_v43 = vmul.f32 %v3687_v22, %v6754_v26  ;;  %v3692_v55 = vmul.f32 0.5, %v3691_v56 }
 0xf30   :  { %v6798_v27 = vadd.f32 %v3694_v30, %v3693_v43 }
 0xf32   :  { %5530 = vtanh.f32 %v6798_v27 }
 0xf3c   :  { %v5531_v47 = vpop.eup %5530 }
 0xf3d   :  { %v3697_v23 = vmul.f32 %v5531_v47, %v3692_v55 }
 0xf3f   :  { %3833 = vmatmul.mubr.f32.vlgmr.msra.gmra.mrb[32].mxu0 %v3697_v23  ;;  %3904 = vmatmul.mubr.f32.vlgmr.msra.gmra.mrb[34].mxu1 %v3697_v23 }
 0xf40   :  { %5277 = vmatpush3.bf16.msra.mxu0 %v5274_v41  ;;  %4174 = vmatprep.mubr.f32.mxu0 %v6463_v17  ;;  %v5298_v17 = vpack.c.bf16 %v3955_v16, %v3954_v2 }
 0xf41   :  { %5279 = vmatprep.subr.bf16.mxu0 %v5278_v25 }
 0xf44   :  { %5281 = vmatpush3.bf16.msra.mxu0 %v5278_v25 }
 0xf45   :  { %5283 = vmatprep.subr.bf16.mxu0 %v5282_v53 }
 0xf48   :  { %5285 = vmatpush3.bf16.msra.mxu0 %v5282_v53 }
 0xf49   :  { %5287 = vmatprep.subr.bf16.mxu0 %v5286_v62 }
 0xf4c   :  { %5289 = vmatpush3.bf16.msra.mxu0 %v5286_v62 }
 0xf4d   :  { %5291 = vmatprep.subr.bf16.mxu0 %v5290_v60 }
 0xf50   :  { %5293 = vmatpush3.bf16.msra.mxu0 %v5290_v60 }
 0xf51   :  { %5295 = vmatprep.subr.bf16.mxu0 %v5294_v13 }
 0xf54   :  { %5297 = vmatpush3.bf16.msra.mxu0 %v5294_v13 }
 0xf55   :  { %5299 = vmatprep.subr.bf16.mxu0 %v5298_v17 }
 0xf58   :  { %5301 = vmatpush3.bf16.msra.mxu0 %v5298_v17 }
 0xf59   :  { %5303 = vmatprep.subr.bf16.mxu0 %v5302_v35 }
 0xf5c   :  { %5305 = vmatpush3.bf16.msra.mxu0 %v5302_v35 }
 0xf5f   :  { %4175 = vmatmul.mubr.f32.vlgmr.msra.gmra.mrb[34].mxu0 %v6509_v58 }
 0xf60   :  { %4177 = vmatprep.mubr.f32.mxu0 %v6553_v54 }
 0xf63   :  { %4178 = vmatmul.mubr.f32.gmra.mrb[36].mxu0 %v6665_v10 }
 0xf64   :  { %4180 = vmatprep.mubr.f32.mxu0 %v6711_v61 }
 0xf67   :  { %4181 = vmatmul.mubr.f32.gmra.mrb[38].mxu0 %v6757_v3 }
 0xf68   :  { %4183 = vmatprep.mubr.f32.mxu0 %v3697_v23 }
0x1012   :  { %v3834_v26 = vpop.f32.mrb[32].mxu0  ;;  %v3905_v6 = vpop.f32.mrb[34].mxu1 }
0x1013   :  { %v3910_v15 = vadd.f32 %v3834_v26, %v6444_v1  ;;  %v3836_v49 = vpop.f32.mrb[33].mxu0  ;;  %v3907_v29 = vpop.f32.mrb[35].mxu1  ;;  %v3912_v58 = vadd.f32 %v3905_v6, %v6452_v5 }
0x1014   :  { %v3911_v0 = vadd.f32 %v3836_v49, %v6448_v21  ;;  %v3913_v54 = vadd.f32 %v3907_v29, %v6457_v14  ;;  %v4117_v14 = vld [vmem:[%s6838_s8] ss:$0 sm:$0xff]  ;;  %s5669_s8 = smov [#allocation13]  }
0x1015   :  { %v3914_v19 = vmul.f32 0.5, %v3910_v15  ;;  %s4083_s15 = sshll.u32 %s5669_s8, 4  ;;  %s4084_s15 = int_to_ptr.vmem [resolvable:$true] %s4083_s15 }
0x1016   :  { %v3918_v41 = vmul.f32 0.5, %v3911_v0  ;;  %v3923_v10 = vmul.f32 0.5, %v3913_v54  ;;  %s5630_s16 = scalar_lea.vmem %s4084_s15, 1024  ;;  %p5635_p5 = scmp.lt.s32.totalorder %s4084_s15, %s4084_s15 }
0x1017   :  { %5532 = vtanh.f32 %v3914_v19  ;;  %p5631_p4 = scmp.ne.s32.totalorder %s4084_s15, %s5630_s16  ;;  %p5636_p6 = scmp.lt.s32.totalorder %s5630_s16, %s5630_s16 }
0x1018   :  { %5534 = vtanh.f32 %v3918_v41 }
0x1019   :  { %5536 = vtanh.f32 %v3912_v58  ;;  %p5637_p7 = por %p5636_p6, %p5635_p5 }
0x101a   :  { %5538 = vtanh.f32 %v3923_v10 }
0x101b   :  { %p5638_p8 = pnand %p5637_p7, %p5631_p4 }
0x1021   :  { %v5533_v61 = vpop.eup %5532 }
0x1022   :  { %v5535_v3 = vpop.eup %5534  ;;  %v3916_v32 = vadd.f32 1.0, %v5533_v61 }
0x1023   :  { %v3920_v31 = vadd.f32 1.0, %v5535_v3  ;;  %v5537_v38 = vpop.eup %5536 }
0x1024   :  { %v3917_v1 = vmul.f32 0.5, %v3916_v32  ;;  %v5539_v20 = vpop.eup %5538 }
0x1025   :  { %v3921_v40 = vmul.f32 0.5, %v3920_v31  ;;  %v3925_v5 = vadd.f32 1.0, %v5539_v20 }
0x1026   :  { %v3928_v63 = vmul.f32 %v5537_v38, %v3917_v1 }
0x1027   :  { %v3927_v21 = vmul.f32 %v3921_v40, %v6798_v27  ;;  %v3926_v11 = vmul.f32 0.5, %v3925_v5 }
0x1029   :  { %v3929_v52 = vadd.f32 %v3928_v63, %v3927_v21 }
0x102b   :  { %5540 = vtanh.f32 %v3929_v52 }
0x1032   :  { %v4176_v42 = vpop.f32.mrb[34].mxu0 }
0x1033   :  { %v4037_v39 = vadd.f32 %v4176_v42, %v4117_v14  ;;  %v4031_v7 = vpop.f32.mrb[35].mxu0 }
0x1034   :  { %v4032_v37 = vadd.f32 %v4117_v14, %v4031_v7 }
0x1035   :  { %v5541_v34 = vpop.eup %5540  ;;  %4071 = vst [vmem:[#allocation13 + $0x8] sm:$0xff] %v4037_v39 }
0x1036   :  { %4070 = vst [vmem:[#allocation13] sm:$0xff] %v4032_v37  ;;  %v4179_v24 = vpop.f32.mrb[36].mxu0  ;;  %v3931_v28 = vmul.f32 %v5541_v34, %v3926_v11 }
0x1037   :  { %v4047_v44 = vadd.f32 %v4179_v24, %v4117_v14  ;;  %v4041_v4 = vpop.f32.mrb[37].mxu0 }
0x1038   :  { %v4042_v22 = vadd.f32 %v4117_v14, %v4041_v4  ;;  %4184 = vmatmul.mubr.f32.gmra.mrb[40].mxu0 %v3931_v28 }
0x1039   :  { %4073 = vst [vmem:[#allocation13 + $0x18] sm:$0xff] %v4047_v44 }
0x103a   :  { %4072 = vst [vmem:[#allocation13 + $0x10] sm:$0xff] %v4042_v22  ;;  %v4182_v30 = vpop.f32.mrb[38].mxu0 }
0x103b   :  { %v4057_v43 = vadd.f32 %v4182_v30, %v4117_v14  ;;  %v4051_v27 = vpop.f32.mrb[39].mxu0 }
0x103c   :  { %v4052_v48 = vadd.f32 %v4117_v14, %v4051_v27 }
0x103d   :  { %4075 = vst [vmem:[#allocation13 + $0x28] sm:$0xff] %v4057_v43 }
0x103e   :  { %4074 = vst [vmem:[#allocation13 + $0x20] sm:$0xff] %v4052_v48 }
0x110b   :  { %v4185_v56 = vpop.f32.mrb[40].mxu0 }
0x110c   :  { %v4067_v57 = vadd.f32 %v4185_v56, %v4117_v14  ;;  %v4061_v59 = vpop.f32.mrb[41].mxu0 }
0x110d   :  { %v4062_v55 = vadd.f32 %v4117_v14, %v4061_v59 }
0x110e   :  { %4077 = vst [vmem:[#allocation13 + $0x38] sm:$0xff] %v4067_v57 }
0x110f   :  { %4076 = vst [vmem:[#allocation13 + $0x30] sm:$0xff] %v4062_v55 }
0x1110   :  { %5641 = shalt.err (!%p5638_p8)
}
0x1111   :  { %s5642_s17 = scalar_lea.hbm %s6839_s9, 1024 }
0x1112   :  { %p5643_p9 = scmp.ne.s32.totalorder %s6839_s9, %s5642_s17  ;;  %p5646_p10 = scmp.lt.u32.totalorder %s5642_s17, %s6839_s9 }
0x1114   :  { %p5648_p11 = pnand %p5646_p10, %p5643_p9 }
0x1116   :  { %5651 = shalt.err (!%p5648_p11)
}
0x1117   :  { %4089 = dma.vmem_to_hbm [thread:$0]  %s4084_s15, 1024, %s6839_s9, [#allocation7], %s5666_s5, %s5666_s5, %s5667_s21  }
0x1118   :  { %5658 = dma.done.wait [#allocation7], 1024  }
0x1119   :  { %5659 = vsyncadd [#allocation7], 4294966272 }
0x111a   :  { %4093 = vsyncpa [#allocation6], 1 }
0x111b   :  { %4094 = vsyncpa [#allocation9], 1 }
0x111c   :  { %4095 = vsyncpa [#allocation12], 1 }
0x111d   :  { %4096 = vsyncpa [#allocation7], 1 }

</bundles_post_ra>
